<compile_context>
chip_gen: v5e
topology: v5e:2x2
jax: 0.10.0
libtpu: 0.0.40
codegen_flags: <defaults>
</compile_context>

<pallas_src>
import jax
import jax.numpy as jnp
import numpy as np
from jax.experimental import pallas as pl
from jax.experimental.pallas import tpu as pltpu


def _round_up(x, m):
    return (x + m - 1) // m * m


def lstm_kernel(x_ref, wih_ref, whh_ref, b_ref, wfc_ref, bfc_ref, out_ref,
                gates_ref, h_carry_ref, c_carry_ref):
    Bt, Tc, D_in = x_ref.shape
    Hp = whh_ref.shape[0]          # lane-padded hidden size (multiple of 128)

    # ---- First T-chunk of each sequence: zero the recurrent carry. ----
    @pl.when(pl.program_id(1) == 0)
    def _():
        h_carry_ref[...] = jnp.zeros_like(h_carry_ref)
        c_carry_ref[...] = jnp.zeros_like(c_carry_ref)

    # ---- Prologue: hoisted input projection for the whole chunk. ----
    # (Bt*Tc, D_in) @ (D_in, 4Hp) in bf16 with f32 accumulation; combined
    # b_ih+b_hh bias folded in once.  Parked in VMEM scratch so only one
    # timestep row is live in vregs during the recurrence.
    # TODO(synk): pass x pre-cast to bf16 (and lane-dense) to halve the x DMA
    # once D_in is a 128-multiple; kept f32-in + in-kernel cast so the
    # leading-dim-merge reshape stays in Mosaic's well-supported set.
    x_flat = x_ref[...].reshape(Bt * Tc, D_in).astype(jnp.bfloat16)
    gates_x = (jnp.dot(x_flat, wih_ref[...], preferred_element_type=jnp.float32)
               + b_ref[...])
    gates_ref[...] = gates_x.reshape(Bt, Tc, 4 * Hp)
    # TODO(synk): for production block_t, tile this prologue matmul over
    # sub-chunks so the (Bt*Tc, 4Hp) value never has to be live at once.

    whh = whh_ref[...]     # (Hp, 4Hp) bf16 — resident across the chunk
    wfc = wfc_ref[...]     # (Hp, D_in) bf16
    bfc = bfc_ref[...]     # (1, D_in)  f32

    h = h_carry_ref[...]   # (Bt, Hp) bf16
    c = c_carry_ref[...]   # (Bt, Hp) f32

    # ---- Recurrence: static unroll over the chunk; h/c live in vregs. ----
    # TODO(synk): for block_t >> 32 switch to lax.fori_loop(..., unroll=4..8)
    # with a dynamic gates_ref row read to bound code size / compile time.
    for t in range(Tc):
        gates = gates_ref[:, t, :] + jnp.dot(
            h, whh, preferred_element_type=jnp.float32)          # (Bt, 4Hp) f32
        # Hp is a multiple of 128 -> lane-aligned gate slices (free split).
        i = jax.nn.sigmoid(gates[:, 0 * Hp:1 * Hp])
        f = jax.nn.sigmoid(gates[:, 1 * Hp:2 * Hp])
        g = jnp.tanh(gates[:, 2 * Hp:3 * Hp])
        o = jax.nn.sigmoid(gates[:, 3 * Hp:4 * Hp])
        c = f * c + i * g
        h = (o * jnp.tanh(c)).astype(jnp.bfloat16)
        # Per-timestep fc: independent of later steps (schedules off the
        # serial chain) and ends h_t's live range immediately.  The store
        # lands at a static lane offset of the lane-dense output slab, so the
        # HBM writeback DMA of the whole block is dense.
        y_t = jnp.dot(h, wfc, preferred_element_type=jnp.float32) + bfc
        out_ref[:, t * D_in:(t + 1) * D_in] = y_t.astype(out_ref.dtype)

    # ---- Carry h/c to the next T-chunk of this batch tile. ----
    h_carry_ref[...] = h
    c_carry_ref[...] = c


def lstm_model_forward(x, params, *, block_b=None, block_t=None):
    """x: (B, T, D_in) float32 (batch-first, like nn.LSTM(batch_first=True)).
    Returns (B, T, D_in) float32.
    block_b: batch tile (v7x: <= B//2 to use both TensorCores; multiple of 8
             in production).  block_t: T-chunk (bound VMEM for long seqs)."""
    B, T, D_in = x.shape
    Hp = params["whh_t"].shape[0]
    if block_b is None:
        block_b = B
    if block_t is None:
        block_t = T
    grid = (pl.cdiv(B, block_b), pl.cdiv(T, block_t))
    # NOTE: if block_b does not divide B, the padded rows of the last batch
    # tile run the recurrence on unspecified data — harmless, the output
    # writeback is clipped to the real rows.

    out2d = pl.pallas_call(
        lstm_kernel,
        out_shape=jax.ShapeDtypeStruct((B, T * D_in), jnp.float32),
        grid=grid,
        in_specs=[
            pl.BlockSpec((block_b, block_t, D_in), lambda b, t: (b, t, 0)),  # x
            pl.BlockSpec((D_in, 4 * Hp), lambda b, t: (0, 0)),   # W_ih^T (padded, bf16)
            pl.BlockSpec((Hp, 4 * Hp), lambda b, t: (0, 0)),     # W_hh^T (padded, bf16)
            pl.BlockSpec((1, 4 * Hp), lambda b, t: (0, 0)),      # b_ih + b_hh (f32)
            pl.BlockSpec((Hp, D_in), lambda b, t: (0, 0)),       # W_fc^T (padded, bf16)
            pl.BlockSpec((1, D_in), lambda b, t: (0, 0)),        # b_fc (f32)
        ],
        out_specs=pl.BlockSpec((block_b, block_t * D_in), lambda b, t: (b, t)),
        scratch_shapes=[
            pltpu.VMEM((block_b, block_t, 4 * Hp), jnp.float32),  # hoisted gates_x
            pltpu.VMEM((block_b, Hp), jnp.bfloat16),              # h carry
            pltpu.VMEM((block_b, Hp), jnp.float32),               # c carry
        ],
        compiler_params=pltpu.CompilerParams(
            dimension_semantics=("parallel", "arbitrary"),
            vmem_limit_bytes=64 * 1024 * 1024),
    )(x, params["wih_t"], params["whh_t"], params["b"],
      params["wfc_t"], params["bfc"])
    return out2d.reshape(B, T, D_in)   # free metadata reshape in XLA


def init_params(key, input_size, hidden_size):
    """PyTorch-style init (uniform +/- 1/sqrt(H)), packed for the kernel:
    per-gate blocks lane-padded to Hp (multiple of 128; pads are zero so the
    math is unchanged), matmul weights cast to bf16 (MXU-native), biases f32."""
    ks = jax.random.split(key, 6)
    H = hidden_size
    Hp = _round_up(max(H, 128), 128)
    bound = 1.0 / np.sqrt(H)

    w_ih = jax.random.uniform(ks[0], (4 * H, input_size), jnp.float32, -bound, bound)
    w_hh = jax.random.uniform(ks[1], (4 * H, H), jnp.float32, -bound, bound)
    b_ih = jax.random.uniform(ks[2], (4 * H,), jnp.float32, -bound, bound)
    b_hh = jax.random.uniform(ks[3], (4 * H,), jnp.float32, -bound, bound)
    w_fc = jax.random.uniform(ks[4], (input_size, H), jnp.float32, -bound, bound)
    b_fc = jax.random.uniform(ks[5], (input_size,), jnp.float32, -bound, bound)

    wih_t = jnp.zeros((input_size, 4 * Hp), jnp.float32)
    whh_t = jnp.zeros((Hp, 4 * Hp), jnp.float32)
    bias = jnp.zeros((1, 4 * Hp), jnp.float32)
    for k in range(4):  # PyTorch gate order: i, f, g, o
        wih_t = wih_t.at[:, k * Hp:k * Hp + H].set(w_ih[k * H:(k + 1) * H, :].T)
        whh_t = whh_t.at[:H, k * Hp:k * Hp + H].set(w_hh[k * H:(k + 1) * H, :].T)
        bias = bias.at[0, k * Hp:k * Hp + H].set(
            b_ih[k * H:(k + 1) * H] + b_hh[k * H:(k + 1) * H])
    wfc_t = jnp.zeros((Hp, input_size), jnp.float32).at[:H, :].set(w_fc.T)

    return {
        "wih_t": wih_t.astype(jnp.bfloat16),    # (D_in, 4Hp)
        "whh_t": whh_t.astype(jnp.bfloat16),    # (Hp, 4Hp)
        "b": bias,                              # (1, 4Hp)  f32
        "wfc_t": wfc_t.astype(jnp.bfloat16),    # (Hp, D_in)
        "bfc": b_fc.reshape(1, -1),             # (1, D_in) f32
    }


def reference_forward(x, params):
    """Pure-JAX (lax.scan) reference mirroring the kernel's numerics: same
    bf16-rounded weights / bf16 matmul inputs, f32 accumulation, f32 gate
    math.  The zero lane padding leaves the LSTM + Linear math unchanged."""
    B, T, D_in = x.shape
    Hp = params["whh_t"].shape[0]
    wih, whh, wfc = params["wih_t"], params["whh_t"], params["wfc_t"]
    b, bfc = params["b"], params["bfc"]
    x_bf16 = x.astype(jnp.bfloat16)

    def step(carry, x_t):
        h, c = carry                       # h: (B, Hp) bf16, c: (B, Hp) f32
        gates = (jnp.dot(x_t, wih, preferred_element_type=jnp.float32)
                 + jnp.dot(h, whh, preferred_element_type=jnp.float32) + b)
        i = jax.nn.sigmoid(gates[:, 0 * Hp:1 * Hp])
        f = jax.nn.sigmoid(gates[:, 1 * Hp:2 * Hp])
        g = jnp.tanh(gates[:, 2 * Hp:3 * Hp])
        o = jax.nn.sigmoid(gates[:, 3 * Hp:4 * Hp])
        c_new = f * c + i * g
        h_new = (o * jnp.tanh(c_new)).astype(jnp.bfloat16)
        y_t = jnp.dot(h_new, wfc, preferred_element_type=jnp.float32) + bfc
        return (h_new, c_new), y_t

    h0 = jnp.zeros((B, Hp), jnp.bfloat16)
    c0 = jnp.zeros((B, Hp), jnp.float32)
    _, ys = jax.lax.scan(step, (h0, c0), jnp.transpose(x_bf16, (1, 0, 2)))
    return jnp.transpose(ys, (1, 0, 2))    # (B, T, D_in)


if __name__ == "__main__":
    B, T, D_in, H = 2, 8, 16, 32

    key = jax.random.PRNGKey(0)
    k_x, k_p = jax.random.split(key)
    x = jax.random.normal(k_x, (B, T, D_in), jnp.float32)
    params = init_params(k_p, D_in, H)

    out = lstm_model_forward(x, params)
    out = jax.block_until_ready(out)

    ref = reference_forward(x, params)
    # Kernel and reference share the same bf16-rounded weights and f32
    # accumulation; the residual gap is accumulation order plus rare one-ulp
    # bf16 rounding flips of h on the recurrent path.
    np.testing.assert_allclose(np.asarray(out), np.asarray(ref),
                               rtol=2e-2, atol=2e-3)

    print("KERNEL_OK")
</pallas_src>

<mosaic_0001>
module attributes {stable_mosaic.version = 11 : i64} {
  func.func @lstm_kernel(%arg0: i32, %arg1: i32, %arg2: memref<2x8x16xf32, #tpu.memory_space<vmem>>, %arg3: memref<16x512xbf16, #tpu.memory_space<vmem>>, %arg4: memref<128x512xbf16, #tpu.memory_space<vmem>>, %arg5: memref<1x512xf32, #tpu.memory_space<vmem>>, %arg6: memref<128x16xbf16, #tpu.memory_space<vmem>>, %arg7: memref<1x16xf32, #tpu.memory_space<vmem>>, %arg8: memref<2x128xf32, #tpu.memory_space<vmem>>, %arg9: memref<2x8x512xf32, #tpu.memory_space<vmem>>, %arg10: memref<2x128xbf16, #tpu.memory_space<vmem>>, %arg11: memref<2x128xf32, #tpu.memory_space<vmem>>) attributes {dimension_semantics = [#tpu.dimension_semantics<parallel>, #tpu.dimension_semantics<arbitrary>], iteration_bounds = array<i64: 1, 1>, scalar_prefetch = 0 : i64, scratch_operands = 3 : i64, tpu.core_type = #tpu.core_type<tc>, window_params = [{transform_indices = @transform_0, window_bounds = array<i64: 2, 8, 16>}, {pipeline_mode = #tpu.pipeline_mode<synchronous>, transform_indices = @transform_1, window_bounds = array<i64: 16, 512>}, {pipeline_mode = #tpu.pipeline_mode<synchronous>, transform_indices = @transform_2, window_bounds = array<i64: 128, 512>}, {pipeline_mode = #tpu.pipeline_mode<synchronous>, transform_indices = @transform_3, window_bounds = array<i64: 1, 512>}, {pipeline_mode = #tpu.pipeline_mode<synchronous>, transform_indices = @transform_4, window_bounds = array<i64: 128, 16>}, {pipeline_mode = #tpu.pipeline_mode<synchronous>, transform_indices = @transform_5, window_bounds = array<i64: 1, 16>}, {transform_indices = @transform_6, window_bounds = array<i64: 2, 128>}]} {
    %c0_i32 = arith.constant 0 : i32
    %0 = arith.cmpi eq, %arg1, %c0_i32 : i32
    %1 = arith.extui %0 : i1 to i32
    %c0_i32_0 = arith.constant 0 : i32
    %2 = arith.cmpi ne, %1, %c0_i32_0 : i32
    scf.if %2 {
      %cst_90 = arith.constant 0.000000e+00 : bf16
      %292 = vector.broadcast %cst_90 : bf16 to vector<2x128xbf16>
      %c0_91 = arith.constant 0 : index
      %c0_92 = arith.constant 0 : index
      %293 = vector.load %arg10[%c0_91, %c0_92] : memref<2x128xbf16, #tpu.memory_space<vmem>>, vector<2x128xbf16>
      tpu.vector_store %arg10[%c0_91, %c0_92], %292 {strides = array<i32>} : memref<2x128xbf16, #tpu.memory_space<vmem>>, vector<2x128xbf16>,
      %cst_93 = arith.constant 0.000000e+00 : f32
      %294 = vector.broadcast %cst_93 : f32 to vector<2x128xf32>
      %c0_94 = arith.constant 0 : index
      %c0_95 = arith.constant 0 : index
      %295 = vector.load %arg11[%c0_94, %c0_95] : memref<2x128xf32, #tpu.memory_space<vmem>>, vector<2x128xf32>
      tpu.vector_store %arg11[%c0_94, %c0_95], %294 {strides = array<i32>} : memref<2x128xf32, #tpu.memory_space<vmem>>, vector<2x128xf32>,
    } else {
    }
    %c0 = arith.constant 0 : index
    %c0_1 = arith.constant 0 : index
    %c0_2 = arith.constant 0 : index
    %3 = vector.load %arg2[%c0, %c0_1, %c0_2] : memref<2x8x16xf32, #tpu.memory_space<vmem>>, vector<2x8x16xf32>
    %4 = vector.shape_cast %3 : vector<2x8x16xf32> to vector<16x16xf32>
    %5 = arith.truncf %4 : vector<16x16xf32> to vector<16x16xbf16>
    %c0_3 = arith.constant 0 : index
    %c0_4 = arith.constant 0 : index
    %6 = vector.load %arg3[%c0_3, %c0_4] : memref<16x512xbf16, #tpu.memory_space<vmem>>, vector<16x512xbf16>
    %cst = arith.constant dense<0.000000e+00> : vector<16x512xf32>
    %7 = tpu.matmul %5, %6, %cst {dimension_numbers = #tpu.dot_dimension_numbers<[1], [0], [0], [1], [0, 0, 1, 1], [], []>} : vector<16x16xbf16>, vector<16x512xbf16>, vector<16x512xf32> -> vector<16x512xf32>
    %c0_5 = arith.constant 0 : index
    %c0_6 = arith.constant 0 : index
    %8 = vector.load %arg5[%c0_5, %c0_6] : memref<1x512xf32, #tpu.memory_space<vmem>>, vector<1x512xf32>
    %9 = vector.broadcast %8 : vector<1x512xf32> to vector<16x512xf32>
    %10 = arith.addf %7, %9 : vector<16x512xf32>
    %11 = vector.shape_cast %10 : vector<16x512xf32> to vector<2x8x512xf32>
    %c0_7 = arith.constant 0 : index
    %c0_8 = arith.constant 0 : index
    %c0_9 = arith.constant 0 : index
    %12 = vector.load %arg9[%c0_7, %c0_8, %c0_9] : memref<2x8x512xf32, #tpu.memory_space<vmem>>, vector<2x8x512xf32>
    tpu.vector_store %arg9[%c0_7, %c0_8, %c0_9], %11 {strides = array<i32>} : memref<2x8x512xf32, #tpu.memory_space<vmem>>, vector<2x8x512xf32>,
    %c0_10 = arith.constant 0 : index
    %c0_11 = arith.constant 0 : index
    %13 = vector.load %arg4[%c0_10, %c0_11] : memref<128x512xbf16, #tpu.memory_space<vmem>>, vector<128x512xbf16>
    %c0_12 = arith.constant 0 : index
    %c0_13 = arith.constant 0 : index
    %14 = vector.load %arg6[%c0_12, %c0_13] : memref<128x16xbf16, #tpu.memory_space<vmem>>, vector<128x16xbf16>
    %c0_14 = arith.constant 0 : index
    %c0_15 = arith.constant 0 : index
    %15 = vector.load %arg7[%c0_14, %c0_15] : memref<1x16xf32, #tpu.memory_space<vmem>>, vector<1x16xf32>
    %c0_16 = arith.constant 0 : index
    %c0_17 = arith.constant 0 : index
    %16 = vector.load %arg10[%c0_16, %c0_17] : memref<2x128xbf16, #tpu.memory_space<vmem>>, vector<2x128xbf16>
    %c0_18 = arith.constant 0 : index
    %c0_19 = arith.constant 0 : index
    %17 = vector.load %arg11[%c0_18, %c0_19] : memref<2x128xf32, #tpu.memory_space<vmem>>, vector<2x128xf32>
    %c0_20 = arith.constant 0 : index
    %c0_21 = arith.constant 0 : index
    %c0_22 = arith.constant 0 : index
    %18 = vector.load %arg9[%c0_20, %c0_21, %c0_22] : memref<2x8x512xf32, #tpu.memory_space<vmem>>, vector<2x1x512xf32>
    %19 = vector.shape_cast %18 : vector<2x1x512xf32> to vector<2x512xf32>
    %cst_23 = arith.constant dense<0.000000e+00> : vector<2x512xf32>
    %20 = tpu.matmul %16, %13, %cst_23 {dimension_numbers = #tpu.dot_dimension_numbers<[1], [0], [0], [1], [0, 0, 1, 1], [], []>} : vector<2x128xbf16>, vector<128x512xbf16>, vector<2x512xf32> -> vector<2x512xf32>
    %21 = arith.addf %19, %20 : vector<2x512xf32>
    %22 = vector.extract_strided_slice %21 {offsets = [0, 0], sizes = [2, 128], strides = [1, 1]} : vector<2x512xf32> to vector<2x128xf32>
    %23 = arith.negf %22 : vector<2x128xf32>
    %24 = math.exp %23 : vector<2x128xf32>
    %cst_24 = arith.constant 1.000000e+00 : f32
    %25 = vector.broadcast %cst_24 : f32 to vector<2x128xf32>
    %26 = arith.addf %25, %24 : vector<2x128xf32>
    %27 = arith.divf %25, %26 : vector<2x128xf32>
    %28 = vector.extract_strided_slice %21 {offsets = [0, 128], sizes = [2, 128], strides = [1, 1]} : vector<2x512xf32> to vector<2x128xf32>
    %29 = arith.negf %28 : vector<2x128xf32>
    %30 = math.exp %29 : vector<2x128xf32>
    %cst_25 = arith.constant 1.000000e+00 : f32
    %31 = vector.broadcast %cst_25 : f32 to vector<2x128xf32>
    %32 = arith.addf %31, %30 : vector<2x128xf32>
    %33 = arith.divf %31, %32 : vector<2x128xf32>
    %34 = vector.extract_strided_slice %21 {offsets = [0, 256], sizes = [2, 128], strides = [1, 1]} : vector<2x512xf32> to vector<2x128xf32>
    %35 = math.tanh %34 : vector<2x128xf32>
    %36 = vector.extract_strided_slice %21 {offsets = [0, 384], sizes = [2, 128], strides = [1, 1]} : vector<2x512xf32> to vector<2x128xf32>
    %37 = arith.negf %36 : vector<2x128xf32>
    %38 = math.exp %37 : vector<2x128xf32>
    %cst_26 = arith.constant 1.000000e+00 : f32
    %39 = vector.broadcast %cst_26 : f32 to vector<2x128xf32>
    %40 = arith.addf %39, %38 : vector<2x128xf32>
    %41 = arith.divf %39, %40 : vector<2x128xf32>
    %42 = arith.mulf %33, %17 : vector<2x128xf32>
    %43 = arith.mulf %27, %35 : vector<2x128xf32>
    %44 = arith.addf %42, %43 : vector<2x128xf32>
    %45 = math.tanh %44 : vector<2x128xf32>
    %46 = arith.mulf %41, %45 : vector<2x128xf32>
    %47 = arith.truncf %46 : vector<2x128xf32> to vector<2x128xbf16>
    %cst_27 = arith.constant dense<0.000000e+00> : vector<2x16xf32>
    %48 = tpu.matmul %47, %14, %cst_27 {dimension_numbers = #tpu.dot_dimension_numbers<[1], [0], [0], [1], [0, 0, 1, 1], [], []>} : vector<2x128xbf16>, vector<128x16xbf16>, vector<2x16xf32> -> vector<2x16xf32>
    %49 = vector.broadcast %15 : vector<1x16xf32> to vector<2x16xf32>
    %50 = arith.addf %48, %49 : vector<2x16xf32>
    %c0_28 = arith.constant 0 : index
    %c0_29 = arith.constant 0 : index
    %51 = vector.load %arg8[%c0_28, %c0_29] : memref<2x128xf32, #tpu.memory_space<vmem>>, vector<2x16xf32>
    tpu.vector_store %arg8[%c0_28, %c0_29], %50 {strides = array<i32>} : memref<2x128xf32, #tpu.memory_space<vmem>>, vector<2x16xf32>,
    %c0_30 = arith.constant 0 : index
    %c1 = arith.constant 1 : index
    %c0_31 = arith.constant 0 : index
    %52 = vector.load %arg9[%c0_30, %c1, %c0_31] : memref<2x8x512xf32, #tpu.memory_space<vmem>>, vector<2x1x512xf32>
    %53 = vector.shape_cast %52 : vector<2x1x512xf32> to vector<2x512xf32>
    %cst_32 = arith.constant dense<0.000000e+00> : vector<2x512xf32>
    %54 = tpu.matmul %47, %13, %cst_32 {dimension_numbers = #tpu.dot_dimension_numbers<[1], [0], [0], [1], [0, 0, 1, 1], [], []>} : vector<2x128xbf16>, vector<128x512xbf16>, vector<2x512xf32> -> vector<2x512xf32>
    %55 = arith.addf %53, %54 : vector<2x512xf32>
    %56 = vector.extract_strided_slice %55 {offsets = [0, 0], sizes = [2, 128], strides = [1, 1]} : vector<2x512xf32> to vector<2x128xf32>
    %57 = arith.negf %56 : vector<2x128xf32>
    %58 = math.exp %57 : vector<2x128xf32>
    %cst_33 = arith.constant 1.000000e+00 : f32
    %59 = vector.broadcast %cst_33 : f32 to vector<2x128xf32>
    %60 = arith.addf %59, %58 : vector<2x128xf32>
    %61 = arith.divf %59, %60 : vector<2x128xf32>
    %62 = vector.extract_strided_slice %55 {offsets = [0, 128], sizes = [2, 128], strides = [1, 1]} : vector<2x512xf32> to vector<2x128xf32>
    %63 = arith.negf %62 : vector<2x128xf32>
    %64 = math.exp %63 : vector<2x128xf32>
    %cst_34 = arith.constant 1.000000e+00 : f32
    %65 = vector.broadcast %cst_34 : f32 to vector<2x128xf32>
    %66 = arith.addf %65, %64 : vector<2x128xf32>
    %67 = arith.divf %65, %66 : vector<2x128xf32>
    %68 = vector.extract_strided_slice %55 {offsets = [0, 256], sizes = [2, 128], strides = [1, 1]} : vector<2x512xf32> to vector<2x128xf32>
    %69 = math.tanh %68 : vector<2x128xf32>
    %70 = vector.extract_strided_slice %55 {offsets = [0, 384], sizes = [2, 128], strides = [1, 1]} : vector<2x512xf32> to vector<2x128xf32>
    %71 = arith.negf %70 : vector<2x128xf32>
    %72 = math.exp %71 : vector<2x128xf32>
    %cst_35 = arith.constant 1.000000e+00 : f32
    %73 = vector.broadcast %cst_35 : f32 to vector<2x128xf32>
    %74 = arith.addf %73, %72 : vector<2x128xf32>
    %75 = arith.divf %73, %74 : vector<2x128xf32>
    %76 = arith.mulf %67, %44 : vector<2x128xf32>
    %77 = arith.mulf %61, %69 : vector<2x128xf32>
    %78 = arith.addf %76, %77 : vector<2x128xf32>
    %79 = math.tanh %78 : vector<2x128xf32>
    %80 = arith.mulf %75, %79 : vector<2x128xf32>
    %81 = arith.truncf %80 : vector<2x128xf32> to vector<2x128xbf16>
    %cst_36 = arith.constant dense<0.000000e+00> : vector<2x16xf32>
    %82 = tpu.matmul %81, %14, %cst_36 {dimension_numbers = #tpu.dot_dimension_numbers<[1], [0], [0], [1], [0, 0, 1, 1], [], []>} : vector<2x128xbf16>, vector<128x16xbf16>, vector<2x16xf32> -> vector<2x16xf32>
    %83 = vector.broadcast %15 : vector<1x16xf32> to vector<2x16xf32>
    %84 = arith.addf %82, %83 : vector<2x16xf32>
    %c0_37 = arith.constant 0 : index
    %c16 = arith.constant 16 : index
    %85 = vector.load %arg8[%c0_37, %c16] : memref<2x128xf32, #tpu.memory_space<vmem>>, vector<2x16xf32>
    tpu.vector_store %arg8[%c0_37, %c16], %84 {strides = array<i32>} : memref<2x128xf32, #tpu.memory_space<vmem>>, vector<2x16xf32>,
    %c0_38 = arith.constant 0 : index
    %c2 = arith.constant 2 : index
    %c0_39 = arith.constant 0 : index
    %86 = vector.load %arg9[%c0_38, %c2, %c0_39] : memref<2x8x512xf32, #tpu.memory_space<vmem>>, vector<2x1x512xf32>
    %87 = vector.shape_cast %86 : vector<2x1x512xf32> to vector<2x512xf32>
    %cst_40 = arith.constant dense<0.000000e+00> : vector<2x512xf32>
    %88 = tpu.matmul %81, %13, %cst_40 {dimension_numbers = #tpu.dot_dimension_numbers<[1], [0], [0], [1], [0, 0, 1, 1], [], []>} : vector<2x128xbf16>, vector<128x512xbf16>, vector<2x512xf32> -> vector<2x512xf32>
    %89 = arith.addf %87, %88 : vector<2x512xf32>
    %90 = vector.extract_strided_slice %89 {offsets = [0, 0], sizes = [2, 128], strides = [1, 1]} : vector<2x512xf32> to vector<2x128xf32>
    %91 = arith.negf %90 : vector<2x128xf32>
    %92 = math.exp %91 : vector<2x128xf32>
    %cst_41 = arith.constant 1.000000e+00 : f32
    %93 = vector.broadcast %cst_41 : f32 to vector<2x128xf32>
    %94 = arith.addf %93, %92 : vector<2x128xf32>
    %95 = arith.divf %93, %94 : vector<2x128xf32>
    %96 = vector.extract_strided_slice %89 {offsets = [0, 128], sizes = [2, 128], strides = [1, 1]} : vector<2x512xf32> to vector<2x128xf32>
    %97 = arith.negf %96 : vector<2x128xf32>
    %98 = math.exp %97 : vector<2x128xf32>
    %cst_42 = arith.constant 1.000000e+00 : f32
    %99 = vector.broadcast %cst_42 : f32 to vector<2x128xf32>
    %100 = arith.addf %99, %98 : vector<2x128xf32>
    %101 = arith.divf %99, %100 : vector<2x128xf32>
    %102 = vector.extract_strided_slice %89 {offsets = [0, 256], sizes = [2, 128], strides = [1, 1]} : vector<2x512xf32> to vector<2x128xf32>
    %103 = math.tanh %102 : vector<2x128xf32>
    %104 = vector.extract_strided_slice %89 {offsets = [0, 384], sizes = [2, 128], strides = [1, 1]} : vector<2x512xf32> to vector<2x128xf32>
    %105 = arith.negf %104 : vector<2x128xf32>
    %106 = math.exp %105 : vector<2x128xf32>
    %cst_43 = arith.constant 1.000000e+00 : f32
    %107 = vector.broadcast %cst_43 : f32 to vector<2x128xf32>
    %108 = arith.addf %107, %106 : vector<2x128xf32>
    %109 = arith.divf %107, %108 : vector<2x128xf32>
    %110 = arith.mulf %101, %78 : vector<2x128xf32>
    %111 = arith.mulf %95, %103 : vector<2x128xf32>
    %112 = arith.addf %110, %111 : vector<2x128xf32>
    %113 = math.tanh %112 : vector<2x128xf32>
    %114 = arith.mulf %109, %113 : vector<2x128xf32>
    %115 = arith.truncf %114 : vector<2x128xf32> to vector<2x128xbf16>
    %cst_44 = arith.constant dense<0.000000e+00> : vector<2x16xf32>
    %116 = tpu.matmul %115, %14, %cst_44 {dimension_numbers = #tpu.dot_dimension_numbers<[1], [0], [0], [1], [0, 0, 1, 1], [], []>} : vector<2x128xbf16>, vector<128x16xbf16>, vector<2x16xf32> -> vector<2x16xf32>
    %117 = vector.broadcast %15 : vector<1x16xf32> to vector<2x16xf32>
    %118 = arith.addf %116, %117 : vector<2x16xf32>
    %c0_45 = arith.constant 0 : index
    %c32 = arith.constant 32 : index
    %119 = vector.load %arg8[%c0_45, %c32] : memref<2x128xf32, #tpu.memory_space<vmem>>, vector<2x16xf32>
    tpu.vector_store %arg8[%c0_45, %c32], %118 {strides = array<i32>} : memref<2x128xf32, #tpu.memory_space<vmem>>, vector<2x16xf32>,
    %c0_46 = arith.constant 0 : index
    %c3 = arith.constant 3 : index
    %c0_47 = arith.constant 0 : index
    %120 = vector.load %arg9[%c0_46, %c3, %c0_47] : memref<2x8x512xf32, #tpu.memory_space<vmem>>, vector<2x1x512xf32>
    %121 = vector.shape_cast %120 : vector<2x1x512xf32> to vector<2x512xf32>
    %cst_48 = arith.constant dense<0.000000e+00> : vector<2x512xf32>
    %122 = tpu.matmul %115, %13, %cst_48 {dimension_numbers = #tpu.dot_dimension_numbers<[1], [0], [0], [1], [0, 0, 1, 1], [], []>} : vector<2x128xbf16>, vector<128x512xbf16>, vector<2x512xf32> -> vector<2x512xf32>
    %123 = arith.addf %121, %122 : vector<2x512xf32>
    %124 = vector.extract_strided_slice %123 {offsets = [0, 0], sizes = [2, 128], strides = [1, 1]} : vector<2x512xf32> to vector<2x128xf32>
    %125 = arith.negf %124 : vector<2x128xf32>
    %126 = math.exp %125 : vector<2x128xf32>
    %cst_49 = arith.constant 1.000000e+00 : f32
    %127 = vector.broadcast %cst_49 : f32 to vector<2x128xf32>
    %128 = arith.addf %127, %126 : vector<2x128xf32>
    %129 = arith.divf %127, %128 : vector<2x128xf32>
    %130 = vector.extract_strided_slice %123 {offsets = [0, 128], sizes = [2, 128], strides = [1, 1]} : vector<2x512xf32> to vector<2x128xf32>
    %131 = arith.negf %130 : vector<2x128xf32>
    %132 = math.exp %131 : vector<2x128xf32>
    %cst_50 = arith.constant 1.000000e+00 : f32
    %133 = vector.broadcast %cst_50 : f32 to vector<2x128xf32>
    %134 = arith.addf %133, %132 : vector<2x128xf32>
    %135 = arith.divf %133, %134 : vector<2x128xf32>
    %136 = vector.extract_strided_slice %123 {offsets = [0, 256], sizes = [2, 128], strides = [1, 1]} : vector<2x512xf32> to vector<2x128xf32>
    %137 = math.tanh %136 : vector<2x128xf32>
    %138 = vector.extract_strided_slice %123 {offsets = [0, 384], sizes = [2, 128], strides = [1, 1]} : vector<2x512xf32> to vector<2x128xf32>
    %139 = arith.negf %138 : vector<2x128xf32>
    %140 = math.exp %139 : vector<2x128xf32>
    %cst_51 = arith.constant 1.000000e+00 : f32
    %141 = vector.broadcast %cst_51 : f32 to vector<2x128xf32>
    %142 = arith.addf %141, %140 : vector<2x128xf32>
    %143 = arith.divf %141, %142 : vector<2x128xf32>
    %144 = arith.mulf %135, %112 : vector<2x128xf32>
    %145 = arith.mulf %129, %137 : vector<2x128xf32>
    %146 = arith.addf %144, %145 : vector<2x128xf32>
    %147 = math.tanh %146 : vector<2x128xf32>
    %148 = arith.mulf %143, %147 : vector<2x128xf32>
    %149 = arith.truncf %148 : vector<2x128xf32> to vector<2x128xbf16>
    %cst_52 = arith.constant dense<0.000000e+00> : vector<2x16xf32>
    %150 = tpu.matmul %149, %14, %cst_52 {dimension_numbers = #tpu.dot_dimension_numbers<[1], [0], [0], [1], [0, 0, 1, 1], [], []>} : vector<2x128xbf16>, vector<128x16xbf16>, vector<2x16xf32> -> vector<2x16xf32>
    %151 = vector.broadcast %15 : vector<1x16xf32> to vector<2x16xf32>
    %152 = arith.addf %150, %151 : vector<2x16xf32>
    %c0_53 = arith.constant 0 : index
    %c48 = arith.constant 48 : index
    %153 = vector.load %arg8[%c0_53, %c48] : memref<2x128xf32, #tpu.memory_space<vmem>>, vector<2x16xf32>
    tpu.vector_store %arg8[%c0_53, %c48], %152 {strides = array<i32>} : memref<2x128xf32, #tpu.memory_space<vmem>>, vector<2x16xf32>,
    %c0_54 = arith.constant 0 : index
    %c4 = arith.constant 4 : index
    %c0_55 = arith.constant 0 : index
    %154 = vector.load %arg9[%c0_54, %c4, %c0_55] : memref<2x8x512xf32, #tpu.memory_space<vmem>>, vector<2x1x512xf32>
    %155 = vector.shape_cast %154 : vector<2x1x512xf32> to vector<2x512xf32>
    %cst_56 = arith.constant dense<0.000000e+00> : vector<2x512xf32>
    %156 = tpu.matmul %149, %13, %cst_56 {dimension_numbers = #tpu.dot_dimension_numbers<[1], [0], [0], [1], [0, 0, 1, 1], [], []>} : vector<2x128xbf16>, vector<128x512xbf16>, vector<2x512xf32> -> vector<2x512xf32>
    %157 = arith.addf %155, %156 : vector<2x512xf32>
    %158 = vector.extract_strided_slice %157 {offsets = [0, 0], sizes = [2, 128], strides = [1, 1]} : vector<2x512xf32> to vector<2x128xf32>
    %159 = arith.negf %158 : vector<2x128xf32>
    %160 = math.exp %159 : vector<2x128xf32>
    %cst_57 = arith.constant 1.000000e+00 : f32
    %161 = vector.broadcast %cst_57 : f32 to vector<2x128xf32>
    %162 = arith.addf %161, %160 : vector<2x128xf32>
    %163 = arith.divf %161, %162 : vector<2x128xf32>
    %164 = vector.extract_strided_slice %157 {offsets = [0, 128], sizes = [2, 128], strides = [1, 1]} : vector<2x512xf32> to vector<2x128xf32>
    %165 = arith.negf %164 : vector<2x128xf32>
    %166 = math.exp %165 : vector<2x128xf32>
    %cst_58 = arith.constant 1.000000e+00 : f32
    %167 = vector.broadcast %cst_58 : f32 to vector<2x128xf32>
    %168 = arith.addf %167, %166 : vector<2x128xf32>
    %169 = arith.divf %167, %168 : vector<2x128xf32>
    %170 = vector.extract_strided_slice %157 {offsets = [0, 256], sizes = [2, 128], strides = [1, 1]} : vector<2x512xf32> to vector<2x128xf32>
    %171 = math.tanh %170 : vector<2x128xf32>
    %172 = vector.extract_strided_slice %157 {offsets = [0, 384], sizes = [2, 128], strides = [1, 1]} : vector<2x512xf32> to vector<2x128xf32>
    %173 = arith.negf %172 : vector<2x128xf32>
    %174 = math.exp %173 : vector<2x128xf32>
    %cst_59 = arith.constant 1.000000e+00 : f32
    %175 = vector.broadcast %cst_59 : f32 to vector<2x128xf32>
    %176 = arith.addf %175, %174 : vector<2x128xf32>
    %177 = arith.divf %175, %176 : vector<2x128xf32>
    %178 = arith.mulf %169, %146 : vector<2x128xf32>
    %179 = arith.mulf %163, %171 : vector<2x128xf32>
    %180 = arith.addf %178, %179 : vector<2x128xf32>
    %181 = math.tanh %180 : vector<2x128xf32>
    %182 = arith.mulf %177, %181 : vector<2x128xf32>
    %183 = arith.truncf %182 : vector<2x128xf32> to vector<2x128xbf16>
    %cst_60 = arith.constant dense<0.000000e+00> : vector<2x16xf32>
    %184 = tpu.matmul %183, %14, %cst_60 {dimension_numbers = #tpu.dot_dimension_numbers<[1], [0], [0], [1], [0, 0, 1, 1], [], []>} : vector<2x128xbf16>, vector<128x16xbf16>, vector<2x16xf32> -> vector<2x16xf32>
    %185 = vector.broadcast %15 : vector<1x16xf32> to vector<2x16xf32>
    %186 = arith.addf %184, %185 : vector<2x16xf32>
    %c0_61 = arith.constant 0 : index
    %c64 = arith.constant 64 : index
    %187 = vector.load %arg8[%c0_61, %c64] : memref<2x128xf32, #tpu.memory_space<vmem>>, vector<2x16xf32>
    tpu.vector_store %arg8[%c0_61, %c64], %186 {strides = array<i32>} : memref<2x128xf32, #tpu.memory_space<vmem>>, vector<2x16xf32>,
    %c0_62 = arith.constant 0 : index
    %c5 = arith.constant 5 : index
    %c0_63 = arith.constant 0 : index
    %188 = vector.load %arg9[%c0_62, %c5, %c0_63] : memref<2x8x512xf32, #tpu.memory_space<vmem>>, vector<2x1x512xf32>
    %189 = vector.shape_cast %188 : vector<2x1x512xf32> to vector<2x512xf32>
    %cst_64 = arith.constant dense<0.000000e+00> : vector<2x512xf32>
    %190 = tpu.matmul %183, %13, %cst_64 {dimension_numbers = #tpu.dot_dimension_numbers<[1], [0], [0], [1], [0, 0, 1, 1], [], []>} : vector<2x128xbf16>, vector<128x512xbf16>, vector<2x512xf32> -> vector<2x512xf32>
    %191 = arith.addf %189, %190 : vector<2x512xf32>
    %192 = vector.extract_strided_slice %191 {offsets = [0, 0], sizes = [2, 128], strides = [1, 1]} : vector<2x512xf32> to vector<2x128xf32>
    %193 = arith.negf %192 : vector<2x128xf32>
    %194 = math.exp %193 : vector<2x128xf32>
    %cst_65 = arith.constant 1.000000e+00 : f32
    %195 = vector.broadcast %cst_65 : f32 to vector<2x128xf32>
    %196 = arith.addf %195, %194 : vector<2x128xf32>
    %197 = arith.divf %195, %196 : vector<2x128xf32>
    %198 = vector.extract_strided_slice %191 {offsets = [0, 128], sizes = [2, 128], strides = [1, 1]} : vector<2x512xf32> to vector<2x128xf32>
    %199 = arith.negf %198 : vector<2x128xf32>
    %200 = math.exp %199 : vector<2x128xf32>
    %cst_66 = arith.constant 1.000000e+00 : f32
    %201 = vector.broadcast %cst_66 : f32 to vector<2x128xf32>
    %202 = arith.addf %201, %200 : vector<2x128xf32>
    %203 = arith.divf %201, %202 : vector<2x128xf32>
    %204 = vector.extract_strided_slice %191 {offsets = [0, 256], sizes = [2, 128], strides = [1, 1]} : vector<2x512xf32> to vector<2x128xf32>
    %205 = math.tanh %204 : vector<2x128xf32>
    %206 = vector.extract_strided_slice %191 {offsets = [0, 384], sizes = [2, 128], strides = [1, 1]} : vector<2x512xf32> to vector<2x128xf32>
    %207 = arith.negf %206 : vector<2x128xf32>
    %208 = math.exp %207 : vector<2x128xf32>
    %cst_67 = arith.constant 1.000000e+00 : f32
    %209 = vector.broadcast %cst_67 : f32 to vector<2x128xf32>
    %210 = arith.addf %209, %208 : vector<2x128xf32>
    %211 = arith.divf %209, %210 : vector<2x128xf32>
    %212 = arith.mulf %203, %180 : vector<2x128xf32>
    %213 = arith.mulf %197, %205 : vector<2x128xf32>
    %214 = arith.addf %212, %213 : vector<2x128xf32>
    %215 = math.tanh %214 : vector<2x128xf32>
    %216 = arith.mulf %211, %215 : vector<2x128xf32>
    %217 = arith.truncf %216 : vector<2x128xf32> to vector<2x128xbf16>
    %cst_68 = arith.constant dense<0.000000e+00> : vector<2x16xf32>
    %218 = tpu.matmul %217, %14, %cst_68 {dimension_numbers = #tpu.dot_dimension_numbers<[1], [0], [0], [1], [0, 0, 1, 1], [], []>} : vector<2x128xbf16>, vector<128x16xbf16>, vector<2x16xf32> -> vector<2x16xf32>
    %219 = vector.broadcast %15 : vector<1x16xf32> to vector<2x16xf32>
    %220 = arith.addf %218, %219 : vector<2x16xf32>
    %c0_69 = arith.constant 0 : index
    %c80 = arith.constant 80 : index
    %221 = vector.load %arg8[%c0_69, %c80] : memref<2x128xf32, #tpu.memory_space<vmem>>, vector<2x16xf32>
    tpu.vector_store %arg8[%c0_69, %c80], %220 {strides = array<i32>} : memref<2x128xf32, #tpu.memory_space<vmem>>, vector<2x16xf32>,
    %c0_70 = arith.constant 0 : index
    %c6 = arith.constant 6 : index
    %c0_71 = arith.constant 0 : index
    %222 = vector.load %arg9[%c0_70, %c6, %c0_71] : memref<2x8x512xf32, #tpu.memory_space<vmem>>, vector<2x1x512xf32>
    %223 = vector.shape_cast %222 : vector<2x1x512xf32> to vector<2x512xf32>
    %cst_72 = arith.constant dense<0.000000e+00> : vector<2x512xf32>
    %224 = tpu.matmul %217, %13, %cst_72 {dimension_numbers = #tpu.dot_dimension_numbers<[1], [0], [0], [1], [0, 0, 1, 1], [], []>} : vector<2x128xbf16>, vector<128x512xbf16>, vector<2x512xf32> -> vector<2x512xf32>
    %225 = arith.addf %223, %224 : vector<2x512xf32>
    %226 = vector.extract_strided_slice %225 {offsets = [0, 0], sizes = [2, 128], strides = [1, 1]} : vector<2x512xf32> to vector<2x128xf32>
    %227 = arith.negf %226 : vector<2x128xf32>
    %228 = math.exp %227 : vector<2x128xf32>
    %cst_73 = arith.constant 1.000000e+00 : f32
    %229 = vector.broadcast %cst_73 : f32 to vector<2x128xf32>
    %230 = arith.addf %229, %228 : vector<2x128xf32>
    %231 = arith.divf %229, %230 : vector<2x128xf32>
    %232 = vector.extract_strided_slice %225 {offsets = [0, 128], sizes = [2, 128], strides = [1, 1]} : vector<2x512xf32> to vector<2x128xf32>
    %233 = arith.negf %232 : vector<2x128xf32>
    %234 = math.exp %233 : vector<2x128xf32>
    %cst_74 = arith.constant 1.000000e+00 : f32
    %235 = vector.broadcast %cst_74 : f32 to vector<2x128xf32>
    %236 = arith.addf %235, %234 : vector<2x128xf32>
    %237 = arith.divf %235, %236 : vector<2x128xf32>
    %238 = vector.extract_strided_slice %225 {offsets = [0, 256], sizes = [2, 128], strides = [1, 1]} : vector<2x512xf32> to vector<2x128xf32>
    %239 = math.tanh %238 : vector<2x128xf32>
    %240 = vector.extract_strided_slice %225 {offsets = [0, 384], sizes = [2, 128], strides = [1, 1]} : vector<2x512xf32> to vector<2x128xf32>
    %241 = arith.negf %240 : vector<2x128xf32>
    %242 = math.exp %241 : vector<2x128xf32>
    %cst_75 = arith.constant 1.000000e+00 : f32
    %243 = vector.broadcast %cst_75 : f32 to vector<2x128xf32>
    %244 = arith.addf %243, %242 : vector<2x128xf32>
    %245 = arith.divf %243, %244 : vector<2x128xf32>
    %246 = arith.mulf %237, %214 : vector<2x128xf32>
    %247 = arith.mulf %231, %239 : vector<2x128xf32>
    %248 = arith.addf %246, %247 : vector<2x128xf32>
    %249 = math.tanh %248 : vector<2x128xf32>
    %250 = arith.mulf %245, %249 : vector<2x128xf32>
    %251 = arith.truncf %250 : vector<2x128xf32> to vector<2x128xbf16>
    %cst_76 = arith.constant dense<0.000000e+00> : vector<2x16xf32>
    %252 = tpu.matmul %251, %14, %cst_76 {dimension_numbers = #tpu.dot_dimension_numbers<[1], [0], [0], [1], [0, 0, 1, 1], [], []>} : vector<2x128xbf16>, vector<128x16xbf16>, vector<2x16xf32> -> vector<2x16xf32>
    %253 = vector.broadcast %15 : vector<1x16xf32> to vector<2x16xf32>
    %254 = arith.addf %252, %253 : vector<2x16xf32>
    %c0_77 = arith.constant 0 : index
    %c96 = arith.constant 96 : index
    %255 = vector.load %arg8[%c0_77, %c96] : memref<2x128xf32, #tpu.memory_space<vmem>>, vector<2x16xf32>
    tpu.vector_store %arg8[%c0_77, %c96], %254 {strides = array<i32>} : memref<2x128xf32, #tpu.memory_space<vmem>>, vector<2x16xf32>,
    %c0_78 = arith.constant 0 : index
    %c7 = arith.constant 7 : index
    %c0_79 = arith.constant 0 : index
    %256 = vector.load %arg9[%c0_78, %c7, %c0_79] : memref<2x8x512xf32, #tpu.memory_space<vmem>>, vector<2x1x512xf32>
    %257 = vector.shape_cast %256 : vector<2x1x512xf32> to vector<2x512xf32>
    %cst_80 = arith.constant dense<0.000000e+00> : vector<2x512xf32>
    %258 = tpu.matmul %251, %13, %cst_80 {dimension_numbers = #tpu.dot_dimension_numbers<[1], [0], [0], [1], [0, 0, 1, 1], [], []>} : vector<2x128xbf16>, vector<128x512xbf16>, vector<2x512xf32> -> vector<2x512xf32>
    %259 = arith.addf %257, %258 : vector<2x512xf32>
    %260 = vector.extract_strided_slice %259 {offsets = [0, 0], sizes = [2, 128], strides = [1, 1]} : vector<2x512xf32> to vector<2x128xf32>
    %261 = arith.negf %260 : vector<2x128xf32>
    %262 = math.exp %261 : vector<2x128xf32>
    %cst_81 = arith.constant 1.000000e+00 : f32
    %263 = vector.broadcast %cst_81 : f32 to vector<2x128xf32>
    %264 = arith.addf %263, %262 : vector<2x128xf32>
    %265 = arith.divf %263, %264 : vector<2x128xf32>
    %266 = vector.extract_strided_slice %259 {offsets = [0, 128], sizes = [2, 128], strides = [1, 1]} : vector<2x512xf32> to vector<2x128xf32>
    %267 = arith.negf %266 : vector<2x128xf32>
    %268 = math.exp %267 : vector<2x128xf32>
    %cst_82 = arith.constant 1.000000e+00 : f32
    %269 = vector.broadcast %cst_82 : f32 to vector<2x128xf32>
    %270 = arith.addf %269, %268 : vector<2x128xf32>
    %271 = arith.divf %269, %270 : vector<2x128xf32>
    %272 = vector.extract_strided_slice %259 {offsets = [0, 256], sizes = [2, 128], strides = [1, 1]} : vector<2x512xf32> to vector<2x128xf32>
    %273 = math.tanh %272 : vector<2x128xf32>
    %274 = vector.extract_strided_slice %259 {offsets = [0, 384], sizes = [2, 128], strides = [1, 1]} : vector<2x512xf32> to vector<2x128xf32>
    %275 = arith.negf %274 : vector<2x128xf32>
    %276 = math.exp %275 : vector<2x128xf32>
    %cst_83 = arith.constant 1.000000e+00 : f32
    %277 = vector.broadcast %cst_83 : f32 to vector<2x128xf32>
    %278 = arith.addf %277, %276 : vector<2x128xf32>
    %279 = arith.divf %277, %278 : vector<2x128xf32>
    %280 = arith.mulf %271, %248 : vector<2x128xf32>
    %281 = arith.mulf %265, %273 : vector<2x128xf32>
    %282 = arith.addf %280, %281 : vector<2x128xf32>
    %283 = math.tanh %282 : vector<2x128xf32>
    %284 = arith.mulf %279, %283 : vector<2x128xf32>
    %285 = arith.truncf %284 : vector<2x128xf32> to vector<2x128xbf16>
    %cst_84 = arith.constant dense<0.000000e+00> : vector<2x16xf32>
    %286 = tpu.matmul %285, %14, %cst_84 {dimension_numbers = #tpu.dot_dimension_numbers<[1], [0], [0], [1], [0, 0, 1, 1], [], []>} : vector<2x128xbf16>, vector<128x16xbf16>, vector<2x16xf32> -> vector<2x16xf32>
    %287 = vector.broadcast %15 : vector<1x16xf32> to vector<2x16xf32>
    %288 = arith.addf %286, %287 : vector<2x16xf32>
    %c0_85 = arith.constant 0 : index
    %c112 = arith.constant 112 : index
    %289 = vector.load %arg8[%c0_85, %c112] : memref<2x128xf32, #tpu.memory_space<vmem>>, vector<2x16xf32>
    tpu.vector_store %arg8[%c0_85, %c112], %288 {strides = array<i32>} : memref<2x128xf32, #tpu.memory_space<vmem>>, vector<2x16xf32>,
    %c0_86 = arith.constant 0 : index
    %c0_87 = arith.constant 0 : index
    %290 = vector.load %arg10[%c0_86, %c0_87] : memref<2x128xbf16, #tpu.memory_space<vmem>>, vector<2x128xbf16>
    tpu.vector_store %arg10[%c0_86, %c0_87], %285 {strides = array<i32>} : memref<2x128xbf16, #tpu.memory_space<vmem>>, vector<2x128xbf16>,
    %c0_88 = arith.constant 0 : index
    %c0_89 = arith.constant 0 : index
    %291 = vector.load %arg11[%c0_88, %c0_89] : memref<2x128xf32, #tpu.memory_space<vmem>>, vector<2x128xf32>
    tpu.vector_store %arg11[%c0_88, %c0_89], %282 {strides = array<i32>} : memref<2x128xf32, #tpu.memory_space<vmem>>, vector<2x128xf32>,
    return
  }
  func.func @transform_0(%arg0: i32, %arg1: i32) -> (i32, i32, i32) {
    %c0_i32 = arith.constant 0 : i32
    %c0_i32_0 = arith.constant 0 : i32
    return %arg0, %arg1, %c0_i32 : i32, i32, i32
  }
  func.func @transform_1(%arg0: i32, %arg1: i32) -> (i32, i32) {
    %c0_i32 = arith.constant 0 : i32
    %c0_i32_0 = arith.constant 0 : i32
    %c0_i32_1 = arith.constant 0 : i32
    return %c0_i32, %c0_i32_0 : i32, i32
  }
  func.func @transform_2(%arg0: i32, %arg1: i32) -> (i32, i32) {
    %c0_i32 = arith.constant 0 : i32
    %c0_i32_0 = arith.constant 0 : i32
    %c0_i32_1 = arith.constant 0 : i32
    return %c0_i32, %c0_i32_0 : i32, i32
  }
  func.func @transform_3(%arg0: i32, %arg1: i32) -> (i32, i32) {
    %c0_i32 = arith.constant 0 : i32
    %c0_i32_0 = arith.constant 0 : i32
    %c0_i32_1 = arith.constant 0 : i32
    return %c0_i32, %c0_i32_0 : i32, i32
  }
  func.func @transform_4(%arg0: i32, %arg1: i32) -> (i32, i32) {
    %c0_i32 = arith.constant 0 : i32
    %c0_i32_0 = arith.constant 0 : i32
    %c0_i32_1 = arith.constant 0 : i32
    return %c0_i32, %c0_i32_0 : i32, i32
  }
  func.func @transform_5(%arg0: i32, %arg1: i32) -> (i32, i32) {
    %c0_i32 = arith.constant 0 : i32
    %c0_i32_0 = arith.constant 0 : i32
    %c0_i32_1 = arith.constant 0 : i32
    return %c0_i32, %c0_i32_0 : i32, i32
  }
  func.func @transform_6(%arg0: i32, %arg1: i32) -> (i32, i32) {
    %c0_i32 = arith.constant 0 : i32
    return %arg0, %arg1 : i32, i32
  }
}

</mosaic_0001>

<bundles_post_ra>
// kernel: tpu_custom_call.1
= control target key start
LH: loop header
LB: loop body
LE: loop exit
PB: predicated region body
PF: predicated region fallthrough
CT: control target
= control target key end

     0   :  { %11 = vsyncpa [#allocation6], 0  ;;  %s4199_s0 = inlined_call_operand.vmem [shape: f32[2,8,16], index: 0, kind: input, shape index: {}]   ;;  %s4200_s1 = inlined_call_operand.vmem [shape: bf16[16,512], index: 1, kind: input, shape index: {}]   ;;  %s4201_s2 = inlined_call_operand.hbm [shape: bf16[128,512], index: 2, kind: input, shape index: {}]   ;;  %s4202_s3 = inlined_call_operand.vmem [shape: f32[1,512], index: 3, kind: input, shape index: {}]   ;;  %s4203_s4 = inlined_call_operand.vmem [shape: bf16[128,16], index: 4, kind: input, shape index: {}]   ;;  %s4204_s5 = inlined_call_operand.vmem [shape: f32[1,16], index: 5, kind: input, shape index: {}]   ;;  %s4205_s6 = inlined_call_operand.hbm [shape: f32[2,128], index: 6, kind: output, shape index: {}]  }
   0x1   :  { %12 = vsyncpa [#allocation7], 0  ;;  %s21_s23 = sshll.u32 %s4201_s2, 4  ;;  %s3030_s24 = smov [#allocation5]   ;;  %s22_s23 = int_to_ptr.hbm [resolvable:$true] %s21_s23 }
   0x2   :  { %s23_s25 = sshll.u32 %s3030_s24, 4  ;;  %s3031_s26 = smov 256   ;;  %s24_s25 = int_to_ptr.vmem [resolvable:$true] %s23_s25 }
   0x3   :  { %s3032_s27 = smov 16  }
   0x4   :  { %29 = dma.hbm_to_vmem [thread:$0]  %s22_s23, 4096, %s24_s25, [#allocation6], %s3031_s26, %s3031_s26, %s3032_s27  }
   0x5   :  { %3026 = dma.done.wait [#allocation6], 4096  }
   0x6   :  { %3027 = vsyncadd [#allocation6], 4294963200  ;;  %v3033_v0 = vmov 0   ;;  %v2419_v1 = vld [vmem:[%s4200_s1] sm:$0xf]  ;;  %v48_v38 = vld [vmem:[%s4199_s0 + $0x8] sm:$0xff] }
   0x7   :  { %45 = vst [vmem:[#allocation3] sm:$0x1] %v3033_v0  ;;  %v2649_v2 = vld [vmem:[%s4200_s1 + $0xc] sm:$0xf0]  ;;  %v2647_v3 = vld [vmem:[%s4200_s1 + $0x4] sm:$0xf] }
   0x8   :  { %v2420_v4 = vor.u32 %v2649_v2, %v2419_v1  ;;  %v2421_v5 = vld [vmem:[%s4200_s1 + $0x10] sm:$0xf0]  ;;  %v2427_v6 = vld [vmem:[%s4200_s1 + $0x8] sm:$0xf]  ;;  %v2650_v7 = vld [vmem:[%s4200_s1 + $0x14] sm:$0xf0] }
   0x9   :  { %v2424_v8 = vor.u32 %v2647_v3, %v2421_v5  ;;  %v2428_v9 = vor.u32 %v2650_v7, %v2427_v6  ;;  %v2648_v10 = vld [vmem:[%s4200_s1 + $0xc] sm:$0xf]  ;;  %v2429_v11 = vld [vmem:[%s4200_s1 + $0x18] sm:$0xf0]  ;;  %v2559_v19 = vld [vmem:[#allocation5 + $0xe8] sm:$0xf] }
   0xa   :  { %v2551_v12 = vld [vmem:[#allocation5 + $0xe0] sm:$0xf]  ;;  %95 = vmatpush.bf16.msra.mxu0 %v2420_v4  ;;  %v2432_v13 = vor.u32 %v2648_v10, %v2429_v11  ;;  %v2681_v14 = vld [vmem:[#allocation5 + $0xec] sm:$0xf0]  ;;  %v2679_v15 = vld [vmem:[#allocation5 + $0xe4] sm:$0xf] }
   0xb   :  { %v2553_v16 = vld [vmem:[#allocation5 + $0xf0] sm:$0xf0]  ;;  %109 = vmatpush.bf16.msra.mxu1 %v2424_v8  ;;  %123 = vmatpush.bf16.msra.mxu2 %v2428_v9  ;;  %v3105_v17 = vor.u32 %v2681_v14, %v2551_v12  ;;  %v2682_v20 = vld [vmem:[#allocation5 + $0xf4] sm:$0xf0]  ;;  %v2680_v21 = vld [vmem:[#allocation5 + $0xec] sm:$0xf] }
   0xc   :  { %v3107_v18 = vor.u32 %v2679_v15, %v2553_v16  ;;  %137 = vmatpush.bf16.msra.mxu3 %v2432_v13  ;;  %v3109_v22 = vor.u32 %v2682_v20, %v2559_v19  ;;  %v2561_v23 = vld [vmem:[#allocation5 + $0xf8] sm:$0xf0]  ;;  %v2535_v24 = vld [vmem:[#allocation5 + $0xc0] sm:$0xf]  ;;  %v2677_v25 = vld [vmem:[#allocation5 + $0xcc] sm:$0xf0] }
   0xd   :  { %v3113_v26 = vor.u32 %v2680_v21, %v2561_v23  ;;  %v3115_v27 = vor.u32 %v2677_v25, %v2535_v24  ;;  %v2675_v28 = vld [vmem:[#allocation5 + $0xc4] sm:$0xf]  ;;  %v2537_v29 = vld [vmem:[#allocation5 + $0xd0] sm:$0xf0]  ;;  %v2543_v30 = vld [vmem:[#allocation5 + $0xc8] sm:$0xf] }
   0xe   :  { %4244 = vst [vmem:[#allocation11_spill] sm:$0xff] %v3107_v18  ;;  %366 = vmatpush.bf16.msrb.mxu0 %v3105_v17  ;;  %v3118_v31 = vor.u32 %v2675_v28, %v2537_v29  ;;  %v2678_v32 = vld [vmem:[#allocation5 + $0xd4] sm:$0xf0]  ;;  %v2676_v33 = vld [vmem:[#allocation5 + $0xcc] sm:$0xf]  ;;  %vm84_vm0 = vcmask 130048  }
   0xf   :  { %379 = vmatpush.bf16.msrb.mxu1 %v3107_v18  ;;  %392 = vmatpush.bf16.msrb.mxu2 %v3109_v22  ;;  %v2545_v34 = vld [vmem:[#allocation5 + $0xd8] sm:$0xf0]  ;;  %v3121_v35 = vor.u32 %v2678_v32, %v2543_v30  ;;  %v2519_v39 = vld [vmem:[#allocation5 + $0xa0] sm:$0xf]  ;;  %v2673_v41 = vld [vmem:[#allocation5 + $0xac] sm:$0xf0] }
  0x10   :  { %4245 = vst [vmem:[#allocation12_spill] sm:$0xff] %v3118_v31  ;;  %405 = vmatpush.bf16.msrb.mxu3 %v3113_v26  ;;  %v3123_v36 = vor.u32 %v2676_v33, %v2545_v34  ;;  %v47_v37 = vld [vmem:[%s4199_s0] sm:$0xff]  ;;  %v2671_v42 = vld [vmem:[#allocation5 + $0xa4] sm:$0xf]  ;;  %v3133_v44 = vor.u32 %v2673_v41, %v2519_v39  ;;  %v2527_v46 = vld [vmem:[#allocation5 + $0xa8] sm:$0xf] }
  0x11   :  { %v49_v40 = vpack.c.bf16 %v48_v38, %v47_v37  ;;  %v2521_v43 = vld [vmem:[#allocation5 + $0xb0] sm:$0xf0]  ;;  %v2674_v47 = vld [vmem:[#allocation5 + $0xb4] sm:$0xf0]  ;;  %v2672_v48 = vld [vmem:[#allocation5 + $0xac] sm:$0xf] }
  0x12   :  { %367 = vmatpush.bf16.msrb.mxu0 %v3115_v27  ;;  %v3135_v45 = vor.u32 %v2671_v42, %v2521_v43  ;;  %v3139_v49 = vor.u32 %v2674_v47, %v2527_v46  ;;  %v2529_v50 = vld [vmem:[#allocation5 + $0xb8] sm:$0xf0]  ;;  %v2503_v51 = vld [vmem:[#allocation5 + $0x80] sm:$0xf]  ;;  %v2669_v52 = vld [vmem:[#allocation5 + $0x8c] sm:$0xf0] }
  0x13   :  { %380 = vmatpush.bf16.msrb.mxu1 %v3118_v31  ;;  %393 = vmatpush.bf16.msrb.mxu2 %v3121_v35  ;;  %v3143_v53 = vor.u32 %v2672_v48, %v2529_v50  ;;  %v2667_v54 = vld [vmem:[#allocation5 + $0x84] sm:$0xf]  ;;  %v2505_v55 = vld [vmem:[#allocation5 + $0x90] sm:$0xf0]  ;;  %v2511_v56 = vld [vmem:[#allocation5 + $0x88] sm:$0xf]  ;;  %v3149_v60 = vor.u32 %v2669_v52, %v2503_v51 }
  0x14   :  { %4246 = vst [vmem:[#allocation13_spill] sm:$0xff] %v3135_v45  ;;  %2436 = vmatmul.msk.bf16.vlgmr.msra.gmra.mxu3 %vm84_vm0, %v49_v40  ;;  %2435 = vmatmul.msk.bf16.vlgmr.msra.gmra.mxu2 %vm84_vm0, %v49_v40  ;;  %v2670_v57 = vld [vmem:[#allocation5 + $0x94] sm:$0xf0]  ;;  %v2668_v58 = vld [vmem:[#allocation5 + $0x8c] sm:$0xf]  ;;  %v3151_v61 = vor.u32 %v2667_v54, %v2505_v55  ;;  %vm425_vm1 = vcmask 1040384  }
  0x15   :  { %406 = vmatpush.bf16.msrb.mxu3 %v3123_v36  ;;  %v2513_v59 = vld [vmem:[#allocation5 + $0x98] sm:$0xf0]  ;;  %2433 = vmatmul.msk.bf16.vlgmr.msra.gmra.mxu0 %vm84_vm0, %v49_v40  ;;  %v2487_v62 = vld [vmem:[#allocation5 + $0x60] sm:$0xf]  ;;  %v3154_v63 = vor.u32 %v2670_v57, %v2511_v56  ;;  %v2665_v0 = vld [vmem:[#allocation5 + $0x6c] sm:$0xf0] }
  0x16   :  { %2434 = vmatmul.msk.bf16.vlgmr.msra.gmra.mxu1 %vm84_vm0, %v49_v40  ;;  %368 = vmatpush.bf16.msrb.mxu0 %v3133_v44  ;;  %4247 = vst [vmem:[#allocation14_spill] sm:$0xff] %v3151_v61  ;;  %v2663_v1 = vld [vmem:[#allocation5 + $0x64] sm:$0xf]  ;;  %v2489_v2 = vld [vmem:[#allocation5 + $0x70] sm:$0xf0]  ;;  %v3157_v3 = vor.u32 %v2668_v58, %v2513_v59  ;;  %v3161_v8 = vor.u32 %v2665_v0, %v2487_v62  ;;  %vm431_vm2 = vcmask 1041409  }
  0x17   :  { %381 = vmatpush.bf16.msrb.mxu1 %v3135_v45  ;;  %394 = vmatpush.bf16.msrb.mxu2 %v3139_v49  ;;  %v2495_v4 = vld [vmem:[#allocation5 + $0x68] sm:$0xf]  ;;  %v2666_v5 = vld [vmem:[#allocation5 + $0x74] sm:$0xf0]  ;;  %v2664_v6 = vld [vmem:[#allocation5 + $0x6c] sm:$0xf]  ;;  %v3163_v9 = vor.u32 %v2663_v1, %v2489_v2 }
  0x18   :  { %v2497_v7 = vld [vmem:[#allocation5 + $0x78] sm:$0xf0]  ;;  %v2471_v10 = vld [vmem:[#allocation5 + $0x40] sm:$0xf]  ;;  %v3166_v11 = vor.u32 %v2666_v5, %v2495_v4  ;;  %v2661_v12 = vld [vmem:[#allocation5 + $0x4c] sm:$0xf0] }
  0x19   :  { %407 = vmatpush.bf16.msrb.mxu3 %v3143_v53  ;;  %4248 = vst [vmem:[#allocation15_spill] sm:$0xff] %v3163_v9  ;;  %v2659_v13 = vld [vmem:[#allocation5 + $0x44] sm:$0xf]  ;;  %v2473_v14 = vld [vmem:[#allocation5 + $0x50] sm:$0xf0]  ;;  %v3169_v15 = vor.u32 %v2664_v6, %v2497_v7  ;;  %v3173_v23 = vor.u32 %v2661_v12, %v2471_v10  ;;  %v3034_v12 = vmov 0.0  }
  0x1a   :  { %369 = vmatpush.bf16.msrb.mxu0 %v3149_v60  ;;  %v2479_v16 = vld [vmem:[#allocation5 + $0x48] sm:$0xf]  ;;  %v2662_v19 = vld [vmem:[#allocation5 + $0x54] sm:$0xf0]  ;;  %v2660_v20 = vld [vmem:[#allocation5 + $0x4c] sm:$0xf]  ;;  %v3175_v24 = vor.u32 %v2659_v13, %v2473_v14 }
  0x1b   :  { %382 = vmatpush.bf16.msrb.mxu1 %v3151_v61  ;;  %395 = vmatpush.bf16.msrb.mxu2 %v3154_v63  ;;  %v2481_v21 = vld [vmem:[#allocation5 + $0x58] sm:$0xf0]  ;;  %v2455_v25 = vld [vmem:[#allocation5 + $0x20] sm:$0xf]  ;;  %v3178_v28 = vor.u32 %v2662_v19, %v2479_v16  ;;  %v2657_v29 = vld [vmem:[#allocation5 + $0x2c] sm:$0xf0] }
  0x1c   :  { %4249 = vst [vmem:[#allocation16_spill] sm:$0xff] %v3175_v24  ;;  %v2655_v30 = vld [vmem:[#allocation5 + $0x24] sm:$0xf]  ;;  %v2457_v32 = vld [vmem:[#allocation5 + $0x30] sm:$0xf0]  ;;  %v3181_v33 = vor.u32 %v2660_v20, %v2481_v21  ;;  %v3185_v40 = vor.u32 %v2657_v29, %v2455_v25  ;;  %vm427_vm3 = vcmask 1042434  }
  0x1d   :  { %408 = vmatpush.bf16.msrb.mxu3 %v3157_v3  ;;  %v2463_v34 = vld [vmem:[#allocation5 + $0x28] sm:$0xf]  ;;  %v2658_v37 = vld [vmem:[#allocation5 + $0x34] sm:$0xf0]  ;;  %v2656_v38 = vld [vmem:[#allocation5 + $0x2c] sm:$0xf]  ;;  %v3187_v41 = vor.u32 %v2655_v30, %v2457_v32 }
  0x1e   :  { %370 = vmatpush.bf16.msrb.mxu0 %v3161_v8  ;;  %v2465_v39 = vld [vmem:[#allocation5 + $0x38] sm:$0xf0]  ;;  %v2439_v42 = vld [vmem:[#allocation5] sm:$0xf]  ;;  %v3190_v43 = vor.u32 %v2658_v37, %v2463_v34  ;;  %v2653_v46 = vld [vmem:[#allocation5 + $0xc] sm:$0xf0] }
  0x1f   :  { %383 = vmatpush.bf16.msrb.mxu1 %v3163_v9  ;;  %396 = vmatpush.bf16.msrb.mxu2 %v3166_v11  ;;  %4250 = vst [vmem:[#allocation17_spill] sm:$0xff] %v3187_v41  ;;  %v2651_v47 = vld [vmem:[#allocation5 + $0x4] sm:$0xf]  ;;  %v2441_v48 = vld [vmem:[#allocation5 + $0x10] sm:$0xf0]  ;;  %v3193_v50 = vor.u32 %v2656_v38, %v2465_v39  ;;  %v3197_v56 = vor.u32 %v2653_v46, %v2439_v42  ;;  %vm429_vm4 = vcmask 1041408  }
  0x20   :  { %v2447_v51 = vld [vmem:[#allocation5 + $0x8] sm:$0xf]  ;;  %v2654_v52 = vld [vmem:[#allocation5 + $0x14] sm:$0xf0]  ;;  %v2652_v54 = vld [vmem:[#allocation5 + $0xc] sm:$0xf]  ;;  %v3199_v57 = vor.u32 %v2651_v47, %v2441_v48 }
  0x21   :  { %409 = vmatpush.bf16.msrb.mxu3 %v3169_v15  ;;  %v2449_v55 = vld [vmem:[#allocation5 + $0x18] sm:$0xf0]  ;;  %4251 = vst [vmem:[#allocation18_spill] sm:$0xff] %v3197_v56  ;;  %v3202_v58 = vor.u32 %v2654_v52, %v2447_v51  ;;  %v54_v0 = vld [vmem:[%s4202_s3] sm:$0xf]  ;;  %v3257_v39 = vld [vmem:[%s4203_s4 + $0x38] sm:$0xff] }
  0x22   :  { %371 = vmatpush.bf16.msrb.mxu0 %v3173_v23  ;;  %4252 = vst [vmem:[#allocation19_spill] sm:$0xff] %v3199_v57  ;;  %v3205_v59 = vor.u32 %v2652_v54, %v2449_v55  ;;  %v201_v62 = vld [vmem:[#allocation3] sm:$0x1]  ;;  %v56_v1 = vperm.slane %v54_v0, 0  ;;  %v57_v2 = vperm.slane %v54_v0, 1  ;;  %v59_v10 = vperm.slane %v54_v0, 3 }
  0x23   :  { %384 = vmatpush.bf16.msrb.mxu1 %v3175_v24  ;;  %397 = vmatpush.bf16.msrb.mxu2 %v3178_v28  ;;  %4253 = vst [vmem:[#allocation20_spill] sm:$0xff] %v3202_v58  ;;  %v58_v13 = vperm.slane %v54_v0, 2  ;;  %v3264_v47 = vld [vmem:[%s4203_s4 + $0x30] sm:$0xff]  ;;  %v3271_v51 = vld [vmem:[%s4203_s4 + $0x28] sm:$0xff]  ;;  %vm433_vm5 = vcmask 1043459   ;;  %vm4230_vm6 = vcmask 1042433  }
  0x24   :  { %4254 = vst [vmem:[#allocation21_spill] sm:$0xff] %v3205_v59  ;;  %s3035_s29 = smov 32   ;;  %s3036_s2 = smov 48  }
  0x25   :  { %410 = vmatpush.bf16.msrb.mxu3 %v3181_v33  ;;  %46 = vst [vmem:[#allocation4] sm:$0x3] %v3034_v12  ;;  %s3037_s8 = smov 64   ;;  %s3038_s22 = smov 80  }
  0x26   :  { %372 = vmatpush.bf16.msrb.mxu0 %v3185_v40  ;;  %s3039_s23 = smov 96   ;;  %s3041_s24 = smov [#allocation8]  }
  0x27   :  { %385 = vmatpush.bf16.msrb.mxu1 %v3187_v41  ;;  %398 = vmatpush.bf16.msrb.mxu2 %v3190_v43  ;;  %s2405_s25 = sshll.u32 %s3041_s24, 4  ;;  %s2406_s25 = int_to_ptr.vmem [resolvable:$true] %s2405_s25 }
  0x29   :  { %411 = vmatpush.bf16.msrb.mxu3 %v3193_v50 }
  0x2a   :  { %373 = vmatpush.bf16.msrb.mxu0 %v3197_v56 }
  0x2b   :  { %386 = vmatpush.bf16.msrb.mxu1 %v3199_v57  ;;  %399 = vmatpush.bf16.msrb.mxu2 %v3202_v58 }
  0x2d   :  { %412 = vmatpush.bf16.msrb.mxu3 %v3205_v59  ;;  %374 = vmatmul.bf16.vlgmr.msrb.gmra.mxu0 %v201_v62 }
  0x2e   :  { %387 = vmatmul.bf16.vlgmr.msrb.gmra.mxu1 %v201_v62  ;;  %400 = vmatmul.bf16.vlgmr.msrb.gmra.mxu2 %v201_v62 }
  0x2f   :  { %665 = vmatpush.bf16.msra.mxu1 %v3105_v17  ;;  %678 = vmatpush.bf16.msra.mxu2 %v3107_v18 }
  0x30   :  { %413 = vmatmul.bf16.vlgmr.msrb.gmra.mxu3 %v201_v62  ;;  %646 = vmatpush.bf16.msra.mxu0 %v3257_v39 }
  0x31   :  { %691 = vmatpush.bf16.msra.mxu3 %v3109_v22 }
  0x33   :  { %666 = vmatpush.bf16.msra.mxu1 %v3115_v27  ;;  %679 = vmatpush.bf16.msra.mxu2 %v3118_v31 }
  0x34   :  { %647 = vmatpush.bf16.msra.mxu0 %v3264_v47 }
  0x35   :  { %692 = vmatpush.bf16.msra.mxu3 %v3121_v35 }
  0x37   :  { %667 = vmatpush.bf16.msra.mxu1 %v3133_v44  ;;  %680 = vmatpush.bf16.msra.mxu2 %v3135_v45 }
  0x38   :  { %648 = vmatpush.bf16.msra.mxu0 %v3271_v51 }
  0x39   :  { %693 = vmatpush.bf16.msra.mxu3 %v3139_v49 }
  0x3b   :  { %668 = vmatpush.bf16.msra.mxu1 %v3149_v60  ;;  %681 = vmatpush.bf16.msra.mxu2 %v3151_v61 }
  0x3d   :  { %694 = vmatpush.bf16.msra.mxu3 %v3154_v63 }
  0x3f   :  { %669 = vmatpush.bf16.msra.mxu1 %v3161_v8  ;;  %682 = vmatpush.bf16.msra.mxu2 %v3163_v9 }
  0x41   :  { %695 = vmatpush.bf16.msra.mxu3 %v3166_v11 }
  0x43   :  { %670 = vmatpush.bf16.msra.mxu1 %v3173_v23  ;;  %683 = vmatpush.bf16.msra.mxu2 %v3175_v24 }
  0x45   :  { %696 = vmatpush.bf16.msra.mxu3 %v3178_v28 }
  0x47   :  { %671 = vmatpush.bf16.msra.mxu1 %v3185_v40  ;;  %684 = vmatpush.bf16.msra.mxu2 %v3187_v41 }
  0x49   :  { %697 = vmatpush.bf16.msra.mxu3 %v3190_v43 }
  0x4b   :  { %672 = vmatpush.bf16.msra.mxu1 %v3197_v56  ;;  %685 = vmatpush.bf16.msra.mxu2 %v3199_v57 }
  0x4d   :  { %698 = vmatpush.bf16.msra.mxu3 %v3202_v58 }
  0x4f   :  { %908 = vmatpush.bf16.msrb.mxu2 %v3105_v17  ;;  %885 = vmatpush.bf16.msrb.mxu1 %v3257_v39 }
  0x51   :  { %921 = vmatpush.bf16.msrb.mxu3 %v3107_v18 }
  0x53   :  { %909 = vmatpush.bf16.msrb.mxu2 %v3115_v27  ;;  %886 = vmatpush.bf16.msrb.mxu1 %v3264_v47 }
  0x55   :  { %922 = vmatpush.bf16.msrb.mxu3 %v3118_v31 }
  0x57   :  { %910 = vmatpush.bf16.msrb.mxu2 %v3133_v44  ;;  %887 = vmatpush.bf16.msrb.mxu1 %v3271_v51 }
  0x59   :  { %923 = vmatpush.bf16.msrb.mxu3 %v3135_v45 }
  0x5b   :  { %911 = vmatpush.bf16.msrb.mxu2 %v3149_v60 }
  0x5d   :  { %924 = vmatpush.bf16.msrb.mxu3 %v3151_v61 }
  0x5f   :  { %912 = vmatpush.bf16.msrb.mxu2 %v3161_v8 }
  0x61   :  { %925 = vmatpush.bf16.msrb.mxu3 %v3163_v9 }
  0x63   :  { %913 = vmatpush.bf16.msrb.mxu2 %v3173_v23 }
  0x65   :  { %926 = vmatpush.bf16.msrb.mxu3 %v3175_v24 }
  0x67   :  { %914 = vmatpush.bf16.msrb.mxu2 %v3185_v40 }
  0x69   :  { %927 = vmatpush.bf16.msrb.mxu3 %v3187_v41 }
  0x6b   :  { %915 = vmatpush.bf16.msrb.mxu2 %v3197_v56 }
  0x6d   :  { %928 = vmatpush.bf16.msrb.mxu3 %v3199_v57 }
  0x92   :  { %v97_v4 = vpop.f32.mrf.mxu0 }
  0x93   :  { %v111_v5 = vpop.f32.mrf.mxu1  ;;  %v98_v6 = vadd.f32 %v97_v4, %v56_v1 }
  0x94   :  { %v112_v7 = vadd.f32 %v111_v5, %v57_v2  ;;  %v3280_v5 = vld [vmem:[%s4203_s4 + $0x20] sm:$0xff] }
  0x95   :  { %144 = vst [vmem:[#allocation2] sm:$0xff] %v98_v6  ;;  %649 = vmatpush.bf16.msra.mxu0 %v3280_v5  ;;  %888 = vmatpush.bf16.msrb.mxu1 %v3280_v5 }
  0x96   :  { %145 = vst [vmem:[#allocation2 + $0x8] sm:$0xff] %v112_v7 }
  0x97   :  { %v139_v14 = vpop.f32.mrf.mxu3  ;;  %v125_v16 = vpop.f32.mrf.mxu2 }
  0x98   :  { %v140_v19 = vadd.f32 %v139_v14, %v59_v10  ;;  %v126_v20 = vadd.f32 %v125_v16, %v58_v13 }
  0x9a   :  { %147 = vst [vmem:[#allocation2 + $0x18] sm:$0xff] %v140_v19  ;;  %v99_v21 = vpop.f32.mrf.mxu0  ;;  %v3291_v19 = vld [vmem:[%s4203_s4 + $0x18] sm:$0xff] }
  0x9b   :  { %146 = vst [vmem:[#allocation2 + $0x10] sm:$0xff] %v126_v20  ;;  %v113_v25 = vpop.f32.mrf.mxu1  ;;  %v100_v29 = vadd.f32 %v99_v21, %v56_v1  ;;  %650 = vmatpush.bf16.msra.mxu0 %v3291_v19  ;;  %889 = vmatpush.bf16.msrb.mxu1 %v3291_v19 }
  0x9c   :  { %v114_v30 = vadd.f32 %v113_v25, %v57_v2 }
  0x9d   :  { %148 = vst [vmem:[#allocation2 + $0x20] sm:$0xff] %v100_v29 }
  0x9e   :  { %149 = vst [vmem:[#allocation2 + $0x28] sm:$0xff] %v114_v30 }
  0x9f   :  { %v141_v32 = vpop.f32.mrf.mxu3  ;;  %v127_v34 = vpop.f32.mrf.mxu2 }
  0xa0   :  { %v142_v37 = vadd.f32 %v141_v32, %v59_v10  ;;  %v128_v38 = vadd.f32 %v127_v34, %v58_v13 }
  0xa2   :  { %151 = vst [vmem:[#allocation2 + $0x38] sm:$0xff] %v142_v37  ;;  %v203_v10 = vld [vmem:[#allocation2] ss:$8 sm:$0xf] }
  0xa3   :  { %150 = vst [vmem:[#allocation2 + $0x30] sm:$0xff] %v128_v38 }
  0xaa   :  { %v375_v42 = vpop.f32.mrf.mxu0  ;;  %v205_v20 = vld [vmem:[#allocation2 + $0x20] ss:$8 sm:$0xf] }
  0xab   :  { %v388_v46 = vpop.f32.mrf.mxu1 }
  0xac   :  { %v422_v48 = vrot.slane %v388_v46, 7  ;;  %v3298_v46 = vld [vmem:[%s4203_s4 + $0x10] sm:$0xff] }
  0xad   :  { %651 = vmatpush.bf16.msra.mxu0 %v3298_v46  ;;  %890 = vmatpush.bf16.msrb.mxu1 %v3298_v46 }
  0xae   :  { %v426_v0 = vsel %vm425_vm1, %v375_v42, %v422_v48  ;;  %v432_v1 = vsel %vm431_vm2, %v375_v42, %v422_v48 }
  0xb1   :  { %v401_v52 = vpop.f32.mrf.mxu2 }
  0xb2   :  { %v423_v54 = vrot.slane %v401_v52, 6  ;;  %v377_v62 = vpop.f32.mrf.mxu0 }
  0xb3   :  { %v414_v55 = vpop.f32.mrf.mxu3  ;;  %v390_v4 = vpop.f32.mrf.mxu1 }
  0xb4   :  { %v424_v2 = vrot.slane %v414_v55, 5  ;;  %v3304_v55 = vld [vmem:[%s4203_s4 + $0x8] sm:$0xff] }
  0xb5   :  { %652 = vmatpush.bf16.msra.mxu0 %v3304_v55  ;;  %891 = vmatpush.bf16.msrb.mxu1 %v3304_v55 }
  0xb6   :  { %v428_v6 = vsel %vm427_vm3, %v423_v54, %v424_v2  ;;  %v434_v7 = vsel %vm433_vm5, %v423_v54, %v424_v2 }
  0xb7   :  { %v430_v12 = vsel %vm429_vm4, %v426_v0, %v428_v6  ;;  %v436_v13 = vsel %vm4230_vm6, %v432_v1, %v434_v7  ;;  %v3311_v1 = vld [vmem:[%s4203_s4] sm:$0xff] }
  0xb8   :  { %v437_v14 = vrot.slane %v436_v13, 1  ;;  %v440_v16 = vadd.f32 %v430_v12, %v203_v10  ;;  %4255 = vst [vmem:[#allocation22_spill] sm:$0xff] %v3311_v1 }
  0xb9   :  { %v403_v30 = vpop.f32.mrf.mxu2  ;;  %653 = vmatpush.bf16.msra.mxu0 %v3311_v1  ;;  %892 = vmatpush.bf16.msrb.mxu1 %v3311_v1 }
  0xba   :  { %v441_v21 = vadd.f32 %v437_v14, %v205_v20  ;;  %v2565_v25 = vmul.f32 -1.442695, %v440_v16  ;;  %v482_v29 = vrot.slane %v440_v16, 1  ;;  %v530_v32 = vrot.slane %v440_v16, 3  ;;  %v3325_v30 = vld [vmem:[#allocation4] sm:$0x3] }
  0xbb   :  { %v416_v34 = vpop.f32.mrf.mxu3  ;;  %v524_v13 = vrot.slane %v440_v16, 2 }
  0xbc   :  { %2704 = vpow2.f32 %v2565_v25  ;;  %v2566_v37 = vmul.f32 -1.442695, %v441_v21  ;;  %v483_v38 = vrot.slane %v441_v21, 1  ;;  %v2567_v42 = vmul.f32 -1.442695, %v482_v29 }
  0xbd   :  { %v531_v48 = vrot.slane %v441_v21, 3  ;;  %v2569_v54 = vmul.f32 -1.442695, %v530_v32  ;;  %704 = vmatpush.bf16.msrb.mxu0 %v3113_v26  ;;  %v525_v25 = vrot.slane %v441_v21, 2 }
  0xbe   :  { %2706 = vpow2.f32 %v2566_v37  ;;  %v2568_v52 = vmul.f32 -1.442695, %v483_v38 }
  0xbf   :  { %2708 = vpow2.f32 %v2567_v42  ;;  %v2570_v62 = vmul.f32 -1.442695, %v531_v48 }
  0xc0   :  { %2710 = vpow2.f32 %v2568_v52 }
  0xc1   :  { %2712 = vpow2.f32 %v2569_v54  ;;  %705 = vmatpush.bf16.msrb.mxu0 %v3123_v36 }
  0xc2   :  { %v2705_v0 = vpop.eup %2704  ;;  %2714 = vpow2.f32 %v2570_v62 }
  0xc3   :  { %v448_v2 = vadd.f32 1.0, %v2705_v0 }
  0xc4   :  { %v2707_v4 = vpop.eup %2706 }
  0xc5   :  { %v2709_v6 = vpop.eup %2708  ;;  %v3314_v7 = vadd.f32 1.0, %v2707_v4  ;;  %2716 = vrcp.f32 %v448_v2  ;;  %v459_v32 = vand.u32 2147483647, %v448_v2  ;;  %v461_v37 = vand.u32 2147483648, %v448_v2  ;;  %706 = vmatpush.bf16.msrb.mxu0 %v3143_v53 }
  0xc6   :  { %v2711_v10 = vpop.eup %2710  ;;  %v3316_v12 = vadd.f32 1.0, %v2709_v6  ;;  %vm455_vm7 = vweird.f32 %v448_v2 }
  0xc7   :  { %2718 = vrcp.f32 %v3314_v7  ;;  %v2713_v14 = vpop.eup %2712  ;;  %v3322_v20 = vadd.f32 1.0, %v2711_v10  ;;  %v474_v38 = vand.u32 2147483647, %v3314_v7  ;;  %vm3335_vm8 = vcmp.eq.f32.partialorder %v459_v32, 8.507059e+37 }
  0xc8   :  { %2720 = vrcp.f32 %v3316_v12  ;;  %v2715_v29 = vpop.eup %2714  ;;  %v3329_v16 = vadd.f32 1.0, %v2713_v14  ;;  %v476_v62 = vand.u32 2147483648, %v3314_v7  ;;  %vm470_vm9 = vweird.f32 %v3314_v7 }
  0xc9   :  { %2722 = vrcp.f32 %v3322_v20  ;;  %v3332_v48 = vadd.f32 1.0, %v2715_v29  ;;  %v462_v10 = vor.u32 1.1754944e-38, %v461_v37  ;;  %vm3344_vm10 = vcmp.eq.f32.partialorder %v474_v38, 8.507059e+37  ;;  %707 = vmatpush.bf16.msrb.mxu0 %v3157_v3 }
  0xca   :  { %2724 = vtanh.f32 %v524_v13  ;;  %vm499_vm11 = vweird.f32 %v3316_v12  ;;  %v477_v57 = vor.u32 1.1754944e-38, %v476_v62  ;;  %v505_v37 = vand.u32 2147483648, %v3316_v12 }
  0xcb   :  { %v2717_v34 = vpop.eup %2716  ;;  %2726 = vtanh.f32 %v525_v25  ;;  %vm514_vm14 = vweird.f32 %v3322_v20  ;;  %v520_v56 = vand.u32 2147483648, %v3322_v20 }
  0xcc   :  { %v451_v42 = vmul.f32 %v2717_v34, %v448_v2  ;;  %2728 = vrcp.f32 %v3329_v16  ;;  %vm456_vm12 = vweird.f32 %v2717_v34 }
  0xcd   :  { %v2719_v52 = vpop.eup %2718  ;;  %2730 = vrcp.f32 %v3332_v48  ;;  %vm3358_vm15 = vmor %vm455_vm7, %vm456_vm12  ;;  %708 = vmatpush.bf16.msrb.mxu0 %v3169_v15 }
  0xce   :  { %v2721_v0 = vpop.eup %2720  ;;  %v452_v4 = vsub.f32 1.0, %v451_v42  ;;  %v466_v6 = vmul.f32 %v2719_v52, %v3314_v7  ;;  %v503_v42 = vand.u32 2147483647, %v3316_v12  ;;  %vm471_vm13 = vweird.f32 %v2719_v52 }
  0xcf   :  { %v495_v14 = vmul.f32 %v2721_v0, %v3316_v12  ;;  %v2723_v25 = vpop.eup %2722  ;;  %vm500_vm0 = vweird.f32 %v2721_v0  ;;  %vm3373_vm7 = vmor %vm470_vm9, %vm471_vm13  ;;  %v506_v7 = vor.u32 1.1754944e-38, %v505_v37  ;;  %vm547_vm13 = vweird.f32 %v3329_v16 }
  0xd0   :  { %v453_v29 = vmul.f32 %v2717_v34, %v452_v4  ;;  %v467_v32 = vsub.f32 1.0, %v466_v6  ;;  %v2725_v21 = vpop.eup %2724  ;;  %v510_v38 = vmul.f32 %v2723_v25, %v3322_v20  ;;  %vm515_vm12 = vweird.f32 %v2723_v25 }
  0xd1   :  { %v496_v41 = vsub.f32 1.0, %v495_v14  ;;  %v2727_v24 = vpop.eup %2726  ;;  %v518_v14 = vand.u32 2147483647, %v3322_v20  ;;  %vm504_vm9 = vcmp.eq.f32.partialorder %v503_v42, 8.507059e+37  ;;  %709 = vmatpush.bf16.msrb.mxu0 %v3181_v33 }
  0xd2   :  { %v454_v9 = vadd.f32 %v2717_v34, %v453_v29  ;;  %v468_v61 = vmul.f32 %v2719_v52, %v467_v32  ;;  %v3355_v45 = vpop.eup %2728  ;;  %v511_v62 = vsub.f32 1.0, %v510_v38 }
  0xd3   :  { %v497_v6 = vmul.f32 %v2721_v0, %v496_v41  ;;  %v3364_v31 = vpop.eup %2730  ;;  %v543_v2 = vmul.f32 %v3355_v45, %v3329_v16 }
  0xd4   :  { %v458_v29 = vsel %vm3358_vm15, %v2717_v34, %v454_v9  ;;  %v469_v32 = vadd.f32 %v2719_v52, %v468_v61  ;;  %v512_v1 = vmul.f32 %v2723_v25, %v511_v62  ;;  %v558_v18 = vmul.f32 %v3364_v31, %v3332_v48  ;;  %vm501_vm15 = vmor %vm499_vm11, %vm500_vm0 }
  0xd5   :  { %v498_v38 = vadd.f32 %v2721_v0, %v497_v6  ;;  %v463_v61 = vsel %vm3335_vm8, %v462_v10, %v458_v29  ;;  %v544_v34 = vsub.f32 1.0, %v543_v2  ;;  %vm516_vm8 = vmor %vm514_vm14, %vm515_vm12  ;;  %vm519_vm11 = vcmp.eq.f32.partialorder %v518_v14, 8.507059e+37  ;;  %710 = vmatpush.bf16.msrb.mxu0 %v3193_v50 }
  0xd6   :  { %v473_v9 = vsel %vm3373_vm7, %v2719_v52, %v469_v32  ;;  %v513_v6 = vadd.f32 %v2723_v25, %v512_v1  ;;  %v559_v62 = vsub.f32 1.0, %v558_v18  ;;  %v521_v52 = vor.u32 1.1754944e-38, %v520_v56 }
  0xd7   :  { %v502_v4 = vsel %vm501_vm15, %v2721_v0, %v498_v38  ;;  %v478_v58 = vsel %vm3344_vm10, %v477_v57, %v473_v9  ;;  %v545_v10 = vmul.f32 %v3355_v45, %v544_v34  ;;  %v577_v0 = vmul.f32 %v2725_v21, %v463_v61 }
  0xd8   :  { %v507_v54 = vsel %vm504_vm9, %v506_v7, %v502_v4  ;;  %v517_v12 = vsel %vm516_vm8, %v2723_v25, %v513_v6  ;;  %v560_v18 = vmul.f32 %v3364_v31, %v559_v62  ;;  %v4264_v1 = vrot.slane %v3325_v30, 1 }
  0xd9   :  { %v575_v37 = vmul.f32 %v507_v54, %v3325_v30  ;;  %v522_v42 = vsel %vm519_vm11, %v521_v52, %v517_v12  ;;  %v578_v13 = vmul.f32 %v2727_v24, %v478_v58  ;;  %v546_v56 = vadd.f32 %v3355_v45, %v545_v10  ;;  %711 = vmatpush.bf16.msrb.mxu0 %v3205_v59  ;;  %v4266_v10 = vld [vmem:[#allocation11_spill] sm:$0xff]  ;;  %v4267_v12 = vld [vmem:[#allocation22_spill] sm:$0xff] }
  0xda   :  { %v576_v29 = vmul.f32 %v4264_v1, %v522_v42  ;;  %vm548_vm10 = vweird.f32 %v3355_v45  ;;  %v553_v25 = vand.u32 2147483648, %v3329_v16  ;;  %v551_v30 = vand.u32 2147483647, %v3329_v16  ;;  %v4270_v42 = vld [vmem:[#allocation13_spill] sm:$0xff]  ;;  %v4272_v1 = vld [vmem:[#allocation15_spill] sm:$0xff] }
  0xdb   :  { %v3396_v57 = vadd.f32 %v577_v0, %v575_v37  ;;  %v561_v24 = vadd.f32 %v3364_v31, %v560_v18  ;;  %vm563_vm14 = vweird.f32 %v3364_v31  ;;  %vm549_vm0 = vmor %vm547_vm13, %vm548_vm10  ;;  %v568_v58 = vand.u32 2147483648, %v3332_v48  ;;  %v4268_v37 = vld [vmem:[#allocation18_spill] sm:$0xff]  ;;  %v4269_v0 = vld [vmem:[#allocation12_spill] sm:$0xff] }
  0xdc   :  { %v3401_v20 = vadd.f32 %v578_v13, %v576_v29  ;;  %v550_v21 = vsel %vm549_vm0, %v3355_v45, %v546_v56  ;;  %vm562_vm7 = vweird.f32 %v3332_v48  ;;  %v566_v14 = vand.u32 2147483647, %v3332_v48  ;;  %v4271_v18 = vld [vmem:[#allocation14_spill] sm:$0xff]  ;;  %v4273_v29 = vld [vmem:[#allocation16_spill] sm:$0xff]  ;;  %v4274_v13 = vld [vmem:[#allocation17_spill] sm:$0xff] }
  0xdd   :  { %2732 = vtanh.f32 %v3396_v57  ;;  %v554_v32 = vor.u32 1.1754944e-38, %v553_v25  ;;  %vm564_vm12 = vmor %vm562_vm7, %vm563_vm14  ;;  %vm552_vm15 = vcmp.eq.f32.partialorder %v551_v30, 8.507059e+37  ;;  %v569_v38 = vor.u32 1.1754944e-38, %v568_v58  ;;  %v4275_v56 = vld [vmem:[#allocation19_spill] sm:$0xff]  ;;  %v3461_v25 = vld [vmem:[%s4204_s5] ss:$0 sm:$0xff] }
  0xde   :  { %2734 = vtanh.f32 %v3401_v20  ;;  %v565_v16 = vsel %vm564_vm12, %v3364_v31, %v561_v24  ;;  %vm567_vm9 = vcmp.eq.f32.partialorder %v566_v14, 8.507059e+37  ;;  %v4265_v31 = vld [vmem:[#allocation20_spill] sm:$0xff]  ;;  %4276 = vst [vmem:[#allocation23_spill] sm:$0xff] %v3461_v25  ;;  %vm659_vm8 = vcmask 123904  }
  0xdf   :  { %v555_v41 = vsel %vm552_vm15, %v554_v32, %v550_v21  ;;  %v570_v7 = vsel %vm567_vm9, %v569_v38, %v565_v16 }
  0xe3   :  { %v2733_v2 = vpop.eup %2732 }
  0xe4   :  { %v583_v61 = vmul.f32 %v2733_v2, %v555_v41  ;;  %v2735_v9 = vpop.eup %2734 }
  0xe5   :  { %v584_v34 = vmul.f32 %v2735_v9, %v570_v7 }
  0xe6   :  { %v585_v45 = vpack.c.bf16 %v583_v61, %v583_v61 }
  0xe7   :  { %v586_v4 = vpack.c.bf16 %v584_v34, %v584_v34 }
  0xe8   :  { %v592_v62 = vunpack.c.l.b16 %v585_v45 }
  0xe9   :  { %v593_v6 = vunpack.c.l.b16 %v586_v4 }
  0xeb   :  { %v594_v48 = vrot.slane %v593_v6, 7 }
  0xed   :  { %v595_v54 = vsel %vm431_vm2, %v594_v48, %v592_v62  ;;  %v662_v62 = vld [vmem:[#allocation2 + $0x1] ss:$8 sm:$0xf] }
  0xee   :  { %v596_v52 = vpack.c.b16 %v595_v54, %v595_v54 }
  0xf0   :  { %654 = vmatmul.bf16.vlgmr.msra.gmra.mxu0 %v596_v52  ;;  %673 = vmatmul.bf16.vlgmr.msra.gmra.mxu1 %v596_v52 }
  0xf1   :  { %686 = vmatmul.bf16.vlgmr.msra.gmra.mxu2 %v596_v52  ;;  %699 = vmatmul.bf16.vlgmr.msra.gmra.mxu3 %v596_v52 }
  0xf2   :  { %934 = vmatpush.bf16.msra.mxu0 %v3109_v22  ;;  %947 = vmatpush.bf16.msra.mxu1 %v3113_v26 }
  0xf3   :  { %1128 = vmatpush.bf16.msra.mxu2 %v3257_v39  ;;  %1151 = vmatpush.bf16.msra.mxu3 %v3105_v17 }
  0xf6   :  { %935 = vmatpush.bf16.msra.mxu0 %v3121_v35  ;;  %948 = vmatpush.bf16.msra.mxu1 %v3123_v36 }
  0xf7   :  { %1129 = vmatpush.bf16.msra.mxu2 %v3264_v47  ;;  %1152 = vmatpush.bf16.msra.mxu3 %v3115_v27 }
  0xfa   :  { %936 = vmatpush.bf16.msra.mxu0 %v3139_v49  ;;  %949 = vmatpush.bf16.msra.mxu1 %v3143_v53 }
  0xfb   :  { %1130 = vmatpush.bf16.msra.mxu2 %v3271_v51  ;;  %1153 = vmatpush.bf16.msra.mxu3 %v3133_v44 }
  0xfe   :  { %937 = vmatpush.bf16.msra.mxu0 %v3154_v63  ;;  %950 = vmatpush.bf16.msra.mxu1 %v3157_v3 }
  0xff   :  { %1131 = vmatpush.bf16.msra.mxu2 %v3280_v5  ;;  %1154 = vmatpush.bf16.msra.mxu3 %v3149_v60 }
 0x100   :  { %712 = vmatmul.bf16.vlgmr.msrb.gmra.mxu0 %v596_v52 }
 0x102   :  { %938 = vmatpush.bf16.msra.mxu0 %v3166_v11  ;;  %951 = vmatpush.bf16.msra.mxu1 %v3169_v15 }
 0x103   :  { %1132 = vmatpush.bf16.msra.mxu2 %v3291_v19  ;;  %1155 = vmatpush.bf16.msra.mxu3 %v3161_v8 }
 0x106   :  { %939 = vmatpush.bf16.msra.mxu0 %v3178_v28  ;;  %952 = vmatpush.bf16.msra.mxu1 %v3181_v33 }
 0x107   :  { %1133 = vmatpush.bf16.msra.mxu2 %v3298_v46  ;;  %1156 = vmatpush.bf16.msra.mxu3 %v3173_v23 }
 0x10a   :  { %940 = vmatpush.bf16.msra.mxu0 %v3190_v43  ;;  %953 = vmatpush.bf16.msra.mxu1 %v3193_v50 }
 0x10b   :  { %1134 = vmatpush.bf16.msra.mxu2 %v3304_v55  ;;  %1157 = vmatpush.bf16.msra.mxu3 %v3185_v40 }
 0x10e   :  { %941 = vmatpush.bf16.msra.mxu0 %v4265_v31  ;;  %954 = vmatpush.bf16.msra.mxu1 %v3205_v59 }
 0x10f   :  { %1135 = vmatpush.bf16.msra.mxu2 %v4267_v12  ;;  %1158 = vmatpush.bf16.msra.mxu3 %v4268_v37 }
 0x112   :  { %1164 = vmatpush.bf16.msrb.mxu0 %v4266_v10 }
 0x116   :  { %1165 = vmatpush.bf16.msrb.mxu0 %v4269_v0 }
 0x11a   :  { %1166 = vmatpush.bf16.msrb.mxu0 %v4270_v42 }
 0x11e   :  { %1167 = vmatpush.bf16.msrb.mxu0 %v4271_v18 }
 0x122   :  { %1168 = vmatpush.bf16.msrb.mxu0 %v4272_v1 }
 0x126   :  { %1169 = vmatpush.bf16.msrb.mxu0 %v4273_v29 }
 0x12a   :  { %1170 = vmatpush.bf16.msrb.mxu0 %v4274_v13 }
 0x12e   :  { %1171 = vmatpush.bf16.msrb.mxu0 %v4275_v56 }
 0x16d   :  { %v655_v30 = vpop.f32.mrf.mxu0  ;;  %v674_v24 = vpop.f32.mrf.mxu1 }
 0x16e   :  { %v656_v58 = vadd.f32 %v3461_v25, %v655_v30 }
 0x170   :  { %660 = vst.msk [vmem:[#allocation8] sm:$0x3] %vm659_vm8, %v656_v58  ;;  %v664_v58 = vld [vmem:[#allocation2 + $0x21] ss:$8 sm:$0xf] }
 0x174   :  { %v687_v21 = vpop.f32.mrf.mxu2  ;;  %v700_v14 = vpop.f32.mrf.mxu3 }
 0x175   :  { %v657_v32 = vpop.f32.mrf.mxu0  ;;  %v676_v16 = vpop.f32.mrf.mxu1  ;;  %v721_v2 = vrot.slane %v687_v21, 7  ;;  %v722_v9 = vrot.slane %v700_v14, 6 }
 0x177   :  { %v724_v34 = vsel %vm425_vm1, %v674_v24, %v721_v2  ;;  %v727_v45 = vsel %vm431_vm2, %v674_v24, %v721_v2 }
 0x17c   :  { %v689_v41 = vpop.f32.mrf.mxu2  ;;  %v702_v38 = vpop.f32.mrf.mxu3 }
 0x17d   :  { %v713_v61 = vpop.f32.mrf.mxu0 }
 0x17e   :  { %v723_v7 = vrot.slane %v713_v61, 5 }
 0x180   :  { %v725_v4 = vsel %vm427_vm3, %v722_v9, %v723_v7  ;;  %v728_v6 = vsel %vm433_vm5, %v722_v9, %v723_v7 }
 0x181   :  { %v726_v48 = vsel %vm429_vm4, %v724_v34, %v725_v4  ;;  %v729_v54 = vsel %vm4230_vm6, %v727_v45, %v728_v6 }
 0x182   :  { %v730_v52 = vrot.slane %v729_v54, 1  ;;  %v733_v30 = vadd.f32 %v726_v48, %v662_v62 }
 0x184   :  { %v734_v21 = vadd.f32 %v730_v52, %v664_v58  ;;  %v2603_v32 = vmul.f32 -1.442695, %v733_v30  ;;  %v775_v14 = vrot.slane %v733_v30, 1  ;;  %v823_v16 = vrot.slane %v733_v30, 3 }
 0x185   :  { %v715_v41 = vpop.f32.mrf.mxu0  ;;  %v817_v58 = vrot.slane %v733_v30, 2 }
 0x186   :  { %2736 = vpow2.f32 %v2603_v32  ;;  %v2604_v38 = vmul.f32 -1.442695, %v734_v21  ;;  %v776_v24 = vrot.slane %v734_v21, 1  ;;  %v2605_v2 = vmul.f32 -1.442695, %v775_v14 }
 0x187   :  { %v824_v61 = vrot.slane %v734_v21, 3  ;;  %v2607_v7 = vmul.f32 -1.442695, %v823_v16  ;;  %v818_v16 = vrot.slane %v734_v21, 2 }
 0x188   :  { %2738 = vpow2.f32 %v2604_v38  ;;  %v2606_v9 = vmul.f32 -1.442695, %v776_v24 }
 0x189   :  { %2740 = vpow2.f32 %v2605_v2  ;;  %v2608_v34 = vmul.f32 -1.442695, %v824_v61 }
 0x18a   :  { %2742 = vpow2.f32 %v2606_v9 }
 0x18b   :  { %2744 = vpow2.f32 %v2607_v7 }
 0x18c   :  { %v2737_v45 = vpop.eup %2736  ;;  %2746 = vpow2.f32 %v2608_v34 }
 0x18d   :  { %v741_v4 = vadd.f32 1.0, %v2737_v45 }
 0x18e   :  { %v2739_v6 = vpop.eup %2738 }
 0x18f   :  { %v2741_v62 = vpop.eup %2740  ;;  %v742_v48 = vadd.f32 1.0, %v2739_v6  ;;  %2748 = vrcp.f32 %v741_v4  ;;  %v752_v38 = vand.u32 2147483647, %v741_v4  ;;  %v754_v2 = vand.u32 2147483648, %v741_v4 }
 0x190   :  { %v2743_v54 = vpop.eup %2742  ;;  %v3470_v52 = vadd.f32 1.0, %v2741_v62  ;;  %vm748_vm11 = vweird.f32 %v741_v4 }
 0x191   :  { %2750 = vrcp.f32 %v742_v48  ;;  %v2745_v32 = vpop.eup %2744  ;;  %v3472_v14 = vadd.f32 1.0, %v2743_v54  ;;  %v767_v61 = vand.u32 2147483647, %v742_v48  ;;  %vm3480_vm10 = vcmp.eq.f32.partialorder %v752_v38, 8.507059e+37 }
 0x192   :  { %2752 = vrcp.f32 %v3470_v52  ;;  %v2747_v41 = vpop.eup %2746  ;;  %v3476_v9 = vadd.f32 1.0, %v2745_v32  ;;  %v769_v21 = vand.u32 2147483648, %v742_v48  ;;  %vm763_vm13 = vweird.f32 %v742_v48 }
 0x193   :  { %2754 = vrcp.f32 %v3472_v14  ;;  %v3478_v34 = vadd.f32 1.0, %v2747_v41  ;;  %vm3486_vm14 = vcmp.eq.f32.partialorder %v767_v61, 8.507059e+37  ;;  %vm792_vm0 = vweird.f32 %v3470_v52 }
 0x194   :  { %2756 = vtanh.f32 %v817_v58  ;;  %v755_v58 = vor.u32 1.1754944e-38, %v754_v2  ;;  %v796_v56 = vand.u32 2147483647, %v3470_v52  ;;  %v770_v13 = vor.u32 1.1754944e-38, %v769_v21 }
 0x195   :  { %v2749_v24 = vpop.eup %2748  ;;  %2758 = vtanh.f32 %v818_v16  ;;  %v798_v1 = vand.u32 2147483648, %v3470_v52  ;;  %vm807_vm15 = vweird.f32 %v3472_v14 }
 0x196   :  { %v744_v7 = vmul.f32 %v2749_v24, %v741_v4  ;;  %2760 = vrcp.f32 %v3476_v9  ;;  %vm749_vm7 = vweird.f32 %v2749_v24 }
 0x197   :  { %v2751_v30 = vpop.eup %2750  ;;  %2762 = vrcp.f32 %v3478_v34  ;;  %vm3497_vm9 = vmor %vm748_vm11, %vm749_vm7 }
 0x198   :  { %v2753_v6 = vpop.eup %2752  ;;  %v745_v62 = vsub.f32 1.0, %v744_v7  ;;  %v759_v54 = vmul.f32 %v2751_v30, %v742_v48  ;;  %vm764_vm12 = vweird.f32 %v2751_v30 }
 0x199   :  { %v788_v16 = vmul.f32 %v2753_v6, %v3470_v52  ;;  %v2755_v41 = vpop.eup %2754  ;;  %vm793_vm8 = vweird.f32 %v2753_v6  ;;  %vm765_vm6 = vmor %vm763_vm13, %vm764_vm12 }
 0x19a   :  { %v746_v38 = vmul.f32 %v2749_v24, %v745_v62  ;;  %v760_v25 = vsub.f32 1.0, %v759_v54  ;;  %v2757_v7 = vpop.eup %2756  ;;  %v803_v2 = vmul.f32 %v2755_v41, %v3472_v14  ;;  %vm808_vm11 = vweird.f32 %v2755_v41  ;;  %vm794_vm7 = vmor %vm792_vm0, %vm793_vm8 }
 0x19b   :  { %v789_v29 = vsub.f32 1.0, %v788_v16  ;;  %v2759_v61 = vpop.eup %2758  ;;  %v811_v16 = vand.u32 2147483647, %v3472_v14  ;;  %vm809_vm13 = vmor %vm807_vm15, %vm808_vm11  ;;  %vm855_vm15 = vweird.f32 %v3478_v34 }
 0x19c   :  { %v747_v18 = vadd.f32 %v2749_v24, %v746_v38  ;;  %v761_v42 = vmul.f32 %v2751_v30, %v760_v25  ;;  %v2761_v0 = vpop.eup %2760  ;;  %v804_v21 = vsub.f32 1.0, %v803_v2  ;;  %v813_v25 = vand.u32 2147483648, %v3472_v14 }
 0x19d   :  { %v790_v54 = vmul.f32 %v2753_v6, %v789_v29  ;;  %v2763_v37 = vpop.eup %2762  ;;  %v836_v10 = vmul.f32 %v2761_v0, %v3476_v9 }
 0x19e   :  { %v751_v12 = vsel %vm3497_vm9, %v2749_v24, %v747_v18  ;;  %v762_v38 = vadd.f32 %v2751_v30, %v761_v42  ;;  %v805_v59 = vmul.f32 %v2755_v41, %v804_v21  ;;  %v851_v29 = vmul.f32 %v2763_v37, %v3478_v34 }
 0x19f   :  { %v791_v4 = vadd.f32 %v2753_v6, %v790_v54  ;;  %v756_v2 = vsel %vm3480_vm10, %v755_v58, %v751_v12  ;;  %v799_v42 = vor.u32 1.1754944e-38, %v798_v1  ;;  %v837_v18 = vsub.f32 1.0, %v836_v10 }
 0x1a0   :  { %v766_v31 = vsel %vm765_vm6, %v2751_v30, %v762_v38  ;;  %vm797_vm9 = vcmp.eq.f32.partialorder %v796_v56, 8.507059e+37  ;;  %v806_v62 = vadd.f32 %v2755_v41, %v805_v59  ;;  %v852_v48 = vsub.f32 1.0, %v851_v29 }
 0x1a1   :  { %v795_v24 = vsel %vm794_vm7, %v2753_v6, %v791_v4  ;;  %v771_v54 = vsel %vm3486_vm14, %v770_v13, %v766_v31  ;;  %v814_v45 = vor.u32 1.1754944e-38, %v813_v25  ;;  %v838_v12 = vmul.f32 %v2761_v0, %v837_v18 }
 0x1a2   :  { %v800_v21 = vsel %vm797_vm9, %v799_v42, %v795_v24  ;;  %v810_v30 = vsel %vm809_vm13, %v2755_v41, %v806_v62  ;;  %vm812_vm6 = vcmp.eq.f32.partialorder %v811_v16, 8.507059e+37  ;;  %v867_v58 = vmul.f32 %v2757_v7, %v756_v2 }
 0x1a3   :  { %v865_v52 = vmul.f32 %v800_v21, %v3396_v57  ;;  %v815_v1 = vsel %vm812_vm6, %v814_v45, %v810_v30  ;;  %v853_v10 = vmul.f32 %v2763_v37, %v852_v48  ;;  %v868_v59 = vmul.f32 %v2759_v61, %v771_v54  ;;  %v4290_v21 = vld [vmem:[#allocation14_spill] sm:$0xff]  ;;  %v4291_v45 = vld [vmem:[#allocation15_spill] sm:$0xff] }
 0x1a4   :  { %v866_v56 = vmul.f32 %v815_v1, %v3401_v20  ;;  %v839_v32 = vadd.f32 %v2761_v0, %v838_v12  ;;  %vm841_vm10 = vweird.f32 %v2761_v0  ;;  %v846_v13 = vand.u32 2147483648, %v3476_v9  ;;  %v4293_v12 = vld [vmem:[#allocation17_spill] sm:$0xff]  ;;  %v4294_v30 = vld [vmem:[#allocation19_spill] sm:$0xff] }
 0x1a5   :  { %v3519_v6 = vadd.f32 %v867_v58, %v865_v52  ;;  %vm840_vm14 = vweird.f32 %v3476_v9  ;;  %v844_v57 = vand.u32 2147483647, %v3476_v9  ;;  %v854_v14 = vadd.f32 %v2763_v37, %v853_v10  ;;  %v4295_v1 = vld [vmem:[#allocation23_spill] sm:$0xff] }
 0x1a6   :  { %v3521_v31 = vadd.f32 %v868_v59, %v866_v56  ;;  %vm856_vm0 = vweird.f32 %v2763_v37  ;;  %vm842_vm12 = vmor %vm840_vm14, %vm841_vm10  ;;  %v861_v20 = vand.u32 2147483648, %v3478_v34  ;;  %v859_v7 = vand.u32 2147483647, %v3478_v34 }
 0x1a7   :  { %2764 = vtanh.f32 %v3519_v6  ;;  %v843_v41 = vsel %vm842_vm12, %v2761_v0, %v839_v32  ;;  %v847_v61 = vor.u32 1.1754944e-38, %v846_v13  ;;  %vm857_vm8 = vmor %vm855_vm15, %vm856_vm0  ;;  %vm845_vm11 = vcmp.eq.f32.partialorder %v844_v57, 8.507059e+37 }
 0x1a8   :  { %2766 = vtanh.f32 %v3521_v31  ;;  %v858_v16 = vsel %vm857_vm8, %v2763_v37, %v854_v14  ;;  %v862_v4 = vor.u32 1.1754944e-38, %v861_v20  ;;  %vm860_vm7 = vcmp.eq.f32.partialorder %v859_v7, 8.507059e+37  ;;  %v4289_v37 = vld [vmem:[#allocation13_spill] sm:$0xff] }
 0x1a9   :  { %v848_v25 = vsel %vm845_vm11, %v847_v61, %v843_v41  ;;  %vm4296_vm9 = vcmask 1042433  }
 0x1aa   :  { %v863_v2 = vsel %vm860_vm7, %v862_v4, %v858_v16 }
 0x1ad   :  { %v2765_v38 = vpop.eup %2764 }
 0x1ae   :  { %v873_v9 = vmul.f32 %v2765_v38, %v848_v25  ;;  %v2767_v29 = vpop.eup %2766 }
 0x1af   :  { %v874_v42 = vmul.f32 %v2767_v29, %v863_v2 }
 0x1b0   :  { %v875_v18 = vpack.c.bf16 %v873_v9, %v873_v9  ;;  %v905_v9 = vld [vmem:[#allocation2 + $0x2] ss:$8 sm:$0xf] }
 0x1b1   :  { %v876_v24 = vpack.c.bf16 %v874_v42, %v874_v42 }
 0x1b2   :  { %v879_v0 = vunpack.c.l.b16 %v875_v18 }
 0x1b3   :  { %v880_v62 = vunpack.c.l.b16 %v876_v24  ;;  %v907_v24 = vld [vmem:[#allocation2 + $0x22] ss:$8 sm:$0xf] }
 0x1b5   :  { %v881_v48 = vrot.slane %v880_v62, 7 }
 0x1b7   :  { %v882_v54 = vsel %vm431_vm2, %v881_v48, %v879_v0 }
 0x1b8   :  { %v883_v34 = vpack.c.b16 %v882_v54, %v882_v54 }
 0x1ba   :  { %893 = vmatmul.bf16.vlgmr.msrb.gmra.mxu1 %v883_v34  ;;  %916 = vmatmul.bf16.vlgmr.msrb.gmra.mxu2 %v883_v34 }
 0x1bb   :  { %929 = vmatmul.bf16.vlgmr.msrb.gmra.mxu3 %v883_v34  ;;  %942 = vmatmul.bf16.vlgmr.msra.gmra.mxu0 %v883_v34 }
 0x1bc   :  { %1177 = vmatpush.bf16.msrb.mxu1 %v3109_v22  ;;  %1190 = vmatpush.bf16.msrb.mxu2 %v3113_v26 }
 0x1bd   :  { %1371 = vmatpush.bf16.msrb.mxu3 %v3257_v39  ;;  %1394 = vmatpush.bf16.msra.mxu0 %v3105_v17  ;;  %v4283_v39 = vld [vmem:[#allocation20_spill] sm:$0xff] }
 0x1c0   :  { %1178 = vmatpush.bf16.msrb.mxu1 %v3121_v35  ;;  %1191 = vmatpush.bf16.msrb.mxu2 %v3123_v36 }
 0x1c1   :  { %1372 = vmatpush.bf16.msrb.mxu3 %v3264_v47  ;;  %1395 = vmatpush.bf16.msra.mxu0 %v3115_v27  ;;  %v4284_v47 = vld [vmem:[#allocation21_spill] sm:$0xff] }
 0x1c4   :  { %1179 = vmatpush.bf16.msrb.mxu1 %v3139_v49  ;;  %1192 = vmatpush.bf16.msrb.mxu2 %v3143_v53 }
 0x1c5   :  { %1373 = vmatpush.bf16.msrb.mxu3 %v3271_v51  ;;  %1396 = vmatpush.bf16.msra.mxu0 %v3133_v44  ;;  %v4285_v51 = vld [vmem:[#allocation11_spill] sm:$0xff] }
 0x1c8   :  { %1180 = vmatpush.bf16.msrb.mxu1 %v3154_v63  ;;  %1193 = vmatpush.bf16.msrb.mxu2 %v3157_v3 }
 0x1c9   :  { %1374 = vmatpush.bf16.msrb.mxu3 %v3280_v5  ;;  %1397 = vmatpush.bf16.msra.mxu0 %v3149_v60  ;;  %v4286_v5 = vld [vmem:[#allocation22_spill] sm:$0xff] }
 0x1ca   :  { %955 = vmatmul.bf16.vlgmr.msra.gmra.mxu1 %v883_v34 }
 0x1cc   :  { %1181 = vmatpush.bf16.msrb.mxu1 %v3166_v11  ;;  %1194 = vmatpush.bf16.msrb.mxu2 %v3169_v15 }
 0x1cd   :  { %1375 = vmatpush.bf16.msrb.mxu3 %v3291_v19  ;;  %1398 = vmatpush.bf16.msra.mxu0 %v3161_v8  ;;  %v4287_v19 = vld [vmem:[#allocation18_spill] sm:$0xff] }
 0x1d0   :  { %1182 = vmatpush.bf16.msrb.mxu1 %v3178_v28  ;;  %1195 = vmatpush.bf16.msrb.mxu2 %v3181_v33 }
 0x1d1   :  { %1376 = vmatpush.bf16.msrb.mxu3 %v3298_v46  ;;  %1399 = vmatpush.bf16.msra.mxu0 %v3173_v23  ;;  %v4288_v46 = vld [vmem:[#allocation12_spill] sm:$0xff] }
 0x1d4   :  { %1183 = vmatpush.bf16.msrb.mxu1 %v3190_v43  ;;  %1196 = vmatpush.bf16.msrb.mxu2 %v3193_v50 }
 0x1d5   :  { %1377 = vmatpush.bf16.msrb.mxu3 %v3304_v55  ;;  %1400 = vmatpush.bf16.msra.mxu0 %v3185_v40  ;;  %v4292_v55 = vld [vmem:[#allocation16_spill] sm:$0xff] }
 0x1d8   :  { %1184 = vmatpush.bf16.msrb.mxu1 %v4283_v39  ;;  %1197 = vmatpush.bf16.msrb.mxu2 %v4284_v47 }
 0x1d9   :  { %1378 = vmatpush.bf16.msrb.mxu3 %v4286_v5  ;;  %1401 = vmatpush.bf16.msra.mxu0 %v4287_v19 }
 0x1dc   :  { %1407 = vmatpush.bf16.msra.mxu1 %v4285_v51 }
 0x1e0   :  { %1408 = vmatpush.bf16.msra.mxu1 %v4288_v46 }
 0x1e4   :  { %1409 = vmatpush.bf16.msra.mxu1 %v4289_v37 }
 0x1e8   :  { %1410 = vmatpush.bf16.msra.mxu1 %v4290_v21 }
 0x1ec   :  { %1411 = vmatpush.bf16.msra.mxu1 %v4291_v45 }
 0x1f0   :  { %1412 = vmatpush.bf16.msra.mxu1 %v4292_v55 }
 0x1f4   :  { %1413 = vmatpush.bf16.msra.mxu1 %v4293_v12 }
 0x1f8   :  { %1414 = vmatpush.bf16.msra.mxu1 %v4294_v30 }
 0x237   :  { %v894_v52 = vpop.f32.mrf.mxu1 }
 0x238   :  { %v943_v58 = vpop.f32.mrf.mxu0  ;;  %v895_v10 = vadd.f32 %v4295_v1, %v894_v52 }
 0x239   :  { %v965_v7 = vrot.slane %v943_v58, 6 }
 0x23a   :  { %899 = vrot.lane.b32.xlu0 %v895_v10, %s3032_s27 }
 0x23d   :  { %v917_v56 = vpop.f32.mrf.mxu2 }
 0x23e   :  { %v930_v59 = vpop.f32.mrf.mxu3 }
 0x23f   :  { %v896_v32 = vpop.f32.mrf.mxu1  ;;  %v964_v14 = vrot.slane %v930_v59, 7 }
 0x240   :  { %v945_v13 = vpop.f32.mrf.mxu0 }
 0x241   :  { %v967_v16 = vsel %vm425_vm1, %v917_v56, %v964_v14  ;;  %v970_v38 = vsel %vm431_vm2, %v917_v56, %v964_v14 }
 0x245   :  { %v919_v57 = vpop.f32.mrf.mxu2 }
 0x246   :  { %v932_v20 = vpop.f32.mrf.mxu3 }
 0x247   :  { %v956_v41 = vpop.f32.mrf.mxu1 }
 0x248   :  { %v966_v61 = vrot.slane %v956_v41, 5 }
 0x24a   :  { %v968_v25 = vsel %vm427_vm3, %v965_v7, %v966_v61  ;;  %v971_v4 = vsel %vm433_vm5, %v965_v7, %v966_v61 }
 0x24b   :  { %v969_v29 = vsel %vm429_vm4, %v967_v16, %v968_v25  ;;  %v972_v2 = vsel %vm4296_vm9, %v970_v38, %v971_v4 }
 0x24c   :  { %v973_v42 = vrot.slane %v972_v2, 1  ;;  %v976_v18 = vadd.f32 %v969_v29, %v905_v9 }
 0x24e   :  { %v977_v62 = vadd.f32 %v973_v42, %v907_v24  ;;  %v2609_v0 = vmul.f32 -1.442695, %v976_v18  ;;  %v1018_v48 = vrot.slane %v976_v18, 1  ;;  %v1066_v54 = vrot.slane %v976_v18, 3 }
 0x24f   :  { %v958_v34 = vpop.f32.mrf.mxu1  ;;  %v1060_v16 = vrot.slane %v976_v18, 2 }
 0x250   :  { %2768 = vpow2.f32 %v2609_v0  ;;  %v2610_v5 = vmul.f32 -1.442695, %v977_v62  ;;  %v1019_v52 = vrot.slane %v977_v62, 1  ;;  %v2611_v58 = vmul.f32 -1.442695, %v1018_v48 }
 0x251   :  { %v1067_v10 = vrot.slane %v977_v62, 3  ;;  %v2613_v59 = vmul.f32 -1.442695, %v1066_v54  ;;  %v1061_v4 = vrot.slane %v977_v62, 2 }
 0x252   :  { %2770 = vpow2.f32 %v2610_v5  ;;  %v2612_v56 = vmul.f32 -1.442695, %v1019_v52 }
 0x253   :  { %2772 = vpow2.f32 %v2611_v58  ;;  %v2614_v32 = vmul.f32 -1.442695, %v1067_v10 }
 0x254   :  { %2774 = vpow2.f32 %v2612_v56 }
 0x255   :  { %2776 = vpow2.f32 %v2613_v59 }
 0x256   :  { %v2769_v13 = vpop.eup %2768  ;;  %2778 = vpow2.f32 %v2614_v32 }
 0x257   :  { %v984_v57 = vadd.f32 1.0, %v2769_v13 }
 0x258   :  { %v2771_v14 = vpop.eup %2770 }
 0x259   :  { %v2773_v20 = vpop.eup %2772  ;;  %v985_v41 = vadd.f32 1.0, %v2771_v14  ;;  %2780 = vrcp.f32 %v984_v57  ;;  %v995_v29 = vand.u32 2147483647, %v984_v57  ;;  %v997_v42 = vand.u32 2147483648, %v984_v57 }
 0x25a   :  { %v2775_v7 = vpop.eup %2774  ;;  %v3580_v61 = vadd.f32 1.0, %v2773_v20  ;;  %vm991_vm13 = vweird.f32 %v984_v57 }
 0x25b   :  { %2782 = vrcp.f32 %v985_v41  ;;  %v2777_v38 = vpop.eup %2776  ;;  %v3582_v25 = vadd.f32 1.0, %v2775_v7  ;;  %v1010_v24 = vand.u32 2147483647, %v985_v41  ;;  %vm3590_vm6 = vcmp.eq.f32.partialorder %v995_v29, 8.507059e+37 }
 0x25c   :  { %2784 = vrcp.f32 %v3580_v61  ;;  %v2779_v9 = vpop.eup %2778  ;;  %v3586_v0 = vadd.f32 1.0, %v2777_v38  ;;  %v1012_v62 = vand.u32 2147483648, %v985_v41  ;;  %vm1006_vm10 = vweird.f32 %v985_v41 }
 0x25d   :  { %2786 = vrcp.f32 %v3582_v25  ;;  %v3588_v54 = vadd.f32 1.0, %v2779_v9  ;;  %v998_v10 = vor.u32 1.1754944e-38, %v997_v42  ;;  %vm3596_vm14 = vcmp.eq.f32.partialorder %v1010_v24, 8.507059e+37 }
 0x25e   :  { %2788 = vtanh.f32 %v1060_v16  ;;  %vm1035_vm0 = vweird.f32 %v3580_v61  ;;  %v1039_v20 = vand.u32 2147483647, %v3580_v61  ;;  %v1013_v16 = vor.u32 1.1754944e-38, %v1012_v62 }
 0x25f   :  { %v2781_v2 = vpop.eup %2780  ;;  %2790 = vtanh.f32 %v1061_v4  ;;  %v1041_v4 = vand.u32 2147483648, %v3580_v61  ;;  %vm1050_vm8 = vweird.f32 %v3582_v25 }
 0x260   :  { %v987_v48 = vmul.f32 %v2781_v2, %v984_v57  ;;  %2792 = vrcp.f32 %v3586_v0  ;;  %vm992_vm12 = vweird.f32 %v2781_v2 }
 0x261   :  { %v2783_v18 = vpop.eup %2782  ;;  %2794 = vrcp.f32 %v3588_v54  ;;  %vm3607_vm11 = vmor %vm991_vm13, %vm992_vm12 }
 0x262   :  { %v2785_v5 = vpop.eup %2784  ;;  %v988_v52 = vsub.f32 1.0, %v987_v48  ;;  %v1002_v58 = vmul.f32 %v2783_v18, %v985_v41  ;;  %vm1007_vm15 = vweird.f32 %v2783_v18 }
 0x263   :  { %v1031_v59 = vmul.f32 %v2785_v5, %v3580_v61  ;;  %v2787_v32 = vpop.eup %2786  ;;  %vm1036_vm7 = vweird.f32 %v2785_v5  ;;  %vm1008_vm9 = vmor %vm1006_vm10, %vm1007_vm15 }
 0x264   :  { %v989_v13 = vmul.f32 %v2781_v2, %v988_v52  ;;  %v1003_v14 = vsub.f32 1.0, %v1002_v58  ;;  %v2789_v7 = vpop.eup %2788  ;;  %v1046_v9 = vmul.f32 %v2787_v32, %v3582_v25  ;;  %vm1051_vm13 = vweird.f32 %v2787_v32  ;;  %vm1037_vm12 = vmor %vm1035_vm0, %vm1036_vm7 }
 0x265   :  { %v1032_v38 = vsub.f32 1.0, %v1031_v59  ;;  %v2791_v29 = vpop.eup %2790  ;;  %v1054_v59 = vand.u32 2147483647, %v3582_v25  ;;  %vm1052_vm10 = vmor %vm1050_vm8, %vm1051_vm13  ;;  %vm1083_vm0 = vweird.f32 %v3586_v0  ;;  %vm1098_vm7 = vweird.f32 %v3588_v54 }
 0x266   :  { %v990_v42 = vadd.f32 %v2781_v2, %v989_v13  ;;  %v1004_v24 = vmul.f32 %v2783_v18, %v1003_v14  ;;  %v2793_v48 = vpop.eup %2792  ;;  %v1047_v62 = vsub.f32 1.0, %v1046_v9  ;;  %v1056_v14 = vand.u32 2147483648, %v3582_v25 }
 0x267   :  { %v1033_v58 = vmul.f32 %v2785_v5, %v1032_v38  ;;  %v2795_v1 = vpop.eup %2794  ;;  %v1079_v12 = vmul.f32 %v2793_v48, %v3586_v0  ;;  %v1089_v25 = vand.u32 2147483648, %v3586_v0 }
 0x268   :  { %v994_v30 = vsel %vm3607_vm11, %v2781_v2, %v990_v42  ;;  %v1005_v13 = vadd.f32 %v2783_v18, %v1004_v24  ;;  %v1048_v55 = vmul.f32 %v2787_v32, %v1047_v62  ;;  %v1094_v38 = vmul.f32 %v2795_v1, %v3588_v54 }
 0x269   :  { %v1034_v57 = vadd.f32 %v2785_v5, %v1033_v58  ;;  %v999_v9 = vsel %vm3590_vm6, %v998_v10, %v994_v30  ;;  %v1042_v2 = vor.u32 1.1754944e-38, %v1041_v4  ;;  %v1080_v42 = vsub.f32 1.0, %v1079_v12 }
 0x26a   :  { %v1009_v45 = vsel %vm1008_vm9, %v2783_v18, %v1005_v13  ;;  %vm1040_vm11 = vcmp.eq.f32.partialorder %v1039_v20, 8.507059e+37  ;;  %v1049_v52 = vadd.f32 %v2787_v32, %v1048_v55  ;;  %v1095_v41 = vsub.f32 1.0, %v1094_v38 }
 0x26b   :  { %v1038_v24 = vsel %vm1037_vm12, %v2785_v5, %v1034_v57  ;;  %v1014_v58 = vsel %vm3596_vm14, %v1013_v16, %v1009_v45  ;;  %v1057_v34 = vor.u32 1.1754944e-38, %v1056_v14  ;;  %v1081_v30 = vmul.f32 %v2793_v48, %v1080_v42 }
 0x26c   :  { %v1043_v62 = vsel %vm1040_vm11, %v1042_v2, %v1038_v24  ;;  %v1053_v18 = vsel %vm1052_vm10, %v2787_v32, %v1049_v52  ;;  %vm1055_vm6 = vcmp.eq.f32.partialorder %v1054_v59, 8.507059e+37  ;;  %v1110_v10 = vmul.f32 %v2789_v7, %v999_v9 }
 0x26d   :  { %v1108_v61 = vmul.f32 %v1043_v62, %v3519_v6  ;;  %v1058_v4 = vsel %vm1055_vm6, %v1057_v34, %v1053_v18  ;;  %v1096_v12 = vmul.f32 %v2795_v1, %v1095_v41  ;;  %v1111_v55 = vmul.f32 %v2791_v29, %v1014_v58  ;;  %v3656_v62 = vld [vmem:[%s4203_s4 + $0x30] sm:$0xff]  ;;  %v3665_v34 = vld [vmem:[%s4203_s4 + $0x28] sm:$0xff]  ;;  %v3683_v18 = vld [vmem:[%s4203_s4 + $0x18] sm:$0xff] }
 0x26e   :  { %v1109_v5 = vmul.f32 %v1058_v4, %v3521_v31  ;;  %v1082_v56 = vadd.f32 %v2793_v48, %v1081_v30  ;;  %vm1084_vm14 = vweird.f32 %v2793_v48  ;;  %v1087_v6 = vand.u32 2147483647, %v3586_v0  ;;  %v3674_v30 = vld [vmem:[%s4203_s4 + $0x20] sm:$0xff] }
 0x26f   :  { %v3629_v20 = vadd.f32 %v1110_v10, %v1108_v61  ;;  %v1097_v32 = vadd.f32 %v2795_v1, %v1096_v12  ;;  %vm1099_vm15 = vweird.f32 %v2795_v1  ;;  %vm1085_vm8 = vmor %vm1083_vm0, %vm1084_vm14  ;;  %v1104_v31 = vand.u32 2147483648, %v3588_v54  ;;  %v3692_v61 = vld [vmem:[%s4203_s4 + $0x10] sm:$0xff]  ;;  %v3701_v10 = vld [vmem:[%s4203_s4 + $0x8] sm:$0xff] }
 0x270   :  { %v3631_v45 = vadd.f32 %v1111_v55, %v1109_v5  ;;  %v1086_v7 = vsel %vm1085_vm8, %v2793_v48, %v1082_v56  ;;  %v1102_v16 = vand.u32 2147483647, %v3588_v54  ;;  %v1090_v29 = vor.u32 1.1754944e-38, %v1089_v25  ;;  %vm1100_vm9 = vmor %vm1098_vm7, %vm1099_vm15  ;;  %v3711_v4 = vld [vmem:[%s4203_s4] sm:$0xff]  ;;  %v4304_v5 = vld [vmem:[#allocation15_spill] sm:$0xff] }
 0x271   :  { %2796 = vtanh.f32 %v3629_v20  ;;  %vm1088_vm13 = vcmp.eq.f32.partialorder %v1087_v6, 8.507059e+37  ;;  %v1101_v59 = vsel %vm1100_vm9, %v2795_v1, %v1097_v32  ;;  %v1105_v57 = vor.u32 1.1754944e-38, %v1104_v31  ;;  %v3647_v1 = vld [vmem:[%s4203_s4 + $0x38] sm:$0xff]  ;;  %4303 = vst [vmem:[#allocation22_spill] sm:$0xff] %v3711_v4  ;;  %v4307_v25 = vld [vmem:[#allocation19_spill] sm:$0xff] }
 0x272   :  { %2798 = vtanh.f32 %v3631_v45  ;;  %v1091_v14 = vsel %vm1088_vm13, %v1090_v29, %v1086_v7  ;;  %vm1103_vm12 = vcmp.eq.f32.partialorder %v1102_v16, 8.507059e+37  ;;  %vm902_vm11 = vcmask 255104   ;;  %v4305_v55 = vld [vmem:[#allocation16_spill] sm:$0xff]  ;;  %v4306_v56 = vld [vmem:[#allocation17_spill] sm:$0xff]  ;;  %v4308_v16 = vld [vmem:[#allocation23_spill] sm:$0xff] }
 0x273   :  { %v1106_v9 = vsel %vm1103_vm12, %v1105_v57, %v1101_v59  ;;  %vm4309_vm10 = vcmask 1042433  }
 0x277   :  { %v2797_v13 = vpop.eup %2796 }
 0x278   :  { %v1116_v0 = vmul.f32 %v2797_v13, %v1091_v14  ;;  %v2799_v38 = vpop.eup %2798 }
 0x279   :  { %v1117_v2 = vmul.f32 %v2799_v38, %v1106_v9 }
 0x27a   :  { %v1118_v42 = vpack.c.bf16 %v1116_v0, %v1116_v0 }
 0x27b   :  { %v1119_v24 = vpack.c.bf16 %v1117_v2, %v1117_v2 }
 0x27c   :  { %v1122_v48 = vunpack.c.l.b16 %v1118_v42 }
 0x27d   :  { %v1123_v52 = vunpack.c.l.b16 %v1119_v24 }
 0x27f   :  { %v1124_v41 = vrot.slane %v1123_v52, 7 }
 0x281   :  { %v1125_v58 = vsel %vm431_vm2, %v1124_v41, %v1122_v48  ;;  %v1148_v41 = vld [vmem:[#allocation2 + $0x3] ss:$8 sm:$0xf] }
 0x282   :  { %v1126_v54 = vpack.c.b16 %v1125_v58, %v1125_v58 }
 0x284   :  { %1136 = vmatmul.bf16.vlgmr.msra.gmra.mxu2 %v1126_v54  ;;  %1159 = vmatmul.bf16.vlgmr.msra.gmra.mxu3 %v1126_v54 }
 0x285   :  { %1172 = vmatmul.bf16.vlgmr.msrb.gmra.mxu0 %v1126_v54  ;;  %1185 = vmatmul.bf16.vlgmr.msrb.gmra.mxu1 %v1126_v54 }
 0x286   :  { %1420 = vmatpush.bf16.msra.mxu2 %v3109_v22  ;;  %1433 = vmatpush.bf16.msra.mxu3 %v3113_v26 }
 0x287   :  { %1614 = vmatpush.bf16.msrb.mxu0 %v3647_v1  ;;  %1637 = vmatpush.bf16.msrb.mxu1 %v3105_v17 }
 0x28a   :  { %1421 = vmatpush.bf16.msra.mxu2 %v3121_v35  ;;  %1434 = vmatpush.bf16.msra.mxu3 %v3123_v36 }
 0x28b   :  { %1615 = vmatpush.bf16.msrb.mxu0 %v3656_v62  ;;  %1638 = vmatpush.bf16.msrb.mxu1 %v3115_v27 }
 0x28e   :  { %1422 = vmatpush.bf16.msra.mxu2 %v3139_v49  ;;  %1435 = vmatpush.bf16.msra.mxu3 %v3143_v53 }
 0x28f   :  { %1616 = vmatpush.bf16.msrb.mxu0 %v3665_v34  ;;  %1639 = vmatpush.bf16.msrb.mxu1 %v3133_v44 }
 0x292   :  { %1423 = vmatpush.bf16.msra.mxu2 %v3154_v63  ;;  %1436 = vmatpush.bf16.msra.mxu3 %v3157_v3 }
 0x293   :  { %1617 = vmatpush.bf16.msrb.mxu0 %v3674_v30  ;;  %1640 = vmatpush.bf16.msrb.mxu1 %v3149_v60 }
 0x294   :  { %1198 = vmatmul.bf16.vlgmr.msrb.gmra.mxu2 %v1126_v54 }
 0x296   :  { %1424 = vmatpush.bf16.msra.mxu2 %v3166_v11  ;;  %1437 = vmatpush.bf16.msra.mxu3 %v3169_v15 }
 0x297   :  { %1618 = vmatpush.bf16.msrb.mxu0 %v3683_v18  ;;  %1641 = vmatpush.bf16.msrb.mxu1 %v3161_v8 }
 0x29a   :  { %1425 = vmatpush.bf16.msra.mxu2 %v3178_v28  ;;  %1438 = vmatpush.bf16.msra.mxu3 %v3181_v33 }
 0x29b   :  { %1619 = vmatpush.bf16.msrb.mxu0 %v3692_v61  ;;  %1642 = vmatpush.bf16.msrb.mxu1 %v3173_v23 }
 0x29e   :  { %1426 = vmatpush.bf16.msra.mxu2 %v3190_v43  ;;  %1439 = vmatpush.bf16.msra.mxu3 %v3193_v50 }
 0x29f   :  { %1620 = vmatpush.bf16.msrb.mxu0 %v3701_v10  ;;  %1643 = vmatpush.bf16.msrb.mxu1 %v3185_v40 }
 0x2a2   :  { %1427 = vmatpush.bf16.msra.mxu2 %v4283_v39  ;;  %1440 = vmatpush.bf16.msra.mxu3 %v4284_v47 }
 0x2a3   :  { %1621 = vmatpush.bf16.msrb.mxu0 %v3711_v4  ;;  %1644 = vmatpush.bf16.msrb.mxu1 %v4287_v19 }
 0x2a6   :  { %1650 = vmatpush.bf16.msrb.mxu2 %v4285_v51 }
 0x2aa   :  { %1651 = vmatpush.bf16.msrb.mxu2 %v4288_v46 }
 0x2ac   :  { %v900_v12 = vpop.permute.xlu0 %899 }
 0x2ad   :  { %903 = vst.msk [vmem:[#allocation8] sm:$0x3] %vm902_vm11, %v900_v12 }
 0x2ae   :  { %1652 = vmatpush.bf16.msrb.mxu2 %v4289_v37 }
 0x2b2   :  { %1653 = vmatpush.bf16.msrb.mxu2 %v4290_v21 }
 0x2b6   :  { %1654 = vmatpush.bf16.msrb.mxu2 %v4304_v5 }
 0x2ba   :  { %1655 = vmatpush.bf16.msrb.mxu2 %v4305_v55 }
 0x2be   :  { %1656 = vmatpush.bf16.msrb.mxu2 %v4306_v56 }
 0x2c2   :  { %1657 = vmatpush.bf16.msrb.mxu2 %v4307_v25 }
 0x302   :  { %v1173_v6 = vpop.f32.mrf.mxu0  ;;  %v1186_v32 = vpop.f32.mrf.mxu1 }
 0x303   :  { %v1207_v38 = vrot.slane %v1173_v6, 7  ;;  %v1208_v9 = vrot.slane %v1186_v32, 6 }
 0x307   :  { %v1137_v31 = vpop.f32.mrf.mxu2  ;;  %v1160_v7 = vpop.f32.mrf.mxu3 }
 0x308   :  { %v1138_v29 = vadd.f32 %v4308_v16, %v1137_v31  ;;  %v1210_v42 = vsel %vm425_vm1, %v1160_v7, %v1207_v38  ;;  %v1213_v24 = vsel %vm431_vm2, %v1160_v7, %v1207_v38  ;;  %v1150_v16 = vld [vmem:[#allocation2 + $0x23] ss:$8 sm:$0xf] }
 0x30a   :  { %v1175_v59 = vpop.f32.mrf.mxu0  ;;  %v1188_v13 = vpop.f32.mrf.mxu1  ;;  %1142 = vrot.lane.b32.xlu0 %v1138_v29, %s3035_s29  ;;  %s2407_s29 = sshll.u32 %s4205_s6, 4  ;;  %s2408_s29 = int_to_ptr.hbm [resolvable:$true] %s2407_s29 }
 0x30f   :  { %v1139_v14 = vpop.f32.mrf.mxu2  ;;  %v1162_v57 = vpop.f32.mrf.mxu3 }
 0x317   :  { %v1199_v0 = vpop.f32.mrf.mxu2 }
 0x318   :  { %v1209_v2 = vrot.slane %v1199_v0, 5 }
 0x31a   :  { %v1211_v52 = vsel %vm427_vm3, %v1208_v9, %v1209_v2  ;;  %v1214_v48 = vsel %vm433_vm5, %v1208_v9, %v1209_v2 }
 0x31b   :  { %v1212_v58 = vsel %vm429_vm4, %v1210_v42, %v1211_v52  ;;  %v1215_v54 = vsel %vm4309_vm10, %v1213_v24, %v1214_v48 }
 0x31c   :  { %v1216_v12 = vrot.slane %v1215_v54, 1  ;;  %v1219_v31 = vadd.f32 %v1212_v58, %v1148_v41 }
 0x31e   :  { %v1220_v29 = vadd.f32 %v1216_v12, %v1150_v16  ;;  %v2615_v6 = vmul.f32 -1.442695, %v1219_v31  ;;  %v1261_v32 = vrot.slane %v1219_v31, 1  ;;  %v1309_v59 = vrot.slane %v1219_v31, 3 }
 0x31f   :  { %v1201_v13 = vpop.f32.mrf.mxu2  ;;  %v1303_v12 = vrot.slane %v1219_v31, 2 }
 0x320   :  { %2800 = vpow2.f32 %v2615_v6  ;;  %v2616_v14 = vmul.f32 -1.442695, %v1220_v29  ;;  %v1262_v7 = vrot.slane %v1220_v29, 1  ;;  %v2617_v57 = vmul.f32 -1.442695, %v1261_v32 }
 0x321   :  { %v1310_v0 = vrot.slane %v1220_v29, 3  ;;  %v2619_v9 = vmul.f32 -1.442695, %v1309_v59  ;;  %v1304_v32 = vrot.slane %v1220_v29, 2 }
 0x322   :  { %2802 = vpow2.f32 %v2616_v14  ;;  %v2618_v38 = vmul.f32 -1.442695, %v1262_v7 }
 0x323   :  { %2804 = vpow2.f32 %v2617_v57  ;;  %v2620_v2 = vmul.f32 -1.442695, %v1310_v0 }
 0x324   :  { %2806 = vpow2.f32 %v2618_v38 }
 0x325   :  { %2808 = vpow2.f32 %v2619_v9 }
 0x326   :  { %v2801_v42 = vpop.eup %2800  ;;  %2810 = vpow2.f32 %v2620_v2 }
 0x327   :  { %v1227_v24 = vadd.f32 1.0, %v2801_v42 }
 0x328   :  { %v2803_v52 = vpop.eup %2802 }
 0x329   :  { %v2805_v48 = vpop.eup %2804  ;;  %v1228_v41 = vadd.f32 1.0, %v2803_v52  ;;  %2812 = vrcp.f32 %v1227_v24  ;;  %v1238_v13 = vand.u32 2147483647, %v1227_v24  ;;  %v1240_v7 = vand.u32 2147483648, %v1227_v24 }
 0x32a   :  { %v2807_v58 = vpop.eup %2806  ;;  %v3729_v54 = vadd.f32 1.0, %v2805_v48  ;;  %vm1234_vm6 = vweird.f32 %v1227_v24 }
 0x32b   :  { %2814 = vrcp.f32 %v1228_v41  ;;  %v2809_v16 = vpop.eup %2808  ;;  %v3731_v6 = vadd.f32 1.0, %v2807_v58  ;;  %v1253_v57 = vand.u32 2147483647, %v1228_v41  ;;  %vm3739_vm14 = vcmp.eq.f32.partialorder %v1238_v13, 8.507059e+37 }
 0x32c   :  { %2816 = vrcp.f32 %v3729_v54  ;;  %v2811_v59 = vpop.eup %2810  ;;  %v3735_v0 = vadd.f32 1.0, %v2809_v16  ;;  %v1255_v29 = vand.u32 2147483648, %v1228_v41  ;;  %vm1249_vm0 = vweird.f32 %v1228_v41 }
 0x32d   :  { %2818 = vrcp.f32 %v3731_v6  ;;  %v3737_v9 = vadd.f32 1.0, %v2811_v59  ;;  %v1241_v58 = vor.u32 1.1754944e-38, %v1240_v7  ;;  %vm3745_vm15 = vcmp.eq.f32.partialorder %v1253_v57, 8.507059e+37 }
 0x32e   :  { %2820 = vtanh.f32 %v1303_v12  ;;  %vm1278_vm8 = vweird.f32 %v3729_v54  ;;  %v1282_v25 = vand.u32 2147483647, %v3729_v54  ;;  %v1256_v56 = vor.u32 1.1754944e-38, %v1255_v29 }
 0x32f   :  { %v2813_v14 = vpop.eup %2812  ;;  %2822 = vtanh.f32 %v1304_v32  ;;  %v1284_v5 = vand.u32 2147483648, %v3729_v54  ;;  %vm1293_vm13 = vweird.f32 %v3731_v6 }
 0x330   :  { %v1230_v38 = vmul.f32 %v2813_v14, %v1227_v24  ;;  %2824 = vrcp.f32 %v3735_v0  ;;  %vm1235_vm7 = vweird.f32 %v2813_v14 }
 0x331   :  { %v2815_v31 = vpop.eup %2814  ;;  %2826 = vrcp.f32 %v3737_v9  ;;  %vm3756_vm12 = vmor %vm1234_vm6, %vm1235_vm7 }
 0x332   :  { %v2817_v42 = vpop.eup %2816  ;;  %v1231_v52 = vsub.f32 1.0, %v1230_v38  ;;  %v1245_v48 = vmul.f32 %v2815_v31, %v1228_v41  ;;  %vm1250_vm9 = vweird.f32 %v2815_v31 }
 0x333   :  { %v1274_v16 = vmul.f32 %v2817_v42, %v3729_v54  ;;  %v2819_v32 = vpop.eup %2818  ;;  %vm1279_vm11 = vweird.f32 %v2817_v42  ;;  %vm1251_vm10 = vmor %vm1249_vm0, %vm1250_vm9 }
 0x334   :  { %v1232_v59 = vmul.f32 %v2813_v14, %v1231_v52  ;;  %v1246_v13 = vsub.f32 1.0, %v1245_v48  ;;  %v2821_v38 = vpop.eup %2820  ;;  %v1289_v7 = vmul.f32 %v2819_v32, %v3731_v6  ;;  %vm1294_vm6 = vweird.f32 %v2819_v32  ;;  %vm1280_vm7 = vmor %vm1278_vm8, %vm1279_vm11 }
 0x335   :  { %v1275_v55 = vsub.f32 1.0, %v1274_v16  ;;  %v2823_v57 = vpop.eup %2822  ;;  %v1297_v16 = vand.u32 2147483647, %v3731_v6  ;;  %vm1295_vm0 = vmor %vm1293_vm13, %vm1294_vm6  ;;  %vm1326_vm8 = vweird.f32 %v3735_v0  ;;  %vm1341_vm11 = vweird.f32 %v3737_v9 }
 0x336   :  { %v1233_v21 = vadd.f32 %v2813_v14, %v1232_v59  ;;  %v1247_v37 = vmul.f32 %v2815_v31, %v1246_v13  ;;  %v2825_v46 = vpop.eup %2824  ;;  %v1290_v29 = vsub.f32 1.0, %v1289_v7  ;;  %v1299_v13 = vand.u32 2147483648, %v3731_v6 }
 0x337   :  { %v1276_v48 = vmul.f32 %v2817_v42, %v1275_v55  ;;  %v2827_v19 = vpop.eup %2826  ;;  %v1322_v51 = vmul.f32 %v2825_v46, %v3735_v0 }
 0x338   :  { %v1237_v4 = vsel %vm3756_vm12, %v2813_v14, %v1233_v21  ;;  %v1248_v59 = vadd.f32 %v2815_v31, %v1247_v37  ;;  %v1291_v47 = vmul.f32 %v2819_v32, %v1290_v29  ;;  %v1337_v55 = vmul.f32 %v2827_v19, %v3737_v9 }
 0x339   :  { %v1277_v24 = vadd.f32 %v2817_v42, %v1276_v48  ;;  %v1242_v7 = vsel %vm3739_vm14, %v1241_v58, %v1237_v4  ;;  %v1285_v37 = vor.u32 1.1754944e-38, %v1284_v5  ;;  %v1323_v21 = vsub.f32 1.0, %v1322_v51 }
 0x33a   :  { %v1252_v39 = vsel %vm1251_vm10, %v2815_v31, %v1248_v59  ;;  %vm1283_vm12 = vcmp.eq.f32.partialorder %v1282_v25, 8.507059e+37  ;;  %v1292_v52 = vadd.f32 %v2819_v32, %v1291_v47  ;;  %v1338_v41 = vsub.f32 1.0, %v1337_v55 }
 0x33b   :  { %v1281_v14 = vsel %vm1280_vm7, %v2817_v42, %v1277_v24  ;;  %v1257_v48 = vsel %vm3745_vm15, %v1256_v56, %v1252_v39  ;;  %v1300_v2 = vor.u32 1.1754944e-38, %v1299_v13  ;;  %v1324_v4 = vmul.f32 %v2825_v46, %v1323_v21 }
 0x33c   :  { %v1286_v29 = vsel %vm1283_vm12, %v1285_v37, %v1281_v14  ;;  %v1296_v31 = vsel %vm1295_vm0, %v2819_v32, %v1292_v52  ;;  %vm1298_vm14 = vcmp.eq.f32.partialorder %v1297_v16, 8.507059e+37  ;;  %v1353_v58 = vmul.f32 %v2821_v38, %v1242_v7 }
 0x33d   :  { %v1351_v54 = vmul.f32 %v1286_v29, %v3629_v20  ;;  %v1301_v5 = vsel %vm1298_vm14, %v1300_v2, %v1296_v31  ;;  %v1339_v51 = vmul.f32 %v2827_v19, %v1338_v41  ;;  %v1354_v47 = vmul.f32 %v2823_v57, %v1257_v48  ;;  %v4317_v29 = vld [vmem:[#allocation21_spill] sm:$0xff]  ;;  %v4318_v2 = vld [vmem:[#allocation11_spill] sm:$0xff]  ;;  %v4320_v31 = vld [vmem:[#allocation18_spill] sm:$0xff] }
 0x33e   :  { %v1352_v25 = vmul.f32 %v1301_v5, %v3631_v45  ;;  %v1325_v12 = vadd.f32 %v2825_v46, %v1324_v4  ;;  %vm1327_vm15 = vweird.f32 %v2825_v46  ;;  %v1332_v56 = vand.u32 2147483648, %v3735_v0  ;;  %v4319_v4 = vld [vmem:[#allocation22_spill] sm:$0xff]  ;;  %v4322_v5 = vld [vmem:[#allocation13_spill] sm:$0xff] }
 0x33f   :  { %v3778_v42 = vadd.f32 %v1353_v58, %v1351_v54  ;;  %v1330_v20 = vand.u32 2147483647, %v3735_v0  ;;  %v1340_v6 = vadd.f32 %v2827_v19, %v1339_v51  ;;  %vm1342_vm9 = vweird.f32 %v2827_v19  ;;  %vm1328_vm13 = vmor %vm1326_vm8, %vm1327_vm15  ;;  %v4321_v54 = vld [vmem:[#allocation12_spill] sm:$0xff]  ;;  %v4323_v51 = vld [vmem:[#allocation14_spill] sm:$0xff] }
 0x340   :  { %v3780_v39 = vadd.f32 %v1354_v47, %v1352_v25  ;;  %v1347_v45 = vand.u32 2147483648, %v3737_v9  ;;  %v1329_v32 = vsel %vm1328_vm13, %v2825_v46, %v1325_v12  ;;  %v1345_v38 = vand.u32 2147483647, %v3737_v9  ;;  %vm1343_vm10 = vmor %vm1341_vm11, %vm1342_vm9  ;;  %v4324_v25 = vld [vmem:[#allocation15_spill] sm:$0xff]  ;;  %v4325_v47 = vld [vmem:[#allocation16_spill] sm:$0xff] }
 0x341   :  { %2828 = vtanh.f32 %v3778_v42  ;;  %v1333_v57 = vor.u32 1.1754944e-38, %v1332_v56  ;;  %vm1331_vm6 = vcmp.eq.f32.partialorder %v1330_v20, 8.507059e+37  ;;  %v1344_v16 = vsel %vm1343_vm10, %v2827_v19, %v1340_v6  ;;  %v4316_v19 = vld [vmem:[#allocation20_spill] sm:$0xff]  ;;  %v4326_v12 = vld [vmem:[#allocation17_spill] sm:$0xff]  ;;  %v4327_v56 = vld [vmem:[#allocation19_spill] sm:$0xff] }
 0x342   :  { %2830 = vtanh.f32 %v3780_v39  ;;  %v1348_v24 = vor.u32 1.1754944e-38, %v1347_v45  ;;  %vm1346_vm7 = vcmp.eq.f32.partialorder %v1345_v38, 8.507059e+37  ;;  %vm1145_vm12 = vcmask 386304  }
 0x343   :  { %v1334_v13 = vsel %vm1331_vm6, %v1333_v57, %v1329_v32  ;;  %v3834_v32 = vld [vmem:[%s4204_s5] ss:$0 sm:$0xff]  ;;  %vm4329_vm0 = vcmask 1042433  }
 0x344   :  { %v1349_v7 = vsel %vm1346_vm7, %v1348_v24, %v1344_v16  ;;  %4328 = vst [vmem:[#allocation23_spill] sm:$0xff] %v3834_v32 }
 0x347   :  { %v2829_v59 = vpop.eup %2828 }
 0x348   :  { %v1359_v0 = vmul.f32 %v2829_v59, %v1334_v13  ;;  %v2831_v55 = vpop.eup %2830 }
 0x349   :  { %v1360_v37 = vmul.f32 %v2831_v55, %v1349_v7 }
 0x34a   :  { %v1361_v21 = vpack.c.bf16 %v1359_v0, %v1359_v0 }
 0x34b   :  { %v1362_v14 = vpack.c.bf16 %v1360_v37, %v1360_v37 }
 0x34c   :  { %v1365_v46 = vunpack.c.l.b16 %v1361_v21 }
 0x34d   :  { %v1366_v52 = vunpack.c.l.b16 %v1362_v14 }
 0x34f   :  { %v1367_v41 = vrot.slane %v1366_v52, 7 }
 0x351   :  { %v1368_v48 = vsel %vm431_vm2, %v1367_v41, %v1365_v46  ;;  %v1391_v41 = vld [vmem:[#allocation2 + $0x4] ss:$8 sm:$0xf] }
 0x352   :  { %v1369_v9 = vpack.c.b16 %v1368_v48, %v1368_v48 }
 0x354   :  { %1379 = vmatmul.bf16.vlgmr.msrb.gmra.mxu3 %v1369_v9  ;;  %1402 = vmatmul.bf16.vlgmr.msra.gmra.mxu0 %v1369_v9 }
 0x355   :  { %1415 = vmatmul.bf16.vlgmr.msra.gmra.mxu1 %v1369_v9  ;;  %1428 = vmatmul.bf16.vlgmr.msra.gmra.mxu2 %v1369_v9 }
 0x356   :  { %1663 = vmatpush.bf16.msrb.mxu3 %v3109_v22  ;;  %1676 = vmatpush.bf16.msra.mxu0 %v3113_v26 }
 0x357   :  { %1857 = vmatpush.bf16.msra.mxu1 %v3647_v1  ;;  %1880 = vmatpush.bf16.msra.mxu2 %v3105_v17 }
 0x35a   :  { %1664 = vmatpush.bf16.msrb.mxu3 %v3121_v35  ;;  %1677 = vmatpush.bf16.msra.mxu0 %v3123_v36 }
 0x35b   :  { %1858 = vmatpush.bf16.msra.mxu1 %v3656_v62  ;;  %1881 = vmatpush.bf16.msra.mxu2 %v3115_v27 }
 0x35e   :  { %1665 = vmatpush.bf16.msrb.mxu3 %v3139_v49  ;;  %1678 = vmatpush.bf16.msra.mxu0 %v3143_v53 }
 0x35f   :  { %1859 = vmatpush.bf16.msra.mxu1 %v3665_v34  ;;  %1882 = vmatpush.bf16.msra.mxu2 %v3133_v44 }
 0x362   :  { %1666 = vmatpush.bf16.msrb.mxu3 %v3154_v63  ;;  %1679 = vmatpush.bf16.msra.mxu0 %v3157_v3 }
 0x363   :  { %1860 = vmatpush.bf16.msra.mxu1 %v3674_v30  ;;  %1883 = vmatpush.bf16.msra.mxu2 %v3149_v60 }
 0x364   :  { %1441 = vmatmul.bf16.vlgmr.msra.gmra.mxu3 %v1369_v9 }
 0x366   :  { %1667 = vmatpush.bf16.msrb.mxu3 %v3166_v11  ;;  %1680 = vmatpush.bf16.msra.mxu0 %v3169_v15 }
 0x367   :  { %1861 = vmatpush.bf16.msra.mxu1 %v3683_v18  ;;  %1884 = vmatpush.bf16.msra.mxu2 %v3161_v8 }
 0x36a   :  { %1668 = vmatpush.bf16.msrb.mxu3 %v3178_v28  ;;  %1681 = vmatpush.bf16.msra.mxu0 %v3181_v33 }
 0x36b   :  { %1862 = vmatpush.bf16.msra.mxu1 %v3692_v61  ;;  %1885 = vmatpush.bf16.msra.mxu2 %v3173_v23 }
 0x36e   :  { %1669 = vmatpush.bf16.msrb.mxu3 %v3190_v43  ;;  %1682 = vmatpush.bf16.msra.mxu0 %v3193_v50 }
 0x36f   :  { %1863 = vmatpush.bf16.msra.mxu1 %v3701_v10  ;;  %1886 = vmatpush.bf16.msra.mxu2 %v3185_v40 }
 0x372   :  { %1670 = vmatpush.bf16.msrb.mxu3 %v4316_v19  ;;  %1683 = vmatpush.bf16.msra.mxu0 %v4317_v29 }
 0x373   :  { %1864 = vmatpush.bf16.msra.mxu1 %v4319_v4  ;;  %1887 = vmatpush.bf16.msra.mxu2 %v4320_v31 }
 0x376   :  { %1893 = vmatpush.bf16.msra.mxu3 %v4318_v2 }
 0x37a   :  { %1894 = vmatpush.bf16.msra.mxu3 %v4321_v54 }
 0x37c   :  { %v1143_v58 = vpop.permute.xlu0 %1142 }
 0x37d   :  { %1146 = vst.msk [vmem:[#allocation8] sm:$0x3] %vm1145_vm12, %v1143_v58 }
 0x37e   :  { %1895 = vmatpush.bf16.msra.mxu3 %v4322_v5 }
 0x382   :  { %1896 = vmatpush.bf16.msra.mxu3 %v4323_v51 }
 0x386   :  { %1897 = vmatpush.bf16.msra.mxu3 %v4324_v25 }
 0x38a   :  { %1898 = vmatpush.bf16.msra.mxu3 %v4325_v47 }
 0x38e   :  { %1899 = vmatpush.bf16.msra.mxu3 %v4326_v12 }
 0x392   :  { %1900 = vmatpush.bf16.msra.mxu3 %v4327_v56 }
 0x3d1   :  { %v1403_v20 = vpop.f32.mrf.mxu0 }
 0x3d2   :  { %v1416_v6 = vpop.f32.mrf.mxu1 }
 0x3d3   :  { %v1450_v0 = vrot.slane %v1416_v6, 7 }
 0x3d5   :  { %v1453_v21 = vsel %vm425_vm1, %v1403_v20, %v1450_v0  ;;  %v1456_v14 = vsel %vm431_vm2, %v1403_v20, %v1450_v0 }
 0x3d7   :  { %v1380_v45 = vpop.f32.mrf.mxu3 }
 0x3d8   :  { %v1381_v38 = vadd.f32 %v3834_v32, %v1380_v45  ;;  %v1429_v57 = vpop.f32.mrf.mxu2 }
 0x3d9   :  { %v1405_v16 = vpop.f32.mrf.mxu0  ;;  %v1451_v7 = vrot.slane %v1429_v57, 6 }
 0x3da   :  { %v1418_v59 = vpop.f32.mrf.mxu1  ;;  %1385 = vrot.lane.b32.xlu1 %v1381_v38, %s3036_s2  ;;  %v1393_v38 = vld [vmem:[#allocation2 + $0x24] ss:$8 sm:$0xf] }
 0x3df   :  { %v1382_v13 = vpop.f32.mrf.mxu3 }
 0x3e0   :  { %v1431_v24 = vpop.f32.mrf.mxu2 }
 0x3e7   :  { %v1442_v55 = vpop.f32.mrf.mxu3 }
 0x3e8   :  { %v1452_v37 = vrot.slane %v1442_v55, 5 }
 0x3ea   :  { %v1454_v52 = vsel %vm427_vm3, %v1451_v7, %v1452_v37  ;;  %v1457_v46 = vsel %vm433_vm5, %v1451_v7, %v1452_v37 }
 0x3eb   :  { %v1455_v48 = vsel %vm429_vm4, %v1453_v21, %v1454_v52  ;;  %v1458_v9 = vsel %vm4329_vm0, %v1456_v14, %v1457_v46 }
 0x3ec   :  { %v1459_v58 = vrot.slane %v1458_v9, 1  ;;  %v1462_v45 = vadd.f32 %v1455_v48, %v1391_v41 }
 0x3ee   :  { %v1463_v6 = vadd.f32 %v1459_v58, %v1393_v38  ;;  %v2621_v16 = vmul.f32 -1.442695, %v1462_v45  ;;  %v1504_v57 = vrot.slane %v1462_v45, 1  ;;  %v1552_v59 = vrot.slane %v1462_v45, 3 }
 0x3ef   :  { %v1444_v13 = vpop.f32.mrf.mxu3  ;;  %v1546_v38 = vrot.slane %v1462_v45, 2 }
 0x3f0   :  { %2832 = vpow2.f32 %v2621_v16  ;;  %v2622_v24 = vmul.f32 -1.442695, %v1463_v6  ;;  %v1505_v20 = vrot.slane %v1463_v6, 1  ;;  %v2623_v0 = vmul.f32 -1.442695, %v1504_v57 }
 0x3f1   :  { %v1553_v55 = vrot.slane %v1463_v6, 3  ;;  %v2625_v37 = vmul.f32 -1.442695, %v1552_v59  ;;  %v1547_v59 = vrot.slane %v1463_v6, 2 }
 0x3f2   :  { %2834 = vpow2.f32 %v2622_v24  ;;  %v2624_v7 = vmul.f32 -1.442695, %v1505_v20 }
 0x3f3   :  { %2836 = vpow2.f32 %v2623_v0  ;;  %v2626_v21 = vmul.f32 -1.442695, %v1553_v55 }
 0x3f4   :  { %2838 = vpow2.f32 %v2624_v7 }
 0x3f5   :  { %2840 = vpow2.f32 %v2625_v37 }
 0x3f6   :  { %v2833_v14 = vpop.eup %2832  ;;  %2842 = vpow2.f32 %v2626_v21 }
 0x3f7   :  { %v1470_v52 = vadd.f32 1.0, %v2833_v14 }
 0x3f8   :  { %v2835_v46 = vpop.eup %2834 }
 0x3f9   :  { %v2837_v41 = vpop.eup %2836  ;;  %v1471_v48 = vadd.f32 1.0, %v2835_v46  ;;  %2844 = vrcp.f32 %v1470_v52  ;;  %v1481_v24 = vand.u32 2147483647, %v1470_v52  ;;  %v1483_v0 = vand.u32 2147483648, %v1470_v52 }
 0x3fa   :  { %v2839_v9 = vpop.eup %2838  ;;  %v3843_v58 = vadd.f32 1.0, %v2837_v41  ;;  %vm1477_vm14 = vweird.f32 %v1470_v52 }
 0x3fb   :  { %2846 = vrcp.f32 %v1471_v48  ;;  %v2841_v16 = vpop.eup %2840  ;;  %v3845_v57 = vadd.f32 1.0, %v2839_v9  ;;  %v1496_v55 = vand.u32 2147483647, %v1471_v48  ;;  %vm3853_vm15 = vcmp.eq.f32.partialorder %v1481_v24, 8.507059e+37 }
 0x3fc   :  { %2848 = vrcp.f32 %v3843_v58  ;;  %v2843_v13 = vpop.eup %2842  ;;  %v3849_v7 = vadd.f32 1.0, %v2841_v16  ;;  %v1498_v6 = vand.u32 2147483648, %v1471_v48  ;;  %vm1492_vm8 = vweird.f32 %v1471_v48 }
 0x3fd   :  { %2850 = vrcp.f32 %v3845_v57  ;;  %v3851_v21 = vadd.f32 1.0, %v2843_v13  ;;  %vm3859_vm9 = vcmp.eq.f32.partialorder %v1496_v55, 8.507059e+37  ;;  %vm1521_vm13 = vweird.f32 %v3843_v58 }
 0x3fe   :  { %2852 = vtanh.f32 %v1546_v38  ;;  %v1484_v38 = vor.u32 1.1754944e-38, %v1483_v0  ;;  %v1525_v56 = vand.u32 2147483647, %v3843_v58  ;;  %v1499_v12 = vor.u32 1.1754944e-38, %v1498_v6 }
 0x3ff   :  { %v2845_v20 = vpop.eup %2844  ;;  %2854 = vtanh.f32 %v1547_v59  ;;  %v1527_v25 = vand.u32 2147483648, %v3843_v58  ;;  %vm1536_vm6 = vweird.f32 %v3845_v57 }
 0x400   :  { %v1473_v37 = vmul.f32 %v2845_v20, %v1470_v52  ;;  %2856 = vrcp.f32 %v3849_v7  ;;  %vm1478_vm11 = vweird.f32 %v2845_v20 }
 0x401   :  { %v2847_v45 = vpop.eup %2846  ;;  %2858 = vrcp.f32 %v3851_v21  ;;  %vm3870_vm7 = vmor %vm1477_vm14, %vm1478_vm11 }
 0x402   :  { %v2849_v46 = vpop.eup %2848  ;;  %v1474_v41 = vsub.f32 1.0, %v1473_v37  ;;  %v1488_v9 = vmul.f32 %v2847_v45, %v1471_v48  ;;  %vm1493_vm10 = vweird.f32 %v2847_v45 }
 0x403   :  { %v1517_v59 = vmul.f32 %v2849_v46, %v3843_v58  ;;  %v2851_v13 = vpop.eup %2850  ;;  %vm1522_vm12 = vweird.f32 %v2849_v46  ;;  %vm1494_vm0 = vmor %vm1492_vm8, %vm1493_vm10 }
 0x404   :  { %v1475_v24 = vmul.f32 %v2845_v20, %v1474_v41  ;;  %v1489_v32 = vsub.f32 1.0, %v1488_v9  ;;  %v2853_v37 = vpop.eup %2852  ;;  %v1532_v0 = vmul.f32 %v2851_v13, %v3845_v57  ;;  %vm1537_vm14 = vweird.f32 %v2851_v13  ;;  %vm1523_vm11 = vmor %vm1521_vm13, %vm1522_vm12 }
 0x405   :  { %v1518_v47 = vsub.f32 1.0, %v1517_v59  ;;  %v2855_v55 = vpop.eup %2854  ;;  %v1540_v59 = vand.u32 2147483647, %v3845_v57  ;;  %vm1538_vm8 = vmor %vm1536_vm6, %vm1537_vm14  ;;  %vm1569_vm13 = vweird.f32 %v3849_v7  ;;  %vm1584_vm12 = vweird.f32 %v3851_v21 }
 0x406   :  { %v1476_v51 = vadd.f32 %v2845_v20, %v1475_v24  ;;  %v1490_v5 = vmul.f32 %v2847_v45, %v1489_v32  ;;  %v2857_v54 = vpop.eup %2856  ;;  %v1533_v6 = vsub.f32 1.0, %v1532_v0  ;;  %v1542_v32 = vand.u32 2147483648, %v3845_v57 }
 0x407   :  { %v1519_v9 = vmul.f32 %v2849_v46, %v1518_v47  ;;  %v2859_v31 = vpop.eup %2858  ;;  %v1565_v2 = vmul.f32 %v2857_v54, %v3849_v7 }
 0x408   :  { %v1480_v4 = vsel %vm3870_vm7, %v2845_v20, %v1476_v51  ;;  %v1491_v24 = vadd.f32 %v2847_v45, %v1490_v5  ;;  %v1534_v29 = vmul.f32 %v2851_v13, %v1533_v6  ;;  %v1580_v47 = vmul.f32 %v2859_v31, %v3851_v21 }
 0x409   :  { %v1520_v52 = vadd.f32 %v2849_v46, %v1519_v9  ;;  %v1485_v0 = vsel %vm3853_vm15, %v1484_v38, %v1480_v4  ;;  %v1528_v5 = vor.u32 1.1754944e-38, %v1527_v25  ;;  %v1566_v51 = vsub.f32 1.0, %v1565_v2 }
 0x40a   :  { %v1495_v19 = vsel %vm1494_vm0, %v2847_v45, %v1491_v24  ;;  %vm1526_vm7 = vcmp.eq.f32.partialorder %v1525_v56, 8.507059e+37  ;;  %v1535_v41 = vadd.f32 %v2851_v13, %v1534_v29  ;;  %v1581_v48 = vsub.f32 1.0, %v1580_v47 }
 0x40b   :  { %v1524_v20 = vsel %vm1523_vm11, %v2849_v46, %v1520_v52  ;;  %v1500_v9 = vsel %vm3859_vm9, %v1499_v12, %v1495_v19  ;;  %v1543_v14 = vor.u32 1.1754944e-38, %v1542_v32  ;;  %v1567_v4 = vmul.f32 %v2857_v54, %v1566_v51 }
 0x40c   :  { %v1529_v6 = vsel %vm1526_vm7, %v1528_v5, %v1524_v20  ;;  %v1539_v45 = vsel %vm1538_vm8, %v2851_v13, %v1535_v41  ;;  %vm1541_vm15 = vcmp.eq.f32.partialorder %v1540_v59, 8.507059e+37  ;;  %v1596_v38 = vmul.f32 %v2853_v37, %v1485_v0 }
 0x40d   :  { %v1594_v58 = vmul.f32 %v1529_v6, %v3778_v42  ;;  %v1544_v25 = vsel %vm1541_vm15, %v1543_v14, %v1539_v45  ;;  %v1582_v2 = vmul.f32 %v2859_v31, %v1581_v48  ;;  %v1597_v29 = vmul.f32 %v2855_v55, %v1500_v9  ;;  %v4348_v6 = vld [vmem:[#allocation23_spill] sm:$0xff] }
 0x40e   :  { %v1595_v56 = vmul.f32 %v1544_v25, %v3780_v39  ;;  %v1568_v16 = vadd.f32 %v2857_v54, %v1567_v4  ;;  %vm1570_vm9 = vweird.f32 %v2857_v54  ;;  %v1575_v12 = vand.u32 2147483648, %v3849_v7 }
 0x40f   :  { %v3892_v46 = vadd.f32 %v1596_v38, %v1594_v58  ;;  %v1573_v42 = vand.u32 2147483647, %v3849_v7  ;;  %v1583_v57 = vadd.f32 %v2859_v31, %v1582_v2  ;;  %vm1585_vm10 = vweird.f32 %v2859_v31  ;;  %vm1571_vm6 = vmor %vm1569_vm13, %vm1570_vm9 }
 0x410   :  { %v3894_v19 = vadd.f32 %v1597_v29, %v1595_v56  ;;  %v1590_v39 = vand.u32 2147483648, %v3851_v21  ;;  %v1572_v13 = vsel %vm1571_vm6, %v2857_v54, %v1568_v16  ;;  %v1588_v37 = vand.u32 2147483647, %v3851_v21  ;;  %vm1586_vm0 = vmor %vm1584_vm12, %vm1585_vm10 }
 0x411   :  { %2860 = vtanh.f32 %v3892_v46  ;;  %v1576_v55 = vor.u32 1.1754944e-38, %v1575_v12  ;;  %vm1574_vm14 = vcmp.eq.f32.partialorder %v1573_v42, 8.507059e+37  ;;  %v1587_v59 = vsel %vm1586_vm0, %v2859_v31, %v1583_v57 }
 0x412   :  { %2862 = vtanh.f32 %v3894_v19  ;;  %v1591_v52 = vor.u32 1.1754944e-38, %v1590_v39  ;;  %vm1589_vm11 = vcmp.eq.f32.partialorder %v1588_v37, 8.507059e+37  ;;  %vm1388_vm7 = vcmask 517504   ;;  %v1634_v37 = vld [vmem:[#allocation2 + $0x5] ss:$8 sm:$0xf] }
 0x413   :  { %v1577_v32 = vsel %vm1574_vm14, %v1576_v55, %v1572_v13  ;;  %vm4349_vm8 = vcmask 1042433  }
 0x414   :  { %v1592_v0 = vsel %vm1589_vm11, %v1591_v52, %v1587_v59  ;;  %v1636_v52 = vld [vmem:[#allocation2 + $0x25] ss:$8 sm:$0xf] }
 0x417   :  { %v2861_v24 = vpop.eup %2860 }
 0x418   :  { %v1602_v7 = vmul.f32 %v2861_v24, %v1577_v32  ;;  %v2863_v47 = vpop.eup %2862 }
 0x419   :  { %v1603_v5 = vmul.f32 %v2863_v47, %v1592_v0 }
 0x41a   :  { %v1604_v51 = vpack.c.bf16 %v1602_v7, %v1602_v7 }
 0x41b   :  { %v1605_v20 = vpack.c.bf16 %v1603_v5, %v1603_v5 }
 0x41c   :  { %v1608_v54 = vunpack.c.l.b16 %v1604_v51 }
 0x41d   :  { %v1609_v41 = vunpack.c.l.b16 %v1605_v20 }
 0x41f   :  { %v1610_v48 = vrot.slane %v1609_v41, 7 }
 0x421   :  { %v1611_v9 = vsel %vm431_vm2, %v1610_v48, %v1608_v54 }
 0x422   :  { %v1612_v21 = vpack.c.b16 %v1611_v9, %v1611_v9 }
 0x424   :  { %1622 = vmatmul.bf16.vlgmr.msrb.gmra.mxu0 %v1612_v21  ;;  %1645 = vmatmul.bf16.vlgmr.msrb.gmra.mxu1 %v1612_v21 }
 0x425   :  { %1658 = vmatmul.bf16.vlgmr.msrb.gmra.mxu2 %v1612_v21  ;;  %1671 = vmatmul.bf16.vlgmr.msrb.gmra.mxu3 %v1612_v21 }
 0x426   :  { %1906 = vmatpush.bf16.msrb.mxu0 %v3109_v22  ;;  %1919 = vmatpush.bf16.msrb.mxu1 %v3113_v26 }
 0x427   :  { %2100 = vmatpush.bf16.msrb.mxu2 %v3647_v1  ;;  %2123 = vmatpush.bf16.msrb.mxu3 %v3105_v17  ;;  %v4336_v17 = vld [vmem:[#allocation20_spill] sm:$0xff] }
 0x428   :  { %v4341_v1 = vld [vmem:[#allocation12_spill] sm:$0xff] }
 0x42a   :  { %1907 = vmatpush.bf16.msrb.mxu0 %v3121_v35  ;;  %1920 = vmatpush.bf16.msrb.mxu1 %v3123_v36 }
 0x42b   :  { %2101 = vmatpush.bf16.msrb.mxu2 %v3656_v62  ;;  %2124 = vmatpush.bf16.msrb.mxu3 %v3115_v27  ;;  %v4337_v27 = vld [vmem:[#allocation21_spill] sm:$0xff] }
 0x42c   :  { %v4342_v62 = vld [vmem:[#allocation13_spill] sm:$0xff] }
 0x42e   :  { %1908 = vmatpush.bf16.msrb.mxu0 %v3139_v49  ;;  %1921 = vmatpush.bf16.msrb.mxu1 %v3143_v53 }
 0x42f   :  { %2102 = vmatpush.bf16.msrb.mxu2 %v3665_v34  ;;  %2125 = vmatpush.bf16.msrb.mxu3 %v3133_v44  ;;  %v4338_v44 = vld [vmem:[#allocation11_spill] sm:$0xff]  ;;  %v4343_v34 = vld [vmem:[#allocation14_spill] sm:$0xff] }
 0x432   :  { %1909 = vmatpush.bf16.msrb.mxu0 %v3154_v63  ;;  %1922 = vmatpush.bf16.msrb.mxu1 %v3157_v3 }
 0x433   :  { %2103 = vmatpush.bf16.msrb.mxu2 %v3674_v30  ;;  %2126 = vmatpush.bf16.msrb.mxu3 %v3149_v60  ;;  %v4339_v60 = vld [vmem:[#allocation22_spill] sm:$0xff]  ;;  %v4345_v30 = vld [vmem:[#allocation16_spill] sm:$0xff] }
 0x434   :  { %1684 = vmatmul.bf16.vlgmr.msra.gmra.mxu0 %v1612_v21 }
 0x436   :  { %1910 = vmatpush.bf16.msrb.mxu0 %v3166_v11  ;;  %1923 = vmatpush.bf16.msrb.mxu1 %v3169_v15 }
 0x437   :  { %2104 = vmatpush.bf16.msrb.mxu2 %v3683_v18  ;;  %2127 = vmatpush.bf16.msrb.mxu3 %v3161_v8  ;;  %v4340_v8 = vld [vmem:[#allocation18_spill] sm:$0xff]  ;;  %v4346_v18 = vld [vmem:[#allocation17_spill] sm:$0xff] }
 0x43a   :  { %1911 = vmatpush.bf16.msrb.mxu0 %v3178_v28  ;;  %1924 = vmatpush.bf16.msrb.mxu1 %v3181_v33 }
 0x43b   :  { %2105 = vmatpush.bf16.msrb.mxu2 %v3692_v61  ;;  %2128 = vmatpush.bf16.msrb.mxu3 %v3173_v23  ;;  %v4347_v61 = vld [vmem:[#allocation19_spill] sm:$0xff] }
 0x43e   :  { %1912 = vmatpush.bf16.msrb.mxu0 %v3190_v43  ;;  %1925 = vmatpush.bf16.msrb.mxu1 %v3193_v50 }
 0x43f   :  { %2106 = vmatpush.bf16.msrb.mxu2 %v3701_v10  ;;  %2129 = vmatpush.bf16.msrb.mxu3 %v3185_v40  ;;  %v4344_v40 = vld [vmem:[#allocation15_spill] sm:$0xff] }
 0x442   :  { %1913 = vmatpush.bf16.msrb.mxu0 %v4336_v17  ;;  %1926 = vmatpush.bf16.msrb.mxu1 %v4337_v27 }
 0x443   :  { %2107 = vmatpush.bf16.msrb.mxu2 %v4339_v60  ;;  %2130 = vmatpush.bf16.msrb.mxu3 %v4340_v8 }
 0x446   :  { %2136 = vmatpush.bf16.msra.mxu0 %v4338_v44 }
 0x44a   :  { %2137 = vmatpush.bf16.msra.mxu0 %v4341_v1 }
 0x44c   :  { %v1386_v23 = vpop.permute.xlu1 %1385 }
 0x44d   :  { %1389 = vst.msk [vmem:[#allocation8] sm:$0x3] %vm1388_vm7, %v1386_v23 }
 0x44e   :  { %2138 = vmatpush.bf16.msra.mxu0 %v4342_v62 }
 0x452   :  { %2139 = vmatpush.bf16.msra.mxu0 %v4343_v34 }
 0x456   :  { %2140 = vmatpush.bf16.msra.mxu0 %v4344_v40 }
 0x45a   :  { %2141 = vmatpush.bf16.msra.mxu0 %v4345_v30 }
 0x45e   :  { %2142 = vmatpush.bf16.msra.mxu0 %v4346_v18 }
 0x462   :  { %2143 = vmatpush.bf16.msra.mxu0 %v4347_v61 }
 0x4a1   :  { %v1623_v10 = vpop.f32.mrf.mxu0  ;;  %v1646_v31 = vpop.f32.mrf.mxu1 }
 0x4a2   :  { %v1624_v14 = vadd.f32 %v4348_v6, %v1623_v10 }
 0x4a4   :  { %1628 = vrot.lane.b32.xlu1 %v1624_v14, %s3037_s8 }
 0x4a8   :  { %v1659_v4 = vpop.f32.mrf.mxu2  ;;  %v1672_v45 = vpop.f32.mrf.mxu3 }
 0x4a9   :  { %v1625_v58 = vpop.f32.mrf.mxu0  ;;  %v1648_v38 = vpop.f32.mrf.mxu1  ;;  %v1693_v25 = vrot.slane %v1659_v4, 7  ;;  %v1694_v16 = vrot.slane %v1672_v45, 6 }
 0x4ab   :  { %v1696_v42 = vsel %vm425_vm1, %v1646_v31, %v1693_v25  ;;  %v1699_v57 = vsel %vm431_vm2, %v1646_v31, %v1693_v25 }
 0x4b0   :  { %v1661_v2 = vpop.f32.mrf.mxu2  ;;  %v1674_v56 = vpop.f32.mrf.mxu3 }
 0x4b1   :  { %v1685_v29 = vpop.f32.mrf.mxu0 }
 0x4b2   :  { %v1695_v12 = vrot.slane %v1685_v29, 5 }
 0x4b4   :  { %v1697_v39 = vsel %vm427_vm3, %v1694_v16, %v1695_v12  ;;  %v1700_v13 = vsel %vm433_vm5, %v1694_v16, %v1695_v12 }
 0x4b5   :  { %v1698_v55 = vsel %vm429_vm4, %v1696_v42, %v1697_v39  ;;  %v1701_v59 = vsel %vm4349_vm8, %v1699_v57, %v1700_v13 }
 0x4b6   :  { %v1702_v24 = vrot.slane %v1701_v59, 1  ;;  %v1705_v32 = vadd.f32 %v1698_v55, %v1634_v37 }
 0x4b8   :  { %v1706_v7 = vadd.f32 %v1702_v24, %v1636_v52  ;;  %v2627_v47 = vmul.f32 -1.442695, %v1705_v32  ;;  %v1747_v0 = vrot.slane %v1705_v32, 1  ;;  %v1795_v5 = vrot.slane %v1705_v32, 3 }
 0x4b9   :  { %v1687_v51 = vpop.f32.mrf.mxu0  ;;  %v1789_v30 = vrot.slane %v1705_v32, 2 }
 0x4ba   :  { %2864 = vpow2.f32 %v2627_v47  ;;  %v2628_v20 = vmul.f32 -1.442695, %v1706_v7  ;;  %v1748_v41 = vrot.slane %v1706_v7, 1  ;;  %v2629_v54 = vmul.f32 -1.442695, %v1747_v0 }
 0x4bb   :  { %v1796_v48 = vrot.slane %v1706_v7, 3  ;;  %v2631_v21 = vmul.f32 -1.442695, %v1795_v5  ;;  %v1790_v10 = vrot.slane %v1706_v7, 2 }
 0x4bc   :  { %2866 = vpow2.f32 %v2628_v20  ;;  %v2630_v9 = vmul.f32 -1.442695, %v1748_v41 }
 0x4bd   :  { %2868 = vpow2.f32 %v2629_v54  ;;  %v2632_v44 = vmul.f32 -1.442695, %v1796_v48 }
 0x4be   :  { %2870 = vpow2.f32 %v2630_v9 }
 0x4bf   :  { %2872 = vpow2.f32 %v2631_v21 }
 0x4c0   :  { %v2865_v60 = vpop.eup %2864  ;;  %2874 = vpow2.f32 %v2632_v44 }
 0x4c1   :  { %v1713_v8 = vadd.f32 1.0, %v2865_v60 }
 0x4c2   :  { %v2867_v1 = vpop.eup %2866 }
 0x4c3   :  { %v2869_v23 = vpop.eup %2868  ;;  %v1714_v62 = vadd.f32 1.0, %v2867_v1  ;;  %2876 = vrcp.f32 %v1713_v8  ;;  %v1724_v14 = vand.u32 2147483647, %v1713_v8  ;;  %v1726_v45 = vand.u32 2147483648, %v1713_v8 }
 0x4c4   :  { %v2871_v34 = vpop.eup %2870  ;;  %v3952_v40 = vadd.f32 1.0, %v2869_v23  ;;  %vm1720_vm15 = vweird.f32 %v1713_v8 }
 0x4c5   :  { %2878 = vrcp.f32 %v1714_v62  ;;  %v2873_v18 = vpop.eup %2872  ;;  %v3954_v61 = vadd.f32 1.0, %v2871_v34  ;;  %v1739_v58 = vand.u32 2147483647, %v1714_v62  ;;  %vm3962_vm9 = vcmp.eq.f32.partialorder %v1724_v14, 8.507059e+37 }
 0x4c6   :  { %2880 = vrcp.f32 %v3952_v40  ;;  %v2875_v31 = vpop.eup %2874  ;;  %v3958_v38 = vadd.f32 1.0, %v2873_v18  ;;  %v1741_v16 = vand.u32 2147483648, %v1714_v62  ;;  %vm1735_vm13 = vweird.f32 %v1714_v62 }
 0x4c7   :  { %2882 = vrcp.f32 %v3954_v61  ;;  %v3960_v2 = vadd.f32 1.0, %v2875_v31  ;;  %v1727_v39 = vor.u32 1.1754944e-38, %v1726_v45  ;;  %vm3968_vm10 = vcmp.eq.f32.partialorder %v1739_v58, 8.507059e+37 }
 0x4c8   :  { %2884 = vtanh.f32 %v1789_v30  ;;  %vm1764_vm6 = vweird.f32 %v3952_v40  ;;  %v1768_v32 = vand.u32 2147483647, %v3952_v40  ;;  %v1742_v7 = vor.u32 1.1754944e-38, %v1741_v16 }
 0x4c9   :  { %v2877_v4 = vpop.eup %2876  ;;  %2886 = vtanh.f32 %v1790_v10  ;;  %v1770_v0 = vand.u32 2147483648, %v3952_v40  ;;  %vm1779_vm14 = vweird.f32 %v3954_v61  ;;  %v1783_v44 = vand.u32 2147483647, %v3954_v61 }
 0x4ca   :  { %v1716_v25 = vmul.f32 %v2877_v4, %v1713_v8  ;;  %2888 = vrcp.f32 %v3958_v38  ;;  %vm1721_vm12 = vweird.f32 %v2877_v4  ;;  %v1785_v34 = vand.u32 2147483648, %v3954_v61 }
 0x4cb   :  { %v2879_v56 = vpop.eup %2878  ;;  %2890 = vrcp.f32 %v3960_v2  ;;  %vm3979_vm11 = vmor %vm1720_vm15, %vm1721_vm12 }
 0x4cc   :  { %v2881_v12 = vpop.eup %2880  ;;  %v1717_v42 = vsub.f32 1.0, %v1716_v25  ;;  %v1731_v57 = vmul.f32 %v2879_v56, %v1714_v62  ;;  %vm1736_vm0 = vweird.f32 %v2879_v56  ;;  %v1786_v29 = vor.u32 1.1754944e-38, %v1785_v34 }
 0x4cd   :  { %v1760_v37 = vmul.f32 %v2881_v12, %v3952_v40  ;;  %v2883_v55 = vpop.eup %2882  ;;  %vm1765_vm7 = vweird.f32 %v2881_v12  ;;  %vm1737_vm8 = vmor %vm1735_vm13, %vm1736_vm0 }
 0x4ce   :  { %v1718_v59 = vmul.f32 %v2877_v4, %v1717_v42  ;;  %v1732_v24 = vsub.f32 1.0, %v1731_v57  ;;  %v2885_v52 = vpop.eup %2884  ;;  %v1775_v5 = vmul.f32 %v2883_v55, %v3954_v61  ;;  %vm1780_vm15 = vweird.f32 %v2883_v55  ;;  %vm1766_vm12 = vmor %vm1764_vm6, %vm1765_vm7 }
 0x4cf   :  { %v1761_v47 = vsub.f32 1.0, %v1760_v37  ;;  %v2887_v51 = vpop.eup %2886  ;;  %vm1781_vm13 = vmor %vm1779_vm14, %vm1780_vm15  ;;  %v1818_v61 = vand.u32 2147483648, %v3958_v38  ;;  %vm1812_vm6 = vweird.f32 %v3958_v38  ;;  %vm1827_vm7 = vweird.f32 %v3960_v2 }
 0x4d0   :  { %v1719_v20 = vadd.f32 %v2877_v4, %v1718_v59  ;;  %v1733_v41 = vmul.f32 %v2879_v56, %v1732_v24  ;;  %v2889_v54 = vpop.eup %2888  ;;  %v1776_v21 = vsub.f32 1.0, %v1775_v5 }
 0x4d1   :  { %v1762_v9 = vmul.f32 %v2881_v12, %v1761_v47  ;;  %v2891_v60 = vpop.eup %2890  ;;  %v1808_v30 = vmul.f32 %v2889_v54, %v3958_v38  ;;  %v1831_v47 = vand.u32 2147483647, %v3960_v2 }
 0x4d2   :  { %v1723_v1 = vsel %vm3979_vm11, %v2877_v4, %v1719_v20  ;;  %v1734_v23 = vadd.f32 %v2879_v56, %v1733_v41  ;;  %v1777_v18 = vmul.f32 %v2883_v55, %v1776_v21  ;;  %v1823_v10 = vmul.f32 %v2891_v60, %v3960_v2 }
 0x4d3   :  { %v1763_v8 = vadd.f32 %v2881_v12, %v1762_v9  ;;  %v1728_v31 = vsel %vm3962_vm9, %v1727_v39, %v1723_v1  ;;  %v1771_v4 = vor.u32 1.1754944e-38, %v1770_v0  ;;  %v1809_v45 = vsub.f32 1.0, %v1808_v30 }
 0x4d4   :  { %v1738_v14 = vsel %vm1737_vm8, %v2879_v56, %v1734_v23  ;;  %vm1769_vm11 = vcmp.eq.f32.partialorder %v1768_v32, 8.507059e+37  ;;  %v1778_v25 = vadd.f32 %v2883_v55, %v1777_v18  ;;  %v1824_v62 = vsub.f32 1.0, %v1823_v10 }
 0x4d5   :  { %v1767_v58 = vsel %vm1766_vm12, %v2881_v12, %v1763_v8  ;;  %v1743_v16 = vsel %vm3968_vm10, %v1742_v7, %v1738_v14  ;;  %v1810_v57 = vmul.f32 %v2889_v54, %v1809_v45  ;;  %vm1784_vm9 = vcmp.eq.f32.partialorder %v1783_v44, 8.507059e+37  ;;  %v2970_v8 = vld [vmem:[%s4203_s4 + $0x30] sm:$0xff] }
 0x4d6   :  { %v1772_v42 = vsel %vm1769_vm11, %v1771_v4, %v1767_v58  ;;  %v1782_v56 = vsel %vm1781_vm13, %v2883_v55, %v1778_v25  ;;  %v1839_v39 = vmul.f32 %v2885_v52, %v1728_v31  ;;  %v1825_v59 = vmul.f32 %v2891_v60, %v1824_v62  ;;  %v1877_v25 = vld [vmem:[#allocation2 + $0x6] ss:$8 sm:$0xf] }
 0x4d7   :  { %v1837_v40 = vmul.f32 %v1772_v42, %v3892_v46  ;;  %v1787_v37 = vsel %vm1784_vm9, %v1786_v29, %v1782_v56  ;;  %v1840_v24 = vmul.f32 %v2887_v51, %v1743_v16  ;;  %v1811_v13 = vadd.f32 %v2889_v54, %v1810_v57  ;;  %v1879_v57 = vld [vmem:[#allocation2 + $0x26] ss:$8 sm:$0xf] }
 0x4d8   :  { %v1838_v12 = vmul.f32 %v1787_v37, %v3894_v19  ;;  %vm1813_vm10 = vweird.f32 %v2889_v54  ;;  %v1816_v46 = vand.u32 2147483647, %v3958_v38  ;;  %v1826_v55 = vadd.f32 %v2891_v60, %v1825_v59 }
 0x4d9   :  { %v4001_v32 = vadd.f32 %v1839_v39, %v1837_v40  ;;  %vm1828_vm0 = vweird.f32 %v2891_v60  ;;  %vm1814_vm14 = vmor %vm1812_vm6, %vm1813_vm10  ;;  %v1833_v19 = vand.u32 2147483648, %v3960_v2  ;;  %v1819_v0 = vor.u32 1.1754944e-38, %v1818_v61 }
 0x4da   :  { %v4003_v7 = vadd.f32 %v1840_v24, %v1838_v12  ;;  %v1815_v52 = vsel %vm1814_vm14, %v2889_v54, %v1811_v13  ;;  %vm1829_vm8 = vmor %vm1827_vm7, %vm1828_vm0  ;;  %vm1817_vm15 = vcmp.eq.f32.partialorder %v1816_v46, 8.507059e+37  ;;  %vm1832_vm12 = vcmp.eq.f32.partialorder %v1831_v47, 8.507059e+37 }
 0x4db   :  { %2892 = vtanh.f32 %v4001_v32  ;;  %v1830_v5 = vsel %vm1829_vm8, %v2891_v60, %v1826_v55  ;;  %v1820_v20 = vsel %vm1817_vm15, %v1819_v0, %v1815_v52  ;;  %v1834_v41 = vor.u32 1.1754944e-38, %v1833_v19  ;;  %v2969_v60 = vld [vmem:[%s4203_s4 + $0x38] sm:$0xff] }
 0x4dc   :  { %2894 = vtanh.f32 %v4003_v7  ;;  %vm1631_vm11 = vcmask 648704   ;;  %vm4356_vm13 = vcmask 1042433  }
 0x4dd   :  { %v1835_v9 = vsel %vm1832_vm12, %v1834_v41, %v1830_v5 }
 0x4e1   :  { %v2893_v51 = vpop.eup %2892 }
 0x4e2   :  { %v1845_v38 = vmul.f32 %v2893_v51, %v1820_v20  ;;  %v2895_v48 = vpop.eup %2894 }
 0x4e3   :  { %v1846_v21 = vmul.f32 %v2895_v48, %v1835_v9 }
 0x4e4   :  { %v1847_v44 = vpack.c.bf16 %v1845_v38, %v1845_v38 }
 0x4e5   :  { %v1848_v1 = vpack.c.bf16 %v1846_v21, %v1846_v21 }
 0x4e6   :  { %v1851_v54 = vunpack.c.l.b16 %v1847_v44 }
 0x4e7   :  { %v1852_v23 = vunpack.c.l.b16 %v1848_v1 }
 0x4e9   :  { %v1853_v34 = vrot.slane %v1852_v23, 7 }
 0x4eb   :  { %v1854_v30 = vsel %vm431_vm2, %v1853_v34, %v1851_v54 }
 0x4ec   :  { %v1855_v2 = vpack.c.b16 %v1854_v30, %v1854_v30 }
 0x4ee   :  { %1865 = vmatmul.bf16.vlgmr.msra.gmra.mxu1 %v1855_v2  ;;  %1888 = vmatmul.bf16.vlgmr.msra.gmra.mxu2 %v1855_v2 }
 0x4ef   :  { %1901 = vmatmul.bf16.vlgmr.msra.gmra.mxu3 %v1855_v2  ;;  %1914 = vmatmul.bf16.vlgmr.msrb.gmra.mxu0 %v1855_v2 }
 0x4f0   :  { %2149 = vmatpush.bf16.msra.mxu1 %v3109_v22  ;;  %2162 = vmatpush.bf16.msra.mxu2 %v3113_v26  ;;  %v2971_v22 = vld [vmem:[%s4203_s4 + $0x28] sm:$0xff]  ;;  %v2972_v26 = vld [vmem:[%s4203_s4 + $0x20] sm:$0xff] }
 0x4f1   :  { %2347 = vmatpush.bf16.msra.mxu3 %v2969_v60 }
 0x4f4   :  { %2150 = vmatpush.bf16.msra.mxu1 %v3121_v35  ;;  %2163 = vmatpush.bf16.msra.mxu2 %v3123_v36  ;;  %v2973_v35 = vld [vmem:[%s4203_s4 + $0x18] sm:$0xff]  ;;  %v2974_v36 = vld [vmem:[%s4203_s4 + $0x10] sm:$0xff] }
 0x4f5   :  { %2348 = vmatpush.bf16.msra.mxu3 %v2970_v8 }
 0x4f8   :  { %2151 = vmatpush.bf16.msra.mxu1 %v3139_v49  ;;  %2164 = vmatpush.bf16.msra.mxu2 %v3143_v53  ;;  %v2975_v49 = vld [vmem:[%s4203_s4 + $0x8] sm:$0xff]  ;;  %v2976_v53 = vld [vmem:[%s4203_s4] sm:$0xff] }
 0x4f9   :  { %2349 = vmatpush.bf16.msra.mxu3 %v2971_v22 }
 0x4fc   :  { %2152 = vmatpush.bf16.msra.mxu1 %v3154_v63  ;;  %2165 = vmatpush.bf16.msra.mxu2 %v3157_v3 }
 0x4fd   :  { %2350 = vmatpush.bf16.msra.mxu3 %v2972_v26 }
 0x4fe   :  { %1927 = vmatmul.bf16.vlgmr.msrb.gmra.mxu1 %v1855_v2 }
 0x500   :  { %2153 = vmatpush.bf16.msra.mxu1 %v3166_v11  ;;  %2166 = vmatpush.bf16.msra.mxu2 %v3169_v15 }
 0x501   :  { %2351 = vmatpush.bf16.msra.mxu3 %v2973_v35 }
 0x504   :  { %2154 = vmatpush.bf16.msra.mxu1 %v3178_v28  ;;  %2167 = vmatpush.bf16.msra.mxu2 %v3181_v33 }
 0x505   :  { %2352 = vmatpush.bf16.msra.mxu3 %v2974_v36 }
 0x508   :  { %2155 = vmatpush.bf16.msra.mxu1 %v3190_v43  ;;  %2168 = vmatpush.bf16.msra.mxu2 %v3193_v50 }
 0x509   :  { %2353 = vmatpush.bf16.msra.mxu3 %v2975_v49 }
 0x50c   :  { %2156 = vmatpush.bf16.msra.mxu1 %v4336_v17  ;;  %2169 = vmatpush.bf16.msra.mxu2 %v4337_v27 }
 0x50d   :  { %2354 = vmatpush.bf16.msra.mxu3 %v2976_v53 }
 0x516   :  { %v1629_v63 = vpop.permute.xlu1 %1628 }
 0x517   :  { %1632 = vst.msk [vmem:[#allocation8] sm:$0x3] %vm1631_vm11, %v1629_v63 }
 0x56b   :  { %v1866_v3 = vpop.f32.mrf.mxu1 }
 0x56c   :  { %v1867_v11 = vadd.f32 %v4348_v6, %v1866_v3  ;;  %v1915_v15 = vpop.f32.mrf.mxu0 }
 0x56d   :  { %v1937_v31 = vrot.slane %v1915_v15, 6 }
 0x56e   :  { %1871 = vrot.lane.b32.xlu2 %v1867_v11, %s3038_s22 }
 0x571   :  { %v1889_v28 = vpop.f32.mrf.mxu2 }
 0x572   :  { %v1902_v33 = vpop.f32.mrf.mxu3 }
 0x573   :  { %v1868_v43 = vpop.f32.mrf.mxu1  ;;  %v1936_v27 = vrot.slane %v1902_v33, 7 }
 0x574   :  { %v1917_v50 = vpop.f32.mrf.mxu0 }
 0x575   :  { %v1939_v4 = vsel %vm425_vm1, %v1889_v28, %v1936_v27  ;;  %v1942_v45 = vsel %vm431_vm2, %v1889_v28, %v1936_v27 }
 0x579   :  { %v1891_v17 = vpop.f32.mrf.mxu2 }
 0x57a   :  { %v1904_v18 = vpop.f32.mrf.mxu3 }
 0x57b   :  { %v1928_v10 = vpop.f32.mrf.mxu1 }
 0x57c   :  { %v1938_v14 = vrot.slane %v1928_v10, 5 }
 0x57e   :  { %v1940_v58 = vsel %vm427_vm3, %v1937_v31, %v1938_v14  ;;  %v1943_v6 = vsel %vm433_vm5, %v1937_v31, %v1938_v14 }
 0x57f   :  { %v1941_v62 = vsel %vm429_vm4, %v1939_v4, %v1940_v58  ;;  %v1944_v16 = vsel %vm4356_vm13, %v1942_v45, %v1943_v6 }
 0x580   :  { %v1945_v42 = vrot.slane %v1944_v16, 1  ;;  %v1948_v29 = vadd.f32 %v1941_v62, %v1877_v25 }
 0x582   :  { %v1949_v56 = vadd.f32 %v1945_v42, %v1879_v57  ;;  %v2633_v40 = vmul.f32 -1.442695, %v1948_v29  ;;  %v1990_v39 = vrot.slane %v1948_v29, 1  ;;  %v2038_v37 = vrot.slane %v1948_v29, 3 }
 0x583   :  { %v1930_v59 = vpop.f32.mrf.mxu1  ;;  %v2032_v38 = vrot.slane %v1948_v29, 2 }
 0x584   :  { %2896 = vpow2.f32 %v2633_v40  ;;  %v2634_v12 = vmul.f32 -1.442695, %v1949_v56  ;;  %v1991_v24 = vrot.slane %v1949_v56, 1  ;;  %v2635_v13 = vmul.f32 -1.442695, %v1990_v39 }
 0x585   :  { %v2039_v61 = vrot.slane %v1949_v56, 3  ;;  %v2637_v55 = vmul.f32 -1.442695, %v2038_v37  ;;  %v2033_v21 = vrot.slane %v1949_v56, 2 }
 0x586   :  { %2898 = vpow2.f32 %v2634_v12  ;;  %v2636_v46 = vmul.f32 -1.442695, %v1991_v24 }
 0x587   :  { %2900 = vpow2.f32 %v2635_v13  ;;  %v2638_v19 = vmul.f32 -1.442695, %v2039_v61 }
 0x588   :  { %2902 = vpow2.f32 %v2636_v46 }
 0x589   :  { %2904 = vpow2.f32 %v2637_v55 }
 0x58a   :  { %v2897_v52 = vpop.eup %2896  ;;  %2906 = vpow2.f32 %v2638_v19 }
 0x58b   :  { %v1956_v47 = vadd.f32 1.0, %v2897_v52 }
 0x58c   :  { %v2899_v0 = vpop.eup %2898 }
 0x58d   :  { %v2901_v5 = vpop.eup %2900  ;;  %v1957_v51 = vadd.f32 1.0, %v2899_v0  ;;  %2908 = vrcp.f32 %v1956_v47  ;;  %v1967_v1 = vand.u32 2147483647, %v1956_v47  ;;  %v1969_v54 = vand.u32 2147483648, %v1956_v47 }
 0x58e   :  { %v2903_v20 = vpop.eup %2902  ;;  %v4061_v41 = vadd.f32 1.0, %v2901_v5  ;;  %vm1963_vm9 = vweird.f32 %v1956_v47 }
 0x58f   :  { %2910 = vrcp.f32 %v1957_v51  ;;  %v2905_v48 = vpop.eup %2904  ;;  %v4063_v9 = vadd.f32 1.0, %v2903_v20  ;;  %v1982_v34 = vand.u32 2147483647, %v1957_v51  ;;  %vm4071_vm10 = vcmp.eq.f32.partialorder %v1967_v1, 8.507059e+37 }
 0x590   :  { %2912 = vrcp.f32 %v4061_v41  ;;  %v2907_v44 = vpop.eup %2906  ;;  %v4067_v30 = vadd.f32 1.0, %v2905_v48  ;;  %v1984_v26 = vand.u32 2147483648, %v1957_v51  ;;  %vm1978_vm6 = vweird.f32 %v1957_v51 }
 0x591   :  { %2914 = vrcp.f32 %v4063_v9  ;;  %v4069_v60 = vadd.f32 1.0, %v2907_v44  ;;  %v1970_v53 = vor.u32 1.1754944e-38, %v1969_v54  ;;  %vm4077_vm0 = vcmp.eq.f32.partialorder %v1982_v34, 8.507059e+37 }
 0x592   :  { %2916 = vtanh.f32 %v2032_v38  ;;  %vm2007_vm14 = vweird.f32 %v4061_v41  ;;  %v2011_v33 = vand.u32 2147483647, %v4061_v41  ;;  %v1985_v50 = vor.u32 1.1754944e-38, %v1984_v26 }
 0x593   :  { %v2909_v23 = vpop.eup %2908  ;;  %2918 = vtanh.f32 %v2033_v21  ;;  %v2013_v27 = vand.u32 2147483648, %v4061_v41  ;;  %vm2022_vm15 = vweird.f32 %v4063_v9  ;;  %v2026_v25 = vand.u32 2147483647, %v4063_v9 }
 0x594   :  { %v1959_v2 = vmul.f32 %v2909_v23, %v1956_v47  ;;  %2920 = vrcp.f32 %v4067_v30  ;;  %vm1964_vm7 = vweird.f32 %v2909_v23  ;;  %v2028_v29 = vand.u32 2147483648, %v4063_v9 }
 0x595   :  { %v2911_v8 = vpop.eup %2910  ;;  %2922 = vrcp.f32 %v4069_v60  ;;  %vm4088_vm12 = vmor %vm1963_vm9, %vm1964_vm7  ;;  %v2014_v12 = vor.u32 1.1754944e-38, %v2013_v27  ;;  %v2074_v34 = vand.u32 2147483647, %v4069_v60 }
 0x596   :  { %v2913_v35 = vpop.eup %2912  ;;  %v1960_v36 = vsub.f32 1.0, %v1959_v2  ;;  %v1974_v49 = vmul.f32 %v2911_v8, %v1957_v51  ;;  %vm1979_vm8 = vweird.f32 %v2911_v8  ;;  %v2029_v52 = vor.u32 1.1754944e-38, %v2028_v29 }
 0x597   :  { %v2003_v3 = vmul.f32 %v2913_v35, %v4061_v41  ;;  %v2915_v11 = vpop.eup %2914  ;;  %vm2008_vm11 = vweird.f32 %v2913_v35  ;;  %vm1980_vm13 = vmor %vm1978_vm6, %vm1979_vm8 }
 0x598   :  { %v1961_v15 = vmul.f32 %v2909_v23, %v1960_v36  ;;  %v1975_v28 = vsub.f32 1.0, %v1974_v49  ;;  %v2917_v43 = vpop.eup %2916  ;;  %v2018_v18 = vmul.f32 %v2915_v11, %v4063_v9  ;;  %vm2023_vm9 = vweird.f32 %v2915_v11  ;;  %vm2009_vm7 = vmor %vm2007_vm14, %vm2008_vm11 }
 0x599   :  { %v2004_v17 = vsub.f32 1.0, %v2003_v3  ;;  %v2919_v10 = vpop.eup %2918  ;;  %vm2024_vm6 = vmor %vm2022_vm15, %vm2023_vm9  ;;  %v2061_v9 = vand.u32 2147483648, %v4067_v30  ;;  %vm2055_vm14 = vweird.f32 %v4067_v30  ;;  %vm2070_vm11 = vweird.f32 %v4069_v60 }
 0x59a   :  { %v1962_v31 = vadd.f32 %v2909_v23, %v1961_v15  ;;  %v1976_v14 = vmul.f32 %v2911_v8, %v1975_v28  ;;  %v2921_v4 = vpop.eup %2920  ;;  %v2019_v6 = vsub.f32 1.0, %v2018_v18 }
 0x59b   :  { %v2005_v58 = vmul.f32 %v2913_v35, %v2004_v17  ;;  %v2923_v62 = vpop.eup %2922  ;;  %v2051_v57 = vmul.f32 %v2921_v4, %v4067_v30  ;;  %v2062_v2 = vor.u32 1.1754944e-38, %v2061_v9 }
 0x59c   :  { %v1966_v16 = vsel %vm4088_vm12, %v2909_v23, %v1962_v31  ;;  %v1977_v42 = vadd.f32 %v2911_v8, %v1976_v14  ;;  %v2020_v40 = vmul.f32 %v2915_v11, %v2019_v6  ;;  %v2066_v39 = vmul.f32 %v2923_v62, %v4069_v60 }
 0x59d   :  { %v2006_v56 = vadd.f32 %v2913_v35, %v2005_v58  ;;  %v1971_v37 = vsel %vm4071_vm10, %v1970_v53, %v1966_v16  ;;  %v2052_v24 = vsub.f32 1.0, %v2051_v57  ;;  %vm2012_vm12 = vcmp.eq.f32.partialorder %v2011_v33, 8.507059e+37 }
 0x59e   :  { %v1981_v59 = vsel %vm1980_vm13, %v2911_v8, %v1977_v42  ;;  %v2021_v61 = vadd.f32 %v2915_v11, %v2020_v40  ;;  %v2067_v46 = vsub.f32 1.0, %v2066_v39  ;;  %vm2027_vm10 = vcmp.eq.f32.partialorder %v2026_v25, 8.507059e+37  ;;  %v2120_v40 = vld [vmem:[#allocation2 + $0x7] ss:$8 sm:$0xf] }
 0x59f   :  { %v2010_v13 = vsel %vm2009_vm7, %v2913_v35, %v2006_v56  ;;  %v1986_v55 = vsel %vm4077_vm0, %v1985_v50, %v1981_v59  ;;  %v2053_v47 = vmul.f32 %v2921_v4, %v2052_v24  ;;  %v2082_v51 = vmul.f32 %v2917_v43, %v1971_v37  ;;  %v2122_v24 = vld [vmem:[#allocation2 + $0x27] ss:$8 sm:$0xf] }
 0x5a0   :  { %v2015_v19 = vsel %vm2012_vm12, %v2014_v12, %v2010_v13  ;;  %v2025_v0 = vsel %vm2024_vm6, %v2915_v11, %v2021_v61  ;;  %v2068_v41 = vmul.f32 %v2923_v62, %v2067_v46  ;;  %v2083_v48 = vmul.f32 %v2919_v10, %v1986_v55  ;;  %v4126_v10 = vld [vmem:[%s4204_s5] ss:$0 sm:$0xff]  ;;  %s3040_s5 = smov 112  }
 0x5a1   :  { %v2080_v5 = vmul.f32 %v2015_v19, %v4001_v32  ;;  %v2030_v20 = vsel %vm2027_vm10, %v2029_v52, %v2025_v0  ;;  %v2054_v44 = vadd.f32 %v2921_v4, %v2053_v47  ;;  %vm2056_vm0 = vweird.f32 %v2921_v4 }
 0x5a2   :  { %v2081_v38 = vmul.f32 %v2030_v20, %v4003_v7  ;;  %v2059_v32 = vand.u32 2147483647, %v4067_v30  ;;  %v2069_v23 = vadd.f32 %v2923_v62, %v2068_v41  ;;  %vm2071_vm8 = vweird.f32 %v2923_v62  ;;  %vm2057_vm15 = vmor %vm2055_vm14, %vm2056_vm0 }
 0x5a3   :  { %v4110_v21 = vadd.f32 %v2082_v51, %v2080_v5  ;;  %v2076_v7 = vand.u32 2147483648, %v4069_v60  ;;  %v2058_v54 = vsel %vm2057_vm15, %v2921_v4, %v2054_v44  ;;  %vm2072_vm13 = vmor %vm2070_vm11, %vm2071_vm8  ;;  %vm2075_vm7 = vcmp.eq.f32.partialorder %v2074_v34, 8.507059e+37 }
 0x5a4   :  { %v4112_v1 = vadd.f32 %v2083_v48, %v2081_v38  ;;  %vm2060_vm9 = vcmp.eq.f32.partialorder %v2059_v32, 8.507059e+37  ;;  %v2073_v8 = vsel %vm2072_vm13, %v2923_v62, %v2069_v23  ;;  %vm1874_vm12 = vcmask 779904  }
 0x5a5   :  { %2924 = vtanh.f32 %v4110_v21  ;;  %v2063_v26 = vsel %vm2060_vm9, %v2062_v2, %v2058_v54  ;;  %v2077_v35 = vor.u32 1.1754944e-38, %v2076_v7  ;;  %vm4363_vm6 = vcmask 1042433  }
 0x5a6   :  { %2926 = vtanh.f32 %v4112_v1 }
 0x5a7   :  { %v2078_v49 = vsel %vm2075_vm7, %v2077_v35, %v2073_v8 }
 0x5ab   :  { %v2925_v22 = vpop.eup %2924 }
 0x5ac   :  { %v2088_v30 = vmul.f32 %v2925_v22, %v2063_v26  ;;  %v2927_v36 = vpop.eup %2926 }
 0x5ad   :  { %v2089_v53 = vmul.f32 %v2927_v36, %v2078_v49 }
 0x5ae   :  { %v2090_v63 = vpack.c.bf16 %v2088_v30, %v2088_v30 }
 0x5af   :  { %v2091_v3 = vpack.c.bf16 %v2089_v53, %v2089_v53 }
 0x5b0   :  { %v2094_v15 = vunpack.c.l.b16 %v2090_v63 }
 0x5b1   :  { %v2095_v11 = vunpack.c.l.b16 %v2091_v3 }
 0x5b3   :  { %v2096_v28 = vrot.slane %v2095_v11, 7 }
 0x5b5   :  { %v2097_v33 = vsel %vm431_vm2, %v2096_v28, %v2094_v15 }
 0x5b6   :  { %v2098_v60 = vpack.c.b16 %v2097_v33, %v2097_v33 }
 0x5b8   :  { %2108 = vmatmul.bf16.vlgmr.msrb.gmra.mxu2 %v2098_v60  ;;  %2131 = vmatmul.bf16.vlgmr.msrb.gmra.mxu3 %v2098_v60 }
 0x5b9   :  { %2144 = vmatmul.bf16.vlgmr.msra.gmra.mxu0 %v2098_v60  ;;  %2157 = vmatmul.bf16.vlgmr.msra.gmra.mxu1 %v2098_v60 }
 0x5c8   :  { %v1872_v43 = vpop.permute.xlu2 %1871  ;;  %2170 = vmatmul.bf16.vlgmr.msra.gmra.mxu2 %v2098_v60 }
 0x5c9   :  { %1875 = vst.msk [vmem:[#allocation8] sm:$0x3] %vm1874_vm12, %v1872_v43 }
 0x636   :  { %v2145_v50 = vpop.f32.mrf.mxu0  ;;  %v2158_v17 = vpop.f32.mrf.mxu1 }
 0x637   :  { %v2179_v25 = vrot.slane %v2145_v50, 7  ;;  %v2180_v62 = vrot.slane %v2158_v17, 6 }
 0x63b   :  { %v2109_v27 = vpop.f32.mrf.mxu2  ;;  %v2132_v18 = vpop.f32.mrf.mxu3 }
 0x63c   :  { %v2110_v31 = vadd.f32 %v4126_v10, %v2109_v27  ;;  %v2182_v42 = vsel %vm425_vm1, %v2132_v18, %v2179_v25  ;;  %v2185_v29 = vsel %vm431_vm2, %v2132_v18, %v2179_v25 }
 0x63e   :  { %v2147_v14 = vpop.f32.mrf.mxu0  ;;  %v2160_v4 = vpop.f32.mrf.mxu1  ;;  %2114 = vrot.lane.b32.xlu2 %v2110_v31, %s3039_s23 }
 0x643   :  { %v2111_v45 = vpop.f32.mrf.mxu2  ;;  %v2134_v58 = vpop.f32.mrf.mxu3 }
 0x64b   :  { %v2171_v6 = vpop.f32.mrf.mxu2 }
 0x64c   :  { %v2181_v16 = vrot.slane %v2171_v6, 5 }
 0x64e   :  { %v2183_v57 = vsel %vm427_vm3, %v2180_v62, %v2181_v16  ;;  %v2186_v56 = vsel %vm433_vm5, %v2180_v62, %v2181_v16 }
 0x64f   :  { %v2184_v39 = vsel %vm429_vm4, %v2182_v42, %v2183_v57  ;;  %v2187_v37 = vsel %vm4363_vm6, %v2185_v29, %v2186_v56 }
 0x650   :  { %v2188_v59 = vrot.slane %v2187_v37, 1  ;;  %v2191_v12 = vadd.f32 %v2184_v39, %v2120_v40 }
 0x652   :  { %v2192_v13 = vadd.f32 %v2188_v59, %v2122_v24  ;;  %v2639_v61 = vmul.f32 -1.442695, %v2191_v12  ;;  %v2233_v46 = vrot.slane %v2191_v12, 1  ;;  %v2281_v55 = vrot.slane %v2191_v12, 3 }
 0x653   :  { %v2173_v19 = vpop.f32.mrf.mxu2  ;;  %v2275_v54 = vrot.slane %v2191_v12, 2 }
 0x654   :  { %2928 = vpow2.f32 %v2639_v61  ;;  %v2640_v52 = vmul.f32 -1.442695, %v2192_v13  ;;  %v2234_v47 = vrot.slane %v2192_v13, 1  ;;  %v2641_v0 = vmul.f32 -1.442695, %v2233_v46 }
 0x655   :  { %v2282_v5 = vrot.slane %v2192_v13, 3  ;;  %v2643_v20 = vmul.f32 -1.442695, %v2281_v55  ;;  %v2276_v8 = vrot.slane %v2192_v13, 2 }
 0x656   :  { %2930 = vpow2.f32 %v2640_v52  ;;  %v2642_v51 = vmul.f32 -1.442695, %v2234_v47 }
 0x657   :  { %2932 = vpow2.f32 %v2641_v0  ;;  %v2644_v41 = vmul.f32 -1.442695, %v2282_v5 }
 0x658   :  { %2934 = vpow2.f32 %v2642_v51 }
 0x659   :  { %2936 = vpow2.f32 %v2643_v20 }
 0x65a   :  { %v2929_v38 = vpop.eup %2928  ;;  %2938 = vpow2.f32 %v2644_v41 }
 0x65b   :  { %v2199_v48 = vadd.f32 1.0, %v2929_v38 }
 0x65c   :  { %v2931_v44 = vpop.eup %2930 }
 0x65d   :  { %v2933_v9 = vpop.eup %2932  ;;  %v2200_v32 = vadd.f32 1.0, %v2931_v44  ;;  %2940 = vrcp.f32 %v2199_v48  ;;  %v2210_v26 = vand.u32 2147483647, %v2199_v48  ;;  %v2212_v30 = vand.u32 2147483648, %v2199_v48 }
 0x65e   :  { %v2935_v23 = vpop.eup %2934  ;;  %v4135_v7 = vadd.f32 1.0, %v2933_v9  ;;  %vm2206_vm3 = vweird.f32 %v2199_v48 }
 0x65f   :  { %2942 = vrcp.f32 %v2200_v32  ;;  %v2937_v34 = vpop.eup %2936  ;;  %v4137_v2 = vadd.f32 1.0, %v2935_v23  ;;  %v2225_v36 = vand.u32 2147483647, %v2200_v32  ;;  %vm4145_vm4 = vcmp.eq.f32.partialorder %v2210_v26, 8.507059e+37 }
 0x660   :  { %2944 = vrcp.f32 %v4135_v7  ;;  %v2939_v22 = vpop.eup %2938  ;;  %v4141_v49 = vadd.f32 1.0, %v2937_v34  ;;  %v2227_v15 = vand.u32 2147483648, %v2200_v32  ;;  %vm2221_vm5 = vweird.f32 %v2200_v32 }
 0x661   :  { %2946 = vrcp.f32 %v4137_v2  ;;  %v4143_v63 = vadd.f32 1.0, %v2939_v22  ;;  %v2213_v43 = vor.u32 1.1754944e-38, %v2212_v30  ;;  %vm4151_vm10 = vcmp.eq.f32.partialorder %v2225_v36, 8.507059e+37 }
 0x662   :  { %2948 = vtanh.f32 %v2275_v54  ;;  %vm2250_vm0 = vweird.f32 %v4135_v7  ;;  %v2254_v14 = vand.u32 2147483647, %v4135_v7  ;;  %v2228_v45 = vor.u32 1.1754944e-38, %v2227_v15 }
 0x663   :  { %v2941_v35 = vpop.eup %2940  ;;  %2950 = vtanh.f32 %v2276_v8  ;;  %v2256_v6 = vand.u32 2147483648, %v4135_v7  ;;  %vm2265_vm15 = vweird.f32 %v4137_v2  ;;  %v2269_v39 = vand.u32 2147483647, %v4137_v2 }
 0x664   :  { %v2202_v53 = vmul.f32 %v2941_v35, %v2199_v48  ;;  %2952 = vrcp.f32 %v4141_v49  ;;  %vm2207_vm14 = vweird.f32 %v2941_v35  ;;  %v2271_v24 = vand.u32 2147483648, %v4137_v2 }
 0x665   :  { %v2943_v3 = vpop.eup %2942  ;;  %2954 = vrcp.f32 %v4143_v63  ;;  %vm4162_vm11 = vmor %vm2206_vm3, %vm2207_vm14  ;;  %v2257_v47 = vor.u32 1.1754944e-38, %v2256_v6  ;;  %vm2255_vm6 = vcmp.eq.f32.partialorder %v2254_v14, 8.507059e+37  ;;  %v2304_v30 = vand.u32 2147483648, %v4141_v49 }
 0x666   :  { %v2945_v28 = vpop.eup %2944  ;;  %v2203_v33 = vsub.f32 1.0, %v2202_v53  ;;  %v2217_v60 = vmul.f32 %v2943_v3, %v2200_v32  ;;  %vm2222_vm8 = vweird.f32 %v2943_v3  ;;  %v2272_v48 = vor.u32 1.1754944e-38, %v2271_v24 }
 0x667   :  { %v2246_v17 = vmul.f32 %v2945_v28, %v4135_v7  ;;  %v2947_v27 = vpop.eup %2946  ;;  %vm2251_vm13 = vweird.f32 %v2945_v28  ;;  %vm2223_vm9 = vmor %vm2221_vm5, %vm2222_vm8  ;;  %vm2313_vm8 = vweird.f32 %v4143_v63 }
 0x668   :  { %v2204_v18 = vmul.f32 %v2941_v35, %v2203_v33  ;;  %v2218_v31 = vsub.f32 1.0, %v2217_v60  ;;  %v2949_v4 = vpop.eup %2948  ;;  %v2261_v25 = vmul.f32 %v2947_v27, %v4137_v2  ;;  %vm2266_vm7 = vweird.f32 %v2947_v27  ;;  %vm2252_vm12 = vmor %vm2250_vm0, %vm2251_vm13 }
 0x669   :  { %v2247_v58 = vsub.f32 1.0, %v2246_v17  ;;  %v2951_v62 = vpop.eup %2950  ;;  %vm2267_vm3 = vmor %vm2265_vm15, %vm2266_vm7  ;;  %v2302_v2 = vand.u32 2147483647, %v4141_v49 }
 0x66a   :  { %v2205_v16 = vadd.f32 %v2941_v35, %v2204_v18  ;;  %v2219_v42 = vmul.f32 %v2943_v3, %v2218_v31  ;;  %v2953_v29 = vpop.eup %2952  ;;  %v2262_v40 = vsub.f32 1.0, %v2261_v25 }
 0x66b   :  { %v2248_v56 = vmul.f32 %v2945_v28, %v2247_v58  ;;  %v2955_v37 = vpop.eup %2954  ;;  %v2294_v13 = vmul.f32 %v2953_v29, %v4141_v49  ;;  %vm2299_vm5 = vweird.f32 %v2953_v29 }
 0x66c   :  { %v2209_v59 = vsel %vm4162_vm11, %v2941_v35, %v2205_v16  ;;  %v2220_v12 = vadd.f32 %v2943_v3, %v2219_v42  ;;  %v2263_v46 = vmul.f32 %v2947_v27, %v2262_v40  ;;  %v2309_v55 = vmul.f32 %v2955_v37, %v4143_v63 }
 0x66d   :  { %v2249_v61 = vadd.f32 %v2945_v28, %v2248_v56  ;;  %v2214_v19 = vsel %vm4145_vm4, %v2213_v43, %v2209_v59  ;;  %v2295_v0 = vsub.f32 1.0, %v2294_v13  ;;  %vm2270_vm4 = vcmp.eq.f32.partialorder %v2269_v39, 8.507059e+37 }
 0x66e   :  { %v2224_v52 = vsel %vm2223_vm9, %v2943_v3, %v2220_v12  ;;  %v2264_v51 = vadd.f32 %v2947_v27, %v2263_v46  ;;  %v2310_v20 = vsub.f32 1.0, %v2309_v55  ;;  %v2325_v23 = vmul.f32 %v2949_v4, %v2214_v19 }
 0x66f   :  { %v2253_v5 = vsel %vm2252_vm12, %v2945_v28, %v2249_v61  ;;  %v2229_v41 = vsel %vm4151_vm10, %v2228_v45, %v2224_v52  ;;  %v2296_v44 = vmul.f32 %v2953_v29, %v2295_v0  ;;  %vm2298_vm10 = vweird.f32 %v4141_v49 }
 0x670   :  { %v2258_v38 = vsel %vm2255_vm6, %v2257_v47, %v2253_v5  ;;  %v2268_v9 = vsel %vm2267_vm3, %v2947_v27, %v2264_v51  ;;  %v2311_v54 = vmul.f32 %v2955_v37, %v2310_v20  ;;  %v2326_v8 = vmul.f32 %v2951_v62, %v2229_v41  ;;  %vm2300_vm14 = vmor %vm2298_vm10, %vm2299_vm5 }
 0x671   :  { %v2323_v32 = vmul.f32 %v2258_v38, %v4110_v21  ;;  %v2273_v7 = vsel %vm2270_vm4, %v2272_v48, %v2268_v9  ;;  %v2297_v26 = vadd.f32 %v2953_v29, %v2296_v44  ;;  %vm2314_vm0 = vweird.f32 %v2955_v37 }
 0x672   :  { %v2324_v34 = vmul.f32 %v2273_v7, %v4112_v1  ;;  %v2312_v36 = vadd.f32 %v2955_v37, %v2311_v54  ;;  %v2319_v21 = vand.u32 2147483648, %v4143_v63  ;;  %v2317_v1 = vand.u32 2147483647, %v4143_v63  ;;  %vm2315_vm15 = vmor %vm2313_vm8, %vm2314_vm0 }
 0x673   :  { %v2327_v22 = vadd.f32 %v2325_v23, %v2323_v32  ;;  %v2301_v53 = vsel %vm2300_vm14, %v2953_v29, %v2297_v26  ;;  %v2305_v3 = vor.u32 1.1754944e-38, %v2304_v30  ;;  %vm2303_vm11 = vcmp.eq.f32.partialorder %v2302_v2, 8.507059e+37 }
 0x674   :  { %v2328_v35 = vadd.f32 %v2326_v8, %v2324_v34  ;;  %v2316_v11 = vsel %vm2315_vm15, %v2955_v37, %v2312_v36  ;;  %v2320_v33 = vor.u32 1.1754944e-38, %v2319_v21  ;;  %vm2318_vm13 = vcmp.eq.f32.partialorder %v2317_v1, 8.507059e+37 }
 0x675   :  { %2956 = vtanh.f32 %v2327_v22  ;;  %v2306_v28 = vsel %vm2303_vm11, %v2305_v3, %v2301_v53  ;;  %vm2117_vm9 = vcmask 911104  }
 0x676   :  { %2958 = vtanh.f32 %v2328_v35  ;;  %v2321_v43 = vsel %vm2318_vm13, %v2320_v33, %v2316_v11 }
 0x67b   :  { %v2957_v15 = vpop.eup %2956 }
 0x67c   :  { %v2331_v49 = vmul.f32 %v2957_v15, %v2306_v28  ;;  %v2959_v60 = vpop.eup %2958 }
 0x67d   :  { %v2332_v50 = vmul.f32 %v2959_v60, %v2321_v43 }
 0x67e   :  { %v2333_v17 = vpack.c.bf16 %v2331_v49, %v2331_v49 }
 0x67f   :  { %v2334_v27 = vpack.c.bf16 %v2332_v50, %v2332_v50 }
 0x680   :  { %v2366_v18 = vrot.slane %v2333_v17, 3  ;;  %v2337_v31 = vunpack.c.l.b16 %v2333_v17 }
 0x681   :  { %v2338_v14 = vunpack.c.l.b16 %v2334_v27  ;;  %v2367_v4 = vrot.slane %v2334_v27, 3 }
 0x682   :  { %v2370_v63 = vsel %vm425_vm1, %v2333_v17, %v2366_v18  ;;  %v2645_v6 = vunpack.i.l.s16 %v2337_v31 }
 0x683   :  { %2374 = vst [vmem:[#allocation1] ss:$4 sm:$0xff] %v2370_v63  ;;  %v2646_v45 = vunpack.i.l.s16 %v2338_v14  ;;  %v2373_v58 = vsel %vm425_vm1, %v2334_v27, %v2367_v4 }
 0x684   :  { %2378 = vst [vmem:[#allocation1 + $0x20] ss:$4 sm:$0xff] %v2373_v58 }
 0x685   :  { %v2343_v25 = vrot.slane %v2646_v45, 7 }
 0x687   :  { %v2344_v62 = vsel %vm431_vm2, %v2343_v25, %v2645_v6 }
 0x688   :  { %v2345_v16 = vpack.c.b16 %v2344_v62, %v2344_v62 }
 0x68a   :  { %2355 = vmatmul.bf16.vlgmr.msra.gmra.mxu3 %v2345_v16  ;;  %v2375_v42 = vld [vmem:[#allocation1] sm:$0xf] }
 0x68b   :  { %v2379_v29 = vld [vmem:[#allocation1 + $0x20] sm:$0xf]  ;;  %2394 = vst [vmem:[#allocation1] ss:$9 sm:$0xff] %v2327_v22  ;;  %v2381_v56 = vunpack.c.l.b16 %v2375_v42 }
 0x68c   :  { %v2382_v57 = vunpack.c.l.b16 %v2379_v29  ;;  %2396 = vst [vmem:[#allocation1 + $0x1] ss:$9 sm:$0xff] %v2328_v35 }
 0x68e   :  { %v2383_v40 = vrot.slane %v2382_v57, 7 }
 0x690   :  { %v2384_v39 = vsel %vm431_vm2, %v2383_v40, %v2381_v56  ;;  %vm2364_vm2 = vcmask 1042304  }
 0x691   :  { %v2385_v37 = vpack.c.b16 %v2384_v39, %v2384_v39 }
 0x693   :  { %v2386_v59 = vrot.slane %v2385_v37, 3  ;;  %v2397_v12 = vld [vmem:[#allocation1] sm:$0xff] }
 0x694   :  { %2399 = vst [vmem:[#allocation4] sm:$0x3] %v2397_v12 }
 0x695   :  { %v2389_v24 = vsel %vm425_vm1, %v2385_v37, %v2386_v59 }
 0x696   :  { %2391 = vst [vmem:[#allocation3] sm:$0x1] %v2389_v24 }
 0x698   :  { %v2115_v13 = vpop.permute.xlu2 %2114 }
 0x699   :  { %2118 = vst.msk [vmem:[#allocation8] sm:$0x3] %vm2117_vm9, %v2115_v13 }
 0x70d   :  { %v2356_v61 = vpop.f32.mrf.mxu3 }
 0x70e   :  { %v2357_v46 = vadd.f32 %v4126_v10, %v2356_v61 }
 0x710   :  { %2361 = vrot.lane.b32.xlu0 %v2357_v46, %s3040_s5 }
 0x715   :  { %v2358_v55 = vpop.f32.mrf.mxu3 }
 0x782   :  { %v2362_v19 = vpop.permute.xlu0 %2361 }
 0x783   :  { %2365 = vst.msk [vmem:[#allocation8] sm:$0x3] %vm2364_vm2, %v2362_v19 }
 0x784   :  { %2410 = dma.vmem_to_hbm [thread:$0]  %s2406_s25, 32, %s2408_s29, [#allocation7]  }
 0x785   :  { %3028 = dma.done.wait [#allocation7], 32  }
 0x786   :  { %3029 = vsyncadd [#allocation7], 4294967264 }
 0x787   :  { %2415 = vsyncpa [#allocation6], 1 }
 0x788   :  { %2416 = vsyncpa [#allocation7], 1 }

</bundles_post_ra>
